<compile_context>
chip_gen: v6e
topology: v6e:2x2x1
jax: 0.10.0
libtpu: 0.0.40
codegen_flags: <defaults>
</compile_context>

<pallas_src>
import numpy as np

import jax
import jax.numpy as jnp
from jax.experimental import pallas as pl
from jax.experimental.pallas import tpu as pltpu

EPS = 1e-5                      # PyTorch GroupNorm default eps
CDT = jnp.bfloat16              # MXU operand / inter-kernel activation dtype


def _cparams():
    return pltpu.CompilerParams(
        dimension_semantics=("parallel",),      # batch axis -> 2 TCs on v7x
        vmem_limit_bytes=32 * 1024 * 1024)


# ----------------------------------------------------------------------------
# In-kernel building blocks
# ----------------------------------------------------------------------------
def _conv3x3_band(x, w_ref, lout):
    """3x3 conv (pad=1) over a lane-flat (H, W*Cin) slab.

    x:     (H, K) bf16 rows (K = W*Cin; kernel-column structure & W-padding are
           folded into the banded weight).
    w_ref: (K, 3*lout) bf16, the three kernel rows merged along N -> one dot.
    Returns (H, lout) f32.
    """
    y3 = jnp.dot(x, w_ref[...], preferred_element_type=jnp.float32)
    h = x.shape[0]
    top, mid, bot = y3[:, :lout], y3[:, lout:2 * lout], y3[:, 2 * lout:]
    z = jnp.zeros((1, lout), jnp.float32)
    # out[i] = mid[i] + top[i-1] + bot[i+1]   (zero rows == height padding)
    return (mid
            + jnp.concatenate([z, top[:h - 1, :]], axis=0)
            + jnp.concatenate([bot[1:, :], z], axis=0))


def _bias_relu_gn(y, e_ref, r_ref, rt_ref, inv_cnt):
    """bias + ReLU + GroupNorm epilogue (all f32, two-pass statistics).

    e_ref:  (3, L) rows = [bias, gamma, beta] (lane-tiled per channel)
    r_ref:  (L, G) 0/1 lane->group reduce matrix; rt_ref: (G, L) broadcast-back.
    inv_cnt = 1 / (H * W * channels_per_group).
    """
    y = jnp.maximum(y + e_ref[0:1, :], 0.0)                       # bias + ReLU
    s1 = jnp.sum(y, axis=0, keepdims=True)
    mean = jnp.dot(
        jnp.dot(s1, r_ref[...], preferred_element_type=jnp.float32) * inv_cnt,
        rt_ref[...], preferred_element_type=jnp.float32)
    d = y - mean
    s2 = jnp.sum(d * d, axis=0, keepdims=True)
    var = jnp.dot(
        jnp.dot(s2, r_ref[...], preferred_element_type=jnp.float32) * inv_cnt,
        rt_ref[...], preferred_element_type=jnp.float32)
    return d * jax.lax.rsqrt(var + EPS) * e_ref[1:2, :] + e_ref[2:3, :]


# ----------------------------------------------------------------------------
# Fused kernels
# ----------------------------------------------------------------------------
def _make_down_kernel(lout, inv_cnt, pool, l_pool, tail, out_dtype):
    """[maxpool2x2] -> conv+ReLU+GN -> conv+ReLU+GN [-> ConvTranspose tail]."""

    def kernel(*refs):
        it = iter(refs)
        x_ref = next(it)
        se_ref = next(it) if pool else None
        so_ref = next(it) if pool else None
        w1_ref, e1_ref = next(it), next(it)
        w2_ref, e2_ref = next(it), next(it)
        r_ref, rt_ref = next(it), next(it)
        wt_ref = next(it) if tail else None
        bt_ref = next(it) if tail else None
        o_ref = next(it)

        x = x_ref[0]
        if pool:
            # The 2x1 row pool was prepared by a free HBM reshape
            # (N,2H,L)->(N,H,2L): lanes [:l_pool] = even rows, [l_pool:] = odd.
            yh = jnp.maximum(x[:, :l_pool], x[:, l_pool:])
            # 1x2 column pool: two 0/1 lane-select matmuls + elementwise max.
            x = jnp.maximum(
                jnp.dot(yh, se_ref[...], preferred_element_type=jnp.float32),
                jnp.dot(yh, so_ref[...], preferred_element_type=jnp.float32),
            ).astype(CDT)
        else:
            x = x.astype(CDT)

        y = _bias_relu_gn(_conv3x3_band(x, w1_ref, lout),
                          e1_ref, r_ref, rt_ref, inv_cnt)
        # TODO(synk): nn.Dropout2d is stochastic; identity here (inference mode).
        y = _bias_relu_gn(_conv3x3_band(y.astype(CDT), w2_ref, lout),
                          e2_ref, r_ref, rt_ref, inv_cnt)

        if tail:
            # ConvTranspose2d(k=2,s=2) emitted in (H, 2*L_up) row-pair layout;
            # the caller's free reshape interleaves even/odd output rows.
            o_ref[0] = (jnp.dot(y.astype(CDT), wt_ref[...],
                                preferred_element_type=jnp.float32)
                        + bt_ref[...]).astype(out_dtype)
        else:
            o_ref[0] = y.astype(out_dtype)

    return kernel


def _make_up_kernel(lout, inv_cnt, out_dtype):
    """concat(skip, up) -> conv+ReLU+GN -> conv+ReLU+GN -> linear tail
    (tail = next decoder step's ConvTranspose, or the final 1x1 output conv)."""

    def kernel(skip_ref, up_ref, w1_ref, e1_ref, w2_ref, e2_ref, r_ref, rt_ref,
               wt_ref, bt_ref, o_ref):
        xc = jnp.concatenate([skip_ref[0], up_ref[0]], axis=-1)    # lane concat
        y = _bias_relu_gn(_conv3x3_band(xc, w1_ref, lout),
                          e1_ref, r_ref, rt_ref, inv_cnt)
        y = _bias_relu_gn(_conv3x3_band(y.astype(CDT), w2_ref, lout),
                          e2_ref, r_ref, rt_ref, inv_cnt)
        o_ref[0] = (jnp.dot(y.astype(CDT), wt_ref[...],
                            preferred_element_type=jnp.float32)
                    + bt_ref[...]).astype(out_dtype)

    return kernel


# ----------------------------------------------------------------------------
# pallas_call wrappers
# ----------------------------------------------------------------------------
def down_level(x, p):
    n, h, l_in = x.shape
    pool = "se" in p
    tail = "wt" in p
    lout = p["e1"].shape[-1]
    groups = p["r"].shape[1]
    inv_cnt = float(groups) / float(h * lout)          # 1 / (H * W * cpg)
    l_pool = p["se"].shape[0] if pool else 0
    l_out = p["wt"].shape[-1] if tail else lout

    names = ((("se", "so") if pool else ())
             + ("w1", "e1", "w2", "e2", "r", "rt")
             + (("wt", "bt") if tail else ()))
    args = [x] + [p[k] for k in names]
    in_specs = [pl.BlockSpec((1, h, l_in), lambda i: (i, 0, 0))]
    in_specs += [pl.BlockSpec(p[k].shape, lambda i: (0, 0)) for k in names]

    return pl.pallas_call(
        _make_down_kernel(lout, inv_cnt, pool, l_pool, tail, CDT),
        out_shape=jax.ShapeDtypeStruct((n, h, l_out), CDT),
        grid=(n,),
        in_specs=in_specs,
        out_specs=pl.BlockSpec((1, h, l_out), lambda i: (i, 0, 0)),
        compiler_params=_cparams(),
    )(*args)


def up_level(skip, up, p, out_dtype):
    n, h, l_skip = skip.shape
    l_up = up.shape[-1]
    lout = p["e1"].shape[-1]
    groups = p["r"].shape[1]
    inv_cnt = float(groups) / float(h * lout)
    l_out = p["wt"].shape[-1]

    names = ("w1", "e1", "w2", "e2", "r", "rt", "wt", "bt")
    args = [skip, up] + [p[k] for k in names]
    in_specs = ([pl.BlockSpec((1, h, l_skip), lambda i: (i, 0, 0)),
                 pl.BlockSpec((1, h, l_up), lambda i: (i, 0, 0))]
                + [pl.BlockSpec(p[k].shape, lambda i: (0, 0)) for k in names])

    return pl.pallas_call(
        _make_up_kernel(lout, inv_cnt, out_dtype),
        out_shape=jax.ShapeDtypeStruct((n, h, l_out), out_dtype),
        grid=(n,),
        in_specs=in_specs,
        out_specs=pl.BlockSpec((1, h, l_out), lambda i: (i, 0, 0)),
        compiler_params=_cparams(),
    )(*args)


# ----------------------------------------------------------------------------
# Model assembly
# ----------------------------------------------------------------------------
def unet_forward(params, x_nchw):
    n, c, h, w = x_nchw.shape
    # TODO(synk): fold these boundary NCHW<->lane-flat transposes into the
    #             first / last kernels' index math.
    x = jnp.transpose(x_nchw, (0, 2, 3, 1)).reshape(n, h, w * c)

    down = params["down"]
    skips = []
    y = None
    for li, p in enumerate(down):
        if li == 0:
            y = down_level(x, p)
        else:
            nb, hb, lb = y.shape
            # Free HBM view pairing adjacent rows for the 2x1 row pool.
            y = down_level(y.reshape(nb, hb // 2, 2 * lb), p)
        if li < len(down) - 1:
            skips.append(y)

    ups = params["up"]
    for k in reversed(range(len(ups))):
        nb, hb, lb = y.shape
        # Free HBM view interleaving even/odd ConvTranspose output rows.
        y = y.reshape(nb, 2 * hb, lb // 2)
        out_dtype = jnp.float32 if k == 0 else CDT
        y = up_level(skips.pop(), y, ups[k], out_dtype)

    classes = ups[0]["wt"].shape[-1] // w
    y = y.reshape(n, h, w, classes)
    return jnp.transpose(y, (0, 3, 1, 2))               # lane-flat -> NCHW


# ----------------------------------------------------------------------------
# Host-side parameter packing (banded / selection matrices, lane tiling)
# ----------------------------------------------------------------------------
def _band_conv3x3(w, width):
    """(3,3,cin,cout) -> (width*cin, 3*width*cout); W-padding folded in, the
    three kernel rows stacked along the output columns."""
    w = np.asarray(w, np.float32)
    cin, cout = w.shape[2], w.shape[3]
    wb = np.zeros((width * cin, 3 * width * cout), np.float32)
    for ky in range(3):
        base = ky * width * cout
        for kx in range(3):
            for jo in range(width):
                ji = jo + kx - 1
                if 0 <= ji < width:
                    wb[ji * cin:(ji + 1) * cin,
                       base + jo * cout: base + (jo + 1) * cout] = w[ky, kx]
    return wb


def _band_upconv2x2(w, width):
    """(2,2,cin,cout) -> (width*cin, 2*(2*width*cout)); dy parity blocks along
    columns so the caller's row-pair reshape interleaves output rows."""
    w = np.asarray(w, np.float32)
    cin, cout = w.shape[2], w.shape[3]
    l_hi = 2 * width * cout
    wb = np.zeros((width * cin, 2 * l_hi), np.float32)
    for dy in range(2):
        for dx in range(2):
            for j in range(width):
                wb[j * cin:(j + 1) * cin,
                   dy * l_hi + (2 * j + dx) * cout:
                   dy * l_hi + (2 * j + dx + 1) * cout] = w[dy, dx]
    return wb


def _band_conv1x1(w, width):
    w = np.asarray(w, np.float32)
    cin, cout = w.shape
    wb = np.zeros((width * cin, width * cout), np.float32)
    for j in range(width):
        wb[j * cin:(j + 1) * cin, j * cout:(j + 1) * cout] = w
    return wb


def _pool_col_select(c, width):
    """0/1 lane-select matrices picking even / odd pixel-channel blocks."""
    half = width // 2
    se = np.zeros((width * c, half * c), np.float32)
    so = np.zeros_like(se)
    eye = np.eye(c, dtype=np.float32)
    for j in range(half):
        se[(2 * j) * c:(2 * j + 1) * c, j * c:(j + 1) * c] = eye
        so[(2 * j + 1) * c:(2 * j + 2) * c, j * c:(j + 1) * c] = eye
    return se, so


def _gn_reduce_mats(cout, cpg, width):
    """(L, G) 0/1 lane->group reduce matrix and its (G, L) transpose."""
    groups = cout // cpg
    grp = (np.arange(width * cout) % cout) // cpg
    r = (grp[:, None] == np.arange(groups)[None, :]).astype(np.float32)
    return r, np.ascontiguousarray(r.T)


def _tile_row(v, reps):
    return np.tile(np.asarray(v, np.float32), reps)[None, :]


def _epilogue(b, cout, width):
    """(3, width*cout) f32: rows = [bias, gamma(=1), beta(=0)] lane-tiled."""
    return jnp.asarray(np.stack([
        np.tile(np.asarray(b, np.float32), width),
        np.tile(np.ones(cout, np.float32), width),
        np.tile(np.zeros(cout, np.float32), width)], axis=0))


def init_params(key, input_channels, output_classes, num_filters, cpg,
                height, width):
    assert len(num_filters) >= 2
    n_levels = len(num_filters)
    widths = [width >> i for i in range(n_levels)]
    keys = iter(jax.random.split(key, 16 * n_levels + 16))

    def uni(shape, fan_in):
        bound = float(1.0 / np.sqrt(fan_in))
        return np.asarray(jax.random.uniform(next(keys), shape, jnp.float32,
                                             -bound, bound))

    def cdt(a):
        return jnp.asarray(a, CDT)

    def f32(a):
        return jnp.asarray(a, jnp.float32)

    params = {"down": [], "up": []}

    cin = input_channels
    for li, f in enumerate(num_filters):
        wres = widths[li]
        w1 = uni((3, 3, cin, f), cin * 9)
        b1 = uni((f,), cin * 9)
        w2 = uni((3, 3, f, f), f * 9)
        b2 = uni((f,), f * 9)
        r, rt = _gn_reduce_mats(f, cpg, wres)
        p = {"w1": cdt(_band_conv3x3(w1, wres)), "e1": _epilogue(b1, f, wres),
             "w2": cdt(_band_conv3x3(w2, wres)), "e2": _epilogue(b2, f, wres),
             "r": f32(r), "rt": f32(rt)}
        if li > 0:
            se, so = _pool_col_select(num_filters[li - 1], widths[li - 1])
            p["se"], p["so"] = cdt(se), cdt(so)
        if li == n_levels - 1:
            # Tail: ConvTranspose2d(num_filters[li] -> num_filters[li-1], 2, 2)
            # of the first decoder step, fused into this (deepest) kernel.
            f_hi = num_filters[li - 1]
            wt = uni((2, 2, f, f_hi), f_hi * 4)     # PyTorch fan_in = out_ch*k*k
            bt = uni((f_hi,), f_hi * 4)
            p["wt"] = cdt(_band_upconv2x2(wt, wres))
            p["bt"] = f32(_tile_row(bt, 4 * wres))
        params["down"].append(p)
        cin = f

    for k in range(n_levels - 1):
        f_hi = num_filters[k]
        wres = widths[k]
        wd = uni((3, 3, 2 * f_hi, f_hi), 2 * f_hi * 9)
        bd = uni((f_hi,), 2 * f_hi * 9)
        w2 = uni((3, 3, f_hi, f_hi), f_hi * 9)
        b2 = uni((f_hi,), f_hi * 9)
        r, rt = _gn_reduce_mats(f_hi, cpg, wres)
        p = {"w1": cdt(np.concatenate(
                 [_band_conv3x3(wd[:, :, :f_hi, :], wres),     # skip channels
                  _band_conv3x3(wd[:, :, f_hi:, :], wres)],    # upsampled channels
                 axis=0)),
             "e1": _epilogue(bd, f_hi, wres),
             "w2": cdt(_band_conv3x3(w2, wres)), "e2": _epilogue(b2, f_hi, wres),
             "r": f32(r), "rt": f32(rt)}
        if k == 0:
            # Tail: final 1x1 output conv fused into the last decoder kernel.
            wo = uni((f_hi, output_classes), f_hi)
            bo = uni((output_classes,), f_hi)
            p["wt"] = cdt(_band_conv1x1(wo, wres))
            p["bt"] = f32(_tile_row(bo, wres))
        else:
            # Tail: next decoder step's ConvTranspose2d.
            f_hi2 = num_filters[k - 1]
            wt = uni((2, 2, f_hi, f_hi2), f_hi2 * 4)
            bt = uni((f_hi2,), f_hi2 * 4)
            p["wt"] = cdt(_band_upconv2x2(wt, wres))
            p["bt"] = f32(_tile_row(bt, 4 * wres))
        params["up"].append(p)

    return params


# ----------------------------------------------------------------------------
if __name__ == "__main__":
    key = jax.random.PRNGKey(0)
    kx, kp = jax.random.split(key)

    input_channels = 4
    output_classes = 3
    num_filters = [8, 16]
    channels_per_group = 4
    dropout = 0.1   # nn.Dropout2d == identity at inference

    n, h, w = 2, 16, 16
    x = jax.random.normal(kx, (n, input_channels, h, w), jnp.float32)
    params = init_params(kp, input_channels, output_classes, num_filters,
                         channels_per_group, h, w)

    fwd = jax.jit(unet_forward)
    out = fwd(params, x)
    jax.block_until_ready(out)
    assert out.shape == (n, output_classes, h, w), out.shape
    assert bool(jnp.all(jnp.isfinite(out)))
    print("KERNEL_OK")
</pallas_src>

<mosaic_0001>
module attributes {stable_mosaic.version = 11 : i64} {
  func.func @kernel(%arg0: i32, %arg1: memref<1x16x64xf32, #tpu.memory_space<vmem>>, %arg2: memref<64x384xbf16, #tpu.memory_space<vmem>>, %arg3: memref<3x128xf32, #tpu.memory_space<vmem>>, %arg4: memref<128x384xbf16, #tpu.memory_space<vmem>>, %arg5: memref<3x128xf32, #tpu.memory_space<vmem>>, %arg6: memref<128x2xf32, #tpu.memory_space<vmem>>, %arg7: memref<2x128xf32, #tpu.memory_space<vmem>>, %arg8: memref<1x16x128xbf16, #tpu.memory_space<vmem>>) attributes {dimension_semantics = [#tpu.dimension_semantics<parallel>], iteration_bounds = array<i64: 2>, scalar_prefetch = 0 : i64, scratch_operands = 0 : i64, tpu.core_type = #tpu.core_type<tc>, window_params = [{transform_indices = @transform_0, window_bounds = array<i64: 1, 16, 64>}, {pipeline_mode = #tpu.pipeline_mode<synchronous>, transform_indices = @transform_1, window_bounds = array<i64: 64, 384>}, {pipeline_mode = #tpu.pipeline_mode<synchronous>, transform_indices = @transform_2, window_bounds = array<i64: 3, 128>}, {pipeline_mode = #tpu.pipeline_mode<synchronous>, transform_indices = @transform_3, window_bounds = array<i64: 128, 384>}, {pipeline_mode = #tpu.pipeline_mode<synchronous>, transform_indices = @transform_4, window_bounds = array<i64: 3, 128>}, {pipeline_mode = #tpu.pipeline_mode<synchronous>, transform_indices = @transform_5, window_bounds = array<i64: 128, 2>}, {pipeline_mode = #tpu.pipeline_mode<synchronous>, transform_indices = @transform_6, window_bounds = array<i64: 2, 128>}, {transform_indices = @transform_7, window_bounds = array<i64: 1, 16, 128>}]} {
    %c0 = arith.constant 0 : index
    %c0_0 = arith.constant 0 : index
    %c0_1 = arith.constant 0 : index
    %0 = vector.load %arg1[%c0, %c0_0, %c0_1] : memref<1x16x64xf32, #tpu.memory_space<vmem>>, vector<1x16x64xf32>
    %1 = vector.shape_cast %0 : vector<1x16x64xf32> to vector<16x64xf32>
    %2 = arith.truncf %1 : vector<16x64xf32> to vector<16x64xbf16>
    %c0_2 = arith.constant 0 : index
    %c0_3 = arith.constant 0 : index
    %3 = vector.load %arg2[%c0_2, %c0_3] : memref<64x384xbf16, #tpu.memory_space<vmem>>, vector<64x384xbf16>
    %cst = arith.constant dense<0.000000e+00> : vector<16x384xf32>
    %4 = tpu.matmul %2, %3, %cst {dimension_numbers = #tpu.dot_dimension_numbers<[1], [0], [0], [1], [0, 0, 1, 1], [], []>} : vector<16x64xbf16>, vector<64x384xbf16>, vector<16x384xf32> -> vector<16x384xf32>
    %5 = vector.extract_strided_slice %4 {offsets = [0, 0], sizes = [16, 128], strides = [1, 1]} : vector<16x384xf32> to vector<16x128xf32>
    %6 = vector.extract_strided_slice %4 {offsets = [0, 128], sizes = [16, 128], strides = [1, 1]} : vector<16x384xf32> to vector<16x128xf32>
    %7 = vector.extract_strided_slice %4 {offsets = [0, 256], sizes = [16, 128], strides = [1, 1]} : vector<16x384xf32> to vector<16x128xf32>
    %cst_4 = arith.constant 0.000000e+00 : f32
    %8 = vector.broadcast %cst_4 : f32 to vector<1x128xf32>
    %9 = vector.extract_strided_slice %5 {offsets = [0, 0], sizes = [15, 128], strides = [1, 1]} : vector<16x128xf32> to vector<15x128xf32>
    %10 = tpu.concatenate %8, %9 in 0 : vector<1x128xf32>, vector<15x128xf32> -> vector<16x128xf32>
    %11 = arith.addf %6, %10 : vector<16x128xf32>
    %12 = vector.extract_strided_slice %7 {offsets = [1, 0], sizes = [15, 128], strides = [1, 1]} : vector<16x128xf32> to vector<15x128xf32>
    %13 = tpu.concatenate %12, %8 in 0 : vector<15x128xf32>, vector<1x128xf32> -> vector<16x128xf32>
    %14 = arith.addf %11, %13 : vector<16x128xf32>
    %c0_5 = arith.constant 0 : index
    %c0_6 = arith.constant 0 : index
    %15 = vector.load %arg3[%c0_5, %c0_6] : memref<3x128xf32, #tpu.memory_space<vmem>>, vector<1x128xf32>
    %16 = vector.broadcast %15 : vector<1x128xf32> to vector<16x128xf32>
    %17 = arith.addf %14, %16 : vector<16x128xf32>
    %cst_7 = arith.constant 0.000000e+00 : f32
    %18 = vector.broadcast %cst_7 : f32 to vector<16x128xf32>
    %19 = arith.maximumf %17, %18 : vector<16x128xf32>
    %cst_8 = arith.constant dense<0.000000e+00> : vector<128xf32>
    %20 = vector.multi_reduction <add>, %19, %cst_8 [0] : vector<16x128xf32> to vector<128xf32>
    %21 = vector.shape_cast %20 : vector<128xf32> to vector<1x128xf32>
    %c0_9 = arith.constant 0 : index
    %c0_10 = arith.constant 0 : index
    %22 = vector.load %arg6[%c0_9, %c0_10] : memref<128x2xf32, #tpu.memory_space<vmem>>, vector<128x2xf32>
    %cst_11 = arith.constant dense<0.000000e+00> : vector<1x2xf32>
    %23 = tpu.matmul %21, %22, %cst_11 {dimension_numbers = #tpu.dot_dimension_numbers<[1], [0], [0], [1], [0, 0, 1, 1], [], []>} : vector<1x128xf32>, vector<128x2xf32>, vector<1x2xf32> -> vector<1x2xf32>
    %cst_12 = arith.constant 9.765625E-4 : f32
    %24 = vector.broadcast %cst_12 : f32 to vector<1x2xf32>
    %25 = arith.mulf %23, %24 : vector<1x2xf32>
    %c0_13 = arith.constant 0 : index
    %c0_14 = arith.constant 0 : index
    %26 = vector.load %arg7[%c0_13, %c0_14] : memref<2x128xf32, #tpu.memory_space<vmem>>, vector<2x128xf32>
    %cst_15 = arith.constant dense<0.000000e+00> : vector<1x128xf32>
    %27 = tpu.matmul %25, %26, %cst_15 {dimension_numbers = #tpu.dot_dimension_numbers<[1], [0], [0], [1], [0, 0, 1, 1], [], []>} : vector<1x2xf32>, vector<2x128xf32>, vector<1x128xf32> -> vector<1x128xf32>
    %28 = vector.broadcast %27 : vector<1x128xf32> to vector<16x128xf32>
    %29 = arith.subf %19, %28 : vector<16x128xf32>
    %30 = arith.mulf %29, %29 : vector<16x128xf32>
    %cst_16 = arith.constant dense<0.000000e+00> : vector<128xf32>
    %31 = vector.multi_reduction <add>, %30, %cst_16 [0] : vector<16x128xf32> to vector<128xf32>
    %32 = vector.shape_cast %31 : vector<128xf32> to vector<1x128xf32>
    %c0_17 = arith.constant 0 : index
    %c0_18 = arith.constant 0 : index
    %33 = vector.load %arg6[%c0_17, %c0_18] : memref<128x2xf32, #tpu.memory_space<vmem>>, vector<128x2xf32>
    %cst_19 = arith.constant dense<0.000000e+00> : vector<1x2xf32>
    %34 = tpu.matmul %32, %33, %cst_19 {dimension_numbers = #tpu.dot_dimension_numbers<[1], [0], [0], [1], [0, 0, 1, 1], [], []>} : vector<1x128xf32>, vector<128x2xf32>, vector<1x2xf32> -> vector<1x2xf32>
    %cst_20 = arith.constant 9.765625E-4 : f32
    %35 = vector.broadcast %cst_20 : f32 to vector<1x2xf32>
    %36 = arith.mulf %34, %35 : vector<1x2xf32>
    %c0_21 = arith.constant 0 : index
    %c0_22 = arith.constant 0 : index
    %37 = vector.load %arg7[%c0_21, %c0_22] : memref<2x128xf32, #tpu.memory_space<vmem>>, vector<2x128xf32>
    %cst_23 = arith.constant dense<0.000000e+00> : vector<1x128xf32>
    %38 = tpu.matmul %36, %37, %cst_23 {dimension_numbers = #tpu.dot_dimension_numbers<[1], [0], [0], [1], [0, 0, 1, 1], [], []>} : vector<1x2xf32>, vector<2x128xf32>, vector<1x128xf32> -> vector<1x128xf32>
    %cst_24 = arith.constant 9.99999974E-6 : f32
    %39 = vector.broadcast %cst_24 : f32 to vector<1x128xf32>
    %40 = arith.addf %38, %39 : vector<1x128xf32>
    %41 = math.rsqrt %40 : vector<1x128xf32>
    %42 = vector.broadcast %41 : vector<1x128xf32> to vector<16x128xf32>
    %43 = arith.mulf %29, %42 : vector<16x128xf32>
    %c1 = arith.constant 1 : index
    %c0_25 = arith.constant 0 : index
    %44 = vector.load %arg3[%c1, %c0_25] : memref<3x128xf32, #tpu.memory_space<vmem>>, vector<1x128xf32>
    %45 = vector.broadcast %44 : vector<1x128xf32> to vector<16x128xf32>
    %46 = arith.mulf %43, %45 : vector<16x128xf32>
    %c2 = arith.constant 2 : index
    %c0_26 = arith.constant 0 : index
    %47 = vector.load %arg3[%c2, %c0_26] : memref<3x128xf32, #tpu.memory_space<vmem>>, vector<1x128xf32>
    %48 = vector.broadcast %47 : vector<1x128xf32> to vector<16x128xf32>
    %49 = arith.addf %46, %48 : vector<16x128xf32>
    %50 = arith.truncf %49 : vector<16x128xf32> to vector<16x128xbf16>
    %c0_27 = arith.constant 0 : index
    %c0_28 = arith.constant 0 : index
    %51 = vector.load %arg4[%c0_27, %c0_28] : memref<128x384xbf16, #tpu.memory_space<vmem>>, vector<128x384xbf16>
    %cst_29 = arith.constant dense<0.000000e+00> : vector<16x384xf32>
    %52 = tpu.matmul %50, %51, %cst_29 {dimension_numbers = #tpu.dot_dimension_numbers<[1], [0], [0], [1], [0, 0, 1, 1], [], []>} : vector<16x128xbf16>, vector<128x384xbf16>, vector<16x384xf32> -> vector<16x384xf32>
    %53 = vector.extract_strided_slice %52 {offsets = [0, 0], sizes = [16, 128], strides = [1, 1]} : vector<16x384xf32> to vector<16x128xf32>
    %54 = vector.extract_strided_slice %52 {offsets = [0, 128], sizes = [16, 128], strides = [1, 1]} : vector<16x384xf32> to vector<16x128xf32>
    %55 = vector.extract_strided_slice %52 {offsets = [0, 256], sizes = [16, 128], strides = [1, 1]} : vector<16x384xf32> to vector<16x128xf32>
    %cst_30 = arith.constant 0.000000e+00 : f32
    %56 = vector.broadcast %cst_30 : f32 to vector<1x128xf32>
    %57 = vector.extract_strided_slice %53 {offsets = [0, 0], sizes = [15, 128], strides = [1, 1]} : vector<16x128xf32> to vector<15x128xf32>
    %58 = tpu.concatenate %56, %57 in 0 : vector<1x128xf32>, vector<15x128xf32> -> vector<16x128xf32>
    %59 = arith.addf %54, %58 : vector<16x128xf32>
    %60 = vector.extract_strided_slice %55 {offsets = [1, 0], sizes = [15, 128], strides = [1, 1]} : vector<16x128xf32> to vector<15x128xf32>
    %61 = tpu.concatenate %60, %56 in 0 : vector<15x128xf32>, vector<1x128xf32> -> vector<16x128xf32>
    %62 = arith.addf %59, %61 : vector<16x128xf32>
    %c0_31 = arith.constant 0 : index
    %c0_32 = arith.constant 0 : index
    %63 = vector.load %arg5[%c0_31, %c0_32] : memref<3x128xf32, #tpu.memory_space<vmem>>, vector<1x128xf32>
    %64 = vector.broadcast %63 : vector<1x128xf32> to vector<16x128xf32>
    %65 = arith.addf %62, %64 : vector<16x128xf32>
    %cst_33 = arith.constant 0.000000e+00 : f32
    %66 = vector.broadcast %cst_33 : f32 to vector<16x128xf32>
    %67 = arith.maximumf %65, %66 : vector<16x128xf32>
    %cst_34 = arith.constant dense<0.000000e+00> : vector<128xf32>
    %68 = vector.multi_reduction <add>, %67, %cst_34 [0] : vector<16x128xf32> to vector<128xf32>
    %69 = vector.shape_cast %68 : vector<128xf32> to vector<1x128xf32>
    %c0_35 = arith.constant 0 : index
    %c0_36 = arith.constant 0 : index
    %70 = vector.load %arg6[%c0_35, %c0_36] : memref<128x2xf32, #tpu.memory_space<vmem>>, vector<128x2xf32>
    %cst_37 = arith.constant dense<0.000000e+00> : vector<1x2xf32>
    %71 = tpu.matmul %69, %70, %cst_37 {dimension_numbers = #tpu.dot_dimension_numbers<[1], [0], [0], [1], [0, 0, 1, 1], [], []>} : vector<1x128xf32>, vector<128x2xf32>, vector<1x2xf32> -> vector<1x2xf32>
    %cst_38 = arith.constant 9.765625E-4 : f32
    %72 = vector.broadcast %cst_38 : f32 to vector<1x2xf32>
    %73 = arith.mulf %71, %72 : vector<1x2xf32>
    %c0_39 = arith.constant 0 : index
    %c0_40 = arith.constant 0 : index
    %74 = vector.load %arg7[%c0_39, %c0_40] : memref<2x128xf32, #tpu.memory_space<vmem>>, vector<2x128xf32>
    %cst_41 = arith.constant dense<0.000000e+00> : vector<1x128xf32>
    %75 = tpu.matmul %73, %74, %cst_41 {dimension_numbers = #tpu.dot_dimension_numbers<[1], [0], [0], [1], [0, 0, 1, 1], [], []>} : vector<1x2xf32>, vector<2x128xf32>, vector<1x128xf32> -> vector<1x128xf32>
    %76 = vector.broadcast %75 : vector<1x128xf32> to vector<16x128xf32>
    %77 = arith.subf %67, %76 : vector<16x128xf32>
    %78 = arith.mulf %77, %77 : vector<16x128xf32>
    %cst_42 = arith.constant dense<0.000000e+00> : vector<128xf32>
    %79 = vector.multi_reduction <add>, %78, %cst_42 [0] : vector<16x128xf32> to vector<128xf32>
    %80 = vector.shape_cast %79 : vector<128xf32> to vector<1x128xf32>
    %c0_43 = arith.constant 0 : index
    %c0_44 = arith.constant 0 : index
    %81 = vector.load %arg6[%c0_43, %c0_44] : memref<128x2xf32, #tpu.memory_space<vmem>>, vector<128x2xf32>
    %cst_45 = arith.constant dense<0.000000e+00> : vector<1x2xf32>
    %82 = tpu.matmul %80, %81, %cst_45 {dimension_numbers = #tpu.dot_dimension_numbers<[1], [0], [0], [1], [0, 0, 1, 1], [], []>} : vector<1x128xf32>, vector<128x2xf32>, vector<1x2xf32> -> vector<1x2xf32>
    %cst_46 = arith.constant 9.765625E-4 : f32
    %83 = vector.broadcast %cst_46 : f32 to vector<1x2xf32>
    %84 = arith.mulf %82, %83 : vector<1x2xf32>
    %c0_47 = arith.constant 0 : index
    %c0_48 = arith.constant 0 : index
    %85 = vector.load %arg7[%c0_47, %c0_48] : memref<2x128xf32, #tpu.memory_space<vmem>>, vector<2x128xf32>
    %cst_49 = arith.constant dense<0.000000e+00> : vector<1x128xf32>
    %86 = tpu.matmul %84, %85, %cst_49 {dimension_numbers = #tpu.dot_dimension_numbers<[1], [0], [0], [1], [0, 0, 1, 1], [], []>} : vector<1x2xf32>, vector<2x128xf32>, vector<1x128xf32> -> vector<1x128xf32>
    %cst_50 = arith.constant 9.99999974E-6 : f32
    %87 = vector.broadcast %cst_50 : f32 to vector<1x128xf32>
    %88 = arith.addf %86, %87 : vector<1x128xf32>
    %89 = math.rsqrt %88 : vector<1x128xf32>
    %90 = vector.broadcast %89 : vector<1x128xf32> to vector<16x128xf32>
    %91 = arith.mulf %77, %90 : vector<16x128xf32>
    %c1_51 = arith.constant 1 : index
    %c0_52 = arith.constant 0 : index
    %92 = vector.load %arg5[%c1_51, %c0_52] : memref<3x128xf32, #tpu.memory_space<vmem>>, vector<1x128xf32>
    %93 = vector.broadcast %92 : vector<1x128xf32> to vector<16x128xf32>
    %94 = arith.mulf %91, %93 : vector<16x128xf32>
    %c2_53 = arith.constant 2 : index
    %c0_54 = arith.constant 0 : index
    %95 = vector.load %arg5[%c2_53, %c0_54] : memref<3x128xf32, #tpu.memory_space<vmem>>, vector<1x128xf32>
    %96 = vector.broadcast %95 : vector<1x128xf32> to vector<16x128xf32>
    %97 = arith.addf %94, %96 : vector<16x128xf32>
    %98 = arith.truncf %97 : vector<16x128xf32> to vector<16x128xbf16>
    %c0_55 = arith.constant 0 : index
    %c0_56 = arith.constant 0 : index
    %c0_57 = arith.constant 0 : index
    %99 = vector.load %arg8[%c0_55, %c0_56, %c0_57] : memref<1x16x128xbf16, #tpu.memory_space<vmem>>, vector<1x16x128xbf16>
    %100 = vector.shape_cast %99 : vector<1x16x128xbf16> to vector<16x128xbf16>
    %101 = vector.shape_cast %98 : vector<16x128xbf16> to vector<1x16x128xbf16>
    tpu.vector_store %arg8[%c0_55, %c0_56, %c0_57], %101 {strides = array<i32>} : memref<1x16x128xbf16, #tpu.memory_space<vmem>>, vector<1x16x128xbf16>,
    return
  }
  func.func @transform_0(%arg0: i32) -> (i32, i32, i32) {
    %c0_i32 = arith.constant 0 : i32
    %c0_i32_0 = arith.constant 0 : i32
    %c0_i32_1 = arith.constant 0 : i32
    return %arg0, %c0_i32, %c0_i32_0 : i32, i32, i32
  }
  func.func @transform_1(%arg0: i32) -> (i32, i32) {
    %c0_i32 = arith.constant 0 : i32
    %c0_i32_0 = arith.constant 0 : i32
    %c0_i32_1 = arith.constant 0 : i32
    return %c0_i32, %c0_i32_0 : i32, i32
  }
  func.func @transform_2(%arg0: i32) -> (i32, i32) {
    %c0_i32 = arith.constant 0 : i32
    %c0_i32_0 = arith.constant 0 : i32
    %c0_i32_1 = arith.constant 0 : i32
    return %c0_i32, %c0_i32_0 : i32, i32
  }
  func.func @transform_3(%arg0: i32) -> (i32, i32) {
    %c0_i32 = arith.constant 0 : i32
    %c0_i32_0 = arith.constant 0 : i32
    %c0_i32_1 = arith.constant 0 : i32
    return %c0_i32, %c0_i32_0 : i32, i32
  }
  func.func @transform_4(%arg0: i32) -> (i32, i32) {
    %c0_i32 = arith.constant 0 : i32
    %c0_i32_0 = arith.constant 0 : i32
    %c0_i32_1 = arith.constant 0 : i32
    return %c0_i32, %c0_i32_0 : i32, i32
  }
  func.func @transform_5(%arg0: i32) -> (i32, i32) {
    %c0_i32 = arith.constant 0 : i32
    %c0_i32_0 = arith.constant 0 : i32
    %c0_i32_1 = arith.constant 0 : i32
    return %c0_i32, %c0_i32_0 : i32, i32
  }
  func.func @transform_6(%arg0: i32) -> (i32, i32) {
    %c0_i32 = arith.constant 0 : i32
    %c0_i32_0 = arith.constant 0 : i32
    %c0_i32_1 = arith.constant 0 : i32
    return %c0_i32, %c0_i32_0 : i32, i32
  }
  func.func @transform_7(%arg0: i32) -> (i32, i32, i32) {
    %c0_i32 = arith.constant 0 : i32
    %c0_i32_0 = arith.constant 0 : i32
    %c0_i32_1 = arith.constant 0 : i32
    return %arg0, %c0_i32, %c0_i32_0 : i32, i32, i32
  }
}

module attributes {stable_mosaic.version = 11 : i64} {
  func.func @kernel(%arg0: i32, %arg1: memref<1x16x128xbf16, #tpu.memory_space<vmem>>, %arg2: memref<1x16x128xbf16, #tpu.memory_space<vmem>>, %arg3: memref<256x384xbf16, #tpu.memory_space<vmem>>, %arg4: memref<3x128xf32, #tpu.memory_space<vmem>>, %arg5: memref<128x384xbf16, #tpu.memory_space<vmem>>, %arg6: memref<3x128xf32, #tpu.memory_space<vmem>>, %arg7: memref<128x2xf32, #tpu.memory_space<vmem>>, %arg8: memref<2x128xf32, #tpu.memory_space<vmem>>, %arg9: memref<128x48xbf16, #tpu.memory_space<vmem>>, %arg10: memref<1x48xf32, #tpu.memory_space<vmem>>, %arg11: memref<1x16x48xf32, #tpu.memory_space<vmem>>) attributes {dimension_semantics = [#tpu.dimension_semantics<parallel>], iteration_bounds = array<i64: 2>, scalar_prefetch = 0 : i64, scratch_operands = 0 : i64, tpu.core_type = #tpu.core_type<tc>, window_params = [{transform_indices = @transform_0, window_bounds = array<i64: 1, 16, 128>}, {transform_indices = @transform_1, window_bounds = array<i64: 1, 16, 128>}, {pipeline_mode = #tpu.pipeline_mode<synchronous>, transform_indices = @transform_2, window_bounds = array<i64: 256, 384>}, {pipeline_mode = #tpu.pipeline_mode<synchronous>, transform_indices = @transform_3, window_bounds = array<i64: 3, 128>}, {pipeline_mode = #tpu.pipeline_mode<synchronous>, transform_indices = @transform_4, window_bounds = array<i64: 128, 384>}, {pipeline_mode = #tpu.pipeline_mode<synchronous>, transform_indices = @transform_5, window_bounds = array<i64: 3, 128>}, {pipeline_mode = #tpu.pipeline_mode<synchronous>, transform_indices = @transform_6, window_bounds = array<i64: 128, 2>}, {pipeline_mode = #tpu.pipeline_mode<synchronous>, transform_indices = @transform_7, window_bounds = array<i64: 2, 128>}, {pipeline_mode = #tpu.pipeline_mode<synchronous>, transform_indices = @transform_8, window_bounds = array<i64: 128, 48>}, {pipeline_mode = #tpu.pipeline_mode<synchronous>, transform_indices = @transform_9, window_bounds = array<i64: 1, 48>}, {transform_indices = @transform_10, window_bounds = array<i64: 1, 16, 48>}]} {
    %c0 = arith.constant 0 : index
    %c0_0 = arith.constant 0 : index
    %c0_1 = arith.constant 0 : index
    %0 = vector.load %arg1[%c0, %c0_0, %c0_1] : memref<1x16x128xbf16, #tpu.memory_space<vmem>>, vector<1x16x128xbf16>
    %1 = vector.shape_cast %0 : vector<1x16x128xbf16> to vector<16x128xbf16>
    %c0_2 = arith.constant 0 : index
    %c0_3 = arith.constant 0 : index
    %c0_4 = arith.constant 0 : index
    %2 = vector.load %arg2[%c0_2, %c0_3, %c0_4] : memref<1x16x128xbf16, #tpu.memory_space<vmem>>, vector<1x16x128xbf16>
    %3 = vector.shape_cast %2 : vector<1x16x128xbf16> to vector<16x128xbf16>
    %4 = tpu.concatenate %1, %3 in 1 : vector<16x128xbf16>, vector<16x128xbf16> -> vector<16x256xbf16>
    %c0_5 = arith.constant 0 : index
    %c0_6 = arith.constant 0 : index
    %5 = vector.load %arg3[%c0_5, %c0_6] : memref<256x384xbf16, #tpu.memory_space<vmem>>, vector<256x384xbf16>
    %cst = arith.constant dense<0.000000e+00> : vector<16x384xf32>
    %6 = tpu.matmul %4, %5, %cst {dimension_numbers = #tpu.dot_dimension_numbers<[1], [0], [0], [1], [0, 0, 1, 1], [], []>} : vector<16x256xbf16>, vector<256x384xbf16>, vector<16x384xf32> -> vector<16x384xf32>
    %7 = vector.extract_strided_slice %6 {offsets = [0, 0], sizes = [16, 128], strides = [1, 1]} : vector<16x384xf32> to vector<16x128xf32>
    %8 = vector.extract_strided_slice %6 {offsets = [0, 128], sizes = [16, 128], strides = [1, 1]} : vector<16x384xf32> to vector<16x128xf32>
    %9 = vector.extract_strided_slice %6 {offsets = [0, 256], sizes = [16, 128], strides = [1, 1]} : vector<16x384xf32> to vector<16x128xf32>
    %cst_7 = arith.constant 0.000000e+00 : f32
    %10 = vector.broadcast %cst_7 : f32 to vector<1x128xf32>
    %11 = vector.extract_strided_slice %7 {offsets = [0, 0], sizes = [15, 128], strides = [1, 1]} : vector<16x128xf32> to vector<15x128xf32>
    %12 = tpu.concatenate %10, %11 in 0 : vector<1x128xf32>, vector<15x128xf32> -> vector<16x128xf32>
    %13 = arith.addf %8, %12 : vector<16x128xf32>
    %14 = vector.extract_strided_slice %9 {offsets = [1, 0], sizes = [15, 128], strides = [1, 1]} : vector<16x128xf32> to vector<15x128xf32>
    %15 = tpu.concatenate %14, %10 in 0 : vector<15x128xf32>, vector<1x128xf32> -> vector<16x128xf32>
    %16 = arith.addf %13, %15 : vector<16x128xf32>
    %c0_8 = arith.constant 0 : index
    %c0_9 = arith.constant 0 : index
    %17 = vector.load %arg4[%c0_8, %c0_9] : memref<3x128xf32, #tpu.memory_space<vmem>>, vector<1x128xf32>
    %18 = vector.broadcast %17 : vector<1x128xf32> to vector<16x128xf32>
    %19 = arith.addf %16, %18 : vector<16x128xf32>
    %cst_10 = arith.constant 0.000000e+00 : f32
    %20 = vector.broadcast %cst_10 : f32 to vector<16x128xf32>
    %21 = arith.maximumf %19, %20 : vector<16x128xf32>
    %cst_11 = arith.constant dense<0.000000e+00> : vector<128xf32>
    %22 = vector.multi_reduction <add>, %21, %cst_11 [0] : vector<16x128xf32> to vector<128xf32>
    %23 = vector.shape_cast %22 : vector<128xf32> to vector<1x128xf32>
    %c0_12 = arith.constant 0 : index
    %c0_13 = arith.constant 0 : index
    %24 = vector.load %arg7[%c0_12, %c0_13] : memref<128x2xf32, #tpu.memory_space<vmem>>, vector<128x2xf32>
    %cst_14 = arith.constant dense<0.000000e+00> : vector<1x2xf32>
    %25 = tpu.matmul %23, %24, %cst_14 {dimension_numbers = #tpu.dot_dimension_numbers<[1], [0], [0], [1], [0, 0, 1, 1], [], []>} : vector<1x128xf32>, vector<128x2xf32>, vector<1x2xf32> -> vector<1x2xf32>
    %cst_15 = arith.constant 9.765625E-4 : f32
    %26 = vector.broadcast %cst_15 : f32 to vector<1x2xf32>
    %27 = arith.mulf %25, %26 : vector<1x2xf32>
    %c0_16 = arith.constant 0 : index
    %c0_17 = arith.constant 0 : index
    %28 = vector.load %arg8[%c0_16, %c0_17] : memref<2x128xf32, #tpu.memory_space<vmem>>, vector<2x128xf32>
    %cst_18 = arith.constant dense<0.000000e+00> : vector<1x128xf32>
    %29 = tpu.matmul %27, %28, %cst_18 {dimension_numbers = #tpu.dot_dimension_numbers<[1], [0], [0], [1], [0, 0, 1, 1], [], []>} : vector<1x2xf32>, vector<2x128xf32>, vector<1x128xf32> -> vector<1x128xf32>
    %30 = vector.broadcast %29 : vector<1x128xf32> to vector<16x128xf32>
    %31 = arith.subf %21, %30 : vector<16x128xf32>
    %32 = arith.mulf %31, %31 : vector<16x128xf32>
    %cst_19 = arith.constant dense<0.000000e+00> : vector<128xf32>
    %33 = vector.multi_reduction <add>, %32, %cst_19 [0] : vector<16x128xf32> to vector<128xf32>
    %34 = vector.shape_cast %33 : vector<128xf32> to vector<1x128xf32>
    %c0_20 = arith.constant 0 : index
    %c0_21 = arith.constant 0 : index
    %35 = vector.load %arg7[%c0_20, %c0_21] : memref<128x2xf32, #tpu.memory_space<vmem>>, vector<128x2xf32>
    %cst_22 = arith.constant dense<0.000000e+00> : vector<1x2xf32>
    %36 = tpu.matmul %34, %35, %cst_22 {dimension_numbers = #tpu.dot_dimension_numbers<[1], [0], [0], [1], [0, 0, 1, 1], [], []>} : vector<1x128xf32>, vector<128x2xf32>, vector<1x2xf32> -> vector<1x2xf32>
    %cst_23 = arith.constant 9.765625E-4 : f32
    %37 = vector.broadcast %cst_23 : f32 to vector<1x2xf32>
    %38 = arith.mulf %36, %37 : vector<1x2xf32>
    %c0_24 = arith.constant 0 : index
    %c0_25 = arith.constant 0 : index
    %39 = vector.load %arg8[%c0_24, %c0_25] : memref<2x128xf32, #tpu.memory_space<vmem>>, vector<2x128xf32>
    %cst_26 = arith.constant dense<0.000000e+00> : vector<1x128xf32>
    %40 = tpu.matmul %38, %39, %cst_26 {dimension_numbers = #tpu.dot_dimension_numbers<[1], [0], [0], [1], [0, 0, 1, 1], [], []>} : vector<1x2xf32>, vector<2x128xf32>, vector<1x128xf32> -> vector<1x128xf32>
    %cst_27 = arith.constant 9.99999974E-6 : f32
    %41 = vector.broadcast %cst_27 : f32 to vector<1x128xf32>
    %42 = arith.addf %40, %41 : vector<1x128xf32>
    %43 = math.rsqrt %42 : vector<1x128xf32>
    %44 = vector.broadcast %43 : vector<1x128xf32> to vector<16x128xf32>
    %45 = arith.mulf %31, %44 : vector<16x128xf32>
    %c1 = arith.constant 1 : index
    %c0_28 = arith.constant 0 : index
    %46 = vector.load %arg4[%c1, %c0_28] : memref<3x128xf32, #tpu.memory_space<vmem>>, vector<1x128xf32>
    %47 = vector.broadcast %46 : vector<1x128xf32> to vector<16x128xf32>
    %48 = arith.mulf %45, %47 : vector<16x128xf32>
    %c2 = arith.constant 2 : index
    %c0_29 = arith.constant 0 : index
    %49 = vector.load %arg4[%c2, %c0_29] : memref<3x128xf32, #tpu.memory_space<vmem>>, vector<1x128xf32>
    %50 = vector.broadcast %49 : vector<1x128xf32> to vector<16x128xf32>
    %51 = arith.addf %48, %50 : vector<16x128xf32>
    %52 = arith.truncf %51 : vector<16x128xf32> to vector<16x128xbf16>
    %c0_30 = arith.constant 0 : index
    %c0_31 = arith.constant 0 : index
    %53 = vector.load %arg5[%c0_30, %c0_31] : memref<128x384xbf16, #tpu.memory_space<vmem>>, vector<128x384xbf16>
    %cst_32 = arith.constant dense<0.000000e+00> : vector<16x384xf32>
    %54 = tpu.matmul %52, %53, %cst_32 {dimension_numbers = #tpu.dot_dimension_numbers<[1], [0], [0], [1], [0, 0, 1, 1], [], []>} : vector<16x128xbf16>, vector<128x384xbf16>, vector<16x384xf32> -> vector<16x384xf32>
    %55 = vector.extract_strided_slice %54 {offsets = [0, 0], sizes = [16, 128], strides = [1, 1]} : vector<16x384xf32> to vector<16x128xf32>
    %56 = vector.extract_strided_slice %54 {offsets = [0, 128], sizes = [16, 128], strides = [1, 1]} : vector<16x384xf32> to vector<16x128xf32>
    %57 = vector.extract_strided_slice %54 {offsets = [0, 256], sizes = [16, 128], strides = [1, 1]} : vector<16x384xf32> to vector<16x128xf32>
    %cst_33 = arith.constant 0.000000e+00 : f32
    %58 = vector.broadcast %cst_33 : f32 to vector<1x128xf32>
    %59 = vector.extract_strided_slice %55 {offsets = [0, 0], sizes = [15, 128], strides = [1, 1]} : vector<16x128xf32> to vector<15x128xf32>
    %60 = tpu.concatenate %58, %59 in 0 : vector<1x128xf32>, vector<15x128xf32> -> vector<16x128xf32>
    %61 = arith.addf %56, %60 : vector<16x128xf32>
    %62 = vector.extract_strided_slice %57 {offsets = [1, 0], sizes = [15, 128], strides = [1, 1]} : vector<16x128xf32> to vector<15x128xf32>
    %63 = tpu.concatenate %62, %58 in 0 : vector<15x128xf32>, vector<1x128xf32> -> vector<16x128xf32>
    %64 = arith.addf %61, %63 : vector<16x128xf32>
    %c0_34 = arith.constant 0 : index
    %c0_35 = arith.constant 0 : index
    %65 = vector.load %arg6[%c0_34, %c0_35] : memref<3x128xf32, #tpu.memory_space<vmem>>, vector<1x128xf32>
    %66 = vector.broadcast %65 : vector<1x128xf32> to vector<16x128xf32>
    %67 = arith.addf %64, %66 : vector<16x128xf32>
    %cst_36 = arith.constant 0.000000e+00 : f32
    %68 = vector.broadcast %cst_36 : f32 to vector<16x128xf32>
    %69 = arith.maximumf %67, %68 : vector<16x128xf32>
    %cst_37 = arith.constant dense<0.000000e+00> : vector<128xf32>
    %70 = vector.multi_reduction <add>, %69, %cst_37 [0] : vector<16x128xf32> to vector<128xf32>
    %71 = vector.shape_cast %70 : vector<128xf32> to vector<1x128xf32>
    %c0_38 = arith.constant 0 : index
    %c0_39 = arith.constant 0 : index
    %72 = vector.load %arg7[%c0_38, %c0_39] : memref<128x2xf32, #tpu.memory_space<vmem>>, vector<128x2xf32>
    %cst_40 = arith.constant dense<0.000000e+00> : vector<1x2xf32>
    %73 = tpu.matmul %71, %72, %cst_40 {dimension_numbers = #tpu.dot_dimension_numbers<[1], [0], [0], [1], [0, 0, 1, 1], [], []>} : vector<1x128xf32>, vector<128x2xf32>, vector<1x2xf32> -> vector<1x2xf32>
    %cst_41 = arith.constant 9.765625E-4 : f32
    %74 = vector.broadcast %cst_41 : f32 to vector<1x2xf32>
    %75 = arith.mulf %73, %74 : vector<1x2xf32>
    %c0_42 = arith.constant 0 : index
    %c0_43 = arith.constant 0 : index
    %76 = vector.load %arg8[%c0_42, %c0_43] : memref<2x128xf32, #tpu.memory_space<vmem>>, vector<2x128xf32>
    %cst_44 = arith.constant dense<0.000000e+00> : vector<1x128xf32>
    %77 = tpu.matmul %75, %76, %cst_44 {dimension_numbers = #tpu.dot_dimension_numbers<[1], [0], [0], [1], [0, 0, 1, 1], [], []>} : vector<1x2xf32>, vector<2x128xf32>, vector<1x128xf32> -> vector<1x128xf32>
    %78 = vector.broadcast %77 : vector<1x128xf32> to vector<16x128xf32>
    %79 = arith.subf %69, %78 : vector<16x128xf32>
    %80 = arith.mulf %79, %79 : vector<16x128xf32>
    %cst_45 = arith.constant dense<0.000000e+00> : vector<128xf32>
    %81 = vector.multi_reduction <add>, %80, %cst_45 [0] : vector<16x128xf32> to vector<128xf32>
    %82 = vector.shape_cast %81 : vector<128xf32> to vector<1x128xf32>
    %c0_46 = arith.constant 0 : index
    %c0_47 = arith.constant 0 : index
    %83 = vector.load %arg7[%c0_46, %c0_47] : memref<128x2xf32, #tpu.memory_space<vmem>>, vector<128x2xf32>
    %cst_48 = arith.constant dense<0.000000e+00> : vector<1x2xf32>
    %84 = tpu.matmul %82, %83, %cst_48 {dimension_numbers = #tpu.dot_dimension_numbers<[1], [0], [0], [1], [0, 0, 1, 1], [], []>} : vector<1x128xf32>, vector<128x2xf32>, vector<1x2xf32> -> vector<1x2xf32>
    %cst_49 = arith.constant 9.765625E-4 : f32
    %85 = vector.broadcast %cst_49 : f32 to vector<1x2xf32>
    %86 = arith.mulf %84, %85 : vector<1x2xf32>
    %c0_50 = arith.constant 0 : index
    %c0_51 = arith.constant 0 : index
    %87 = vector.load %arg8[%c0_50, %c0_51] : memref<2x128xf32, #tpu.memory_space<vmem>>, vector<2x128xf32>
    %cst_52 = arith.constant dense<0.000000e+00> : vector<1x128xf32>
    %88 = tpu.matmul %86, %87, %cst_52 {dimension_numbers = #tpu.dot_dimension_numbers<[1], [0], [0], [1], [0, 0, 1, 1], [], []>} : vector<1x2xf32>, vector<2x128xf32>, vector<1x128xf32> -> vector<1x128xf32>
    %cst_53 = arith.constant 9.99999974E-6 : f32
    %89 = vector.broadcast %cst_53 : f32 to vector<1x128xf32>
    %90 = arith.addf %88, %89 : vector<1x128xf32>
    %91 = math.rsqrt %90 : vector<1x128xf32>
    %92 = vector.broadcast %91 : vector<1x128xf32> to vector<16x128xf32>
    %93 = arith.mulf %79, %92 : vector<16x128xf32>
    %c1_54 = arith.constant 1 : index
    %c0_55 = arith.constant 0 : index
    %94 = vector.load %arg6[%c1_54, %c0_55] : memref<3x128xf32, #tpu.memory_space<vmem>>, vector<1x128xf32>
    %95 = vector.broadcast %94 : vector<1x128xf32> to vector<16x128xf32>
    %96 = arith.mulf %93, %95 : vector<16x128xf32>
    %c2_56 = arith.constant 2 : index
    %c0_57 = arith.constant 0 : index
    %97 = vector.load %arg6[%c2_56, %c0_57] : memref<3x128xf32, #tpu.memory_space<vmem>>, vector<1x128xf32>
    %98 = vector.broadcast %97 : vector<1x128xf32> to vector<16x128xf32>
    %99 = arith.addf %96, %98 : vector<16x128xf32>
    %100 = arith.truncf %99 : vector<16x128xf32> to vector<16x128xbf16>
    %c0_58 = arith.constant 0 : index
    %c0_59 = arith.constant 0 : index
    %101 = vector.load %arg9[%c0_58, %c0_59] : memref<128x48xbf16, #tpu.memory_space<vmem>>, vector<128x48xbf16>
    %cst_60 = arith.constant dense<0.000000e+00> : vector<16x48xf32>
    %102 = tpu.matmul %100, %101, %cst_60 {dimension_numbers = #tpu.dot_dimension_numbers<[1], [0], [0], [1], [0, 0, 1, 1], [], []>} : vector<16x128xbf16>, vector<128x48xbf16>, vector<16x48xf32> -> vector<16x48xf32>
    %c0_61 = arith.constant 0 : index
    %c0_62 = arith.constant 0 : index
    %103 = vector.load %arg10[%c0_61, %c0_62] : memref<1x48xf32, #tpu.memory_space<vmem>>, vector<1x48xf32>
    %104 = vector.broadcast %103 : vector<1x48xf32> to vector<16x48xf32>
    %105 = arith.addf %102, %104 : vector<16x48xf32>
    %c0_63 = arith.constant 0 : index
    %c0_64 = arith.constant 0 : index
    %c0_65 = arith.constant 0 : index
    %106 = vector.load %arg11[%c0_63, %c0_64, %c0_65] : memref<1x16x48xf32, #tpu.memory_space<vmem>>, vector<1x16x48xf32>
    %107 = vector.shape_cast %106 : vector<1x16x48xf32> to vector<16x48xf32>
    %108 = vector.shape_cast %105 : vector<16x48xf32> to vector<1x16x48xf32>
    tpu.vector_store %arg11[%c0_63, %c0_64, %c0_65], %108 {strides = array<i32>} : memref<1x16x48xf32, #tpu.memory_space<vmem>>, vector<1x16x48xf32>,
    return
  }
  func.func @transform_0(%arg0: i32) -> (i32, i32, i32) {
    %c0_i32 = arith.constant 0 : i32
    %c0_i32_0 = arith.constant 0 : i32
    %c0_i32_1 = arith.constant 0 : i32
    return %arg0, %c0_i32, %c0_i32_0 : i32, i32, i32
  }
  func.func @transform_1(%arg0: i32) -> (i32, i32, i32) {
    %c0_i32 = arith.constant 0 : i32
    %c0_i32_0 = arith.constant 0 : i32
    %c0_i32_1 = arith.constant 0 : i32
    return %arg0, %c0_i32, %c0_i32_0 : i32, i32, i32
  }
  func.func @transform_2(%arg0: i32) -> (i32, i32) {
    %c0_i32 = arith.constant 0 : i32
    %c0_i32_0 = arith.constant 0 : i32
    %c0_i32_1 = arith.constant 0 : i32
    return %c0_i32, %c0_i32_0 : i32, i32
  }
  func.func @transform_3(%arg0: i32) -> (i32, i32) {
    %c0_i32 = arith.constant 0 : i32
    %c0_i32_0 = arith.constant 0 : i32
    %c0_i32_1 = arith.constant 0 : i32
    return %c0_i32, %c0_i32_0 : i32, i32
  }
  func.func @transform_4(%arg0: i32) -> (i32, i32) {
    %c0_i32 = arith.constant 0 : i32
    %c0_i32_0 = arith.constant 0 : i32
    %c0_i32_1 = arith.constant 0 : i32
    return %c0_i32, %c0_i32_0 : i32, i32
  }
  func.func @transform_5(%arg0: i32) -> (i32, i32) {
    %c0_i32 = arith.constant 0 : i32
    %c0_i32_0 = arith.constant 0 : i32
    %c0_i32_1 = arith.constant 0 : i32
    return %c0_i32, %c0_i32_0 : i32, i32
  }
  func.func @transform_6(%arg0: i32) -> (i32, i32) {
    %c0_i32 = arith.constant 0 : i32
    %c0_i32_0 = arith.constant 0 : i32
    %c0_i32_1 = arith.constant 0 : i32
    return %c0_i32, %c0_i32_0 : i32, i32
  }
  func.func @transform_7(%arg0: i32) -> (i32, i32) {
    %c0_i32 = arith.constant 0 : i32
    %c0_i32_0 = arith.constant 0 : i32
    %c0_i32_1 = arith.constant 0 : i32
    return %c0_i32, %c0_i32_0 : i32, i32
  }
  func.func @transform_8(%arg0: i32) -> (i32, i32) {
    %c0_i32 = arith.constant 0 : i32
    %c0_i32_0 = arith.constant 0 : i32
    %c0_i32_1 = arith.constant 0 : i32
    return %c0_i32, %c0_i32_0 : i32, i32
  }
  func.func @transform_9(%arg0: i32) -> (i32, i32) {
    %c0_i32 = arith.constant 0 : i32
    %c0_i32_0 = arith.constant 0 : i32
    %c0_i32_1 = arith.constant 0 : i32
    return %c0_i32, %c0_i32_0 : i32, i32
  }
  func.func @transform_10(%arg0: i32) -> (i32, i32, i32) {
    %c0_i32 = arith.constant 0 : i32
    %c0_i32_0 = arith.constant 0 : i32
    %c0_i32_1 = arith.constant 0 : i32
    return %arg0, %c0_i32, %c0_i32_0 : i32, i32, i32
  }
}

module attributes {stable_mosaic.version = 11 : i64} {
  func.func @kernel(%arg0: i32, %arg1: memref<1x8x256xbf16, #tpu.memory_space<vmem>>, %arg2: memref<128x64xbf16, #tpu.memory_space<vmem>>, %arg3: memref<128x64xbf16, #tpu.memory_space<vmem>>, %arg4: memref<64x384xbf16, #tpu.memory_space<vmem>>, %arg5: memref<3x128xf32, #tpu.memory_space<vmem>>, %arg6: memref<128x384xbf16, #tpu.memory_space<vmem>>, %arg7: memref<3x128xf32, #tpu.memory_space<vmem>>, %arg8: memref<128x4xf32, #tpu.memory_space<vmem>>, %arg9: memref<4x128xf32, #tpu.memory_space<vmem>>, %arg10: memref<128x256xbf16, #tpu.memory_space<vmem>>, %arg11: memref<1x256xf32, #tpu.memory_space<vmem>>, %arg12: memref<1x8x256xbf16, #tpu.memory_space<vmem>>) attributes {dimension_semantics = [#tpu.dimension_semantics<parallel>], iteration_bounds = array<i64: 2>, scalar_prefetch = 0 : i64, scratch_operands = 0 : i64, tpu.core_type = #tpu.core_type<tc>, window_params = [{transform_indices = @transform_0, window_bounds = array<i64: 1, 8, 256>}, {pipeline_mode = #tpu.pipeline_mode<synchronous>, transform_indices = @transform_1, window_bounds = array<i64: 128, 64>}, {pipeline_mode = #tpu.pipeline_mode<synchronous>, transform_indices = @transform_2, window_bounds = array<i64: 128, 64>}, {pipeline_mode = #tpu.pipeline_mode<synchronous>, transform_indices = @transform_3, window_bounds = array<i64: 64, 384>}, {pipeline_mode = #tpu.pipeline_mode<synchronous>, transform_indices = @transform_4, window_bounds = array<i64: 3, 128>}, {pipeline_mode = #tpu.pipeline_mode<synchronous>, transform_indices = @transform_5, window_bounds = array<i64: 128, 384>}, {pipeline_mode = #tpu.pipeline_mode<synchronous>, transform_indices = @transform_6, window_bounds = array<i64: 3, 128>}, {pipeline_mode = #tpu.pipeline_mode<synchronous>, transform_indices = @transform_7, window_bounds = array<i64: 128, 4>}, {pipeline_mode = #tpu.pipeline_mode<synchronous>, transform_indices = @transform_8, window_bounds = array<i64: 4, 128>}, {pipeline_mode = #tpu.pipeline_mode<synchronous>, transform_indices = @transform_9, window_bounds = array<i64: 128, 256>}, {pipeline_mode = #tpu.pipeline_mode<synchronous>, transform_indices = @transform_10, window_bounds = array<i64: 1, 256>}, {transform_indices = @transform_11, window_bounds = array<i64: 1, 8, 256>}]} {
    %c0 = arith.constant 0 : index
    %c0_0 = arith.constant 0 : index
    %c0_1 = arith.constant 0 : index
    %0 = vector.load %arg1[%c0, %c0_0, %c0_1] : memref<1x8x256xbf16, #tpu.memory_space<vmem>>, vector<1x8x256xbf16>
    %1 = vector.shape_cast %0 : vector<1x8x256xbf16> to vector<8x256xbf16>
    %2 = vector.extract_strided_slice %1 {offsets = [0, 0], sizes = [8, 128], strides = [1, 1]} : vector<8x256xbf16> to vector<8x128xbf16>
    %3 = vector.extract_strided_slice %1 {offsets = [0, 128], sizes = [8, 128], strides = [1, 1]} : vector<8x256xbf16> to vector<8x128xbf16>
    %4 = arith.maximumf %2, %3 : vector<8x128xbf16>
    %c0_2 = arith.constant 0 : index
    %c0_3 = arith.constant 0 : index
    %5 = vector.load %arg2[%c0_2, %c0_3] : memref<128x64xbf16, #tpu.memory_space<vmem>>, vector<128x64xbf16>
    %cst = arith.constant dense<0.000000e+00> : vector<8x64xf32>
    %6 = tpu.matmul %4, %5, %cst {dimension_numbers = #tpu.dot_dimension_numbers<[1], [0], [0], [1], [0, 0, 1, 1], [], []>} : vector<8x128xbf16>, vector<128x64xbf16>, vector<8x64xf32> -> vector<8x64xf32>
    %c0_4 = arith.constant 0 : index
    %c0_5 = arith.constant 0 : index
    %7 = vector.load %arg3[%c0_4, %c0_5] : memref<128x64xbf16, #tpu.memory_space<vmem>>, vector<128x64xbf16>
    %cst_6 = arith.constant dense<0.000000e+00> : vector<8x64xf32>
    %8 = tpu.matmul %4, %7, %cst_6 {dimension_numbers = #tpu.dot_dimension_numbers<[1], [0], [0], [1], [0, 0, 1, 1], [], []>} : vector<8x128xbf16>, vector<128x64xbf16>, vector<8x64xf32> -> vector<8x64xf32>
    %9 = arith.maximumf %6, %8 : vector<8x64xf32>
    %10 = arith.truncf %9 : vector<8x64xf32> to vector<8x64xbf16>
    %c0_7 = arith.constant 0 : index
    %c0_8 = arith.constant 0 : index
    %11 = vector.load %arg4[%c0_7, %c0_8] : memref<64x384xbf16, #tpu.memory_space<vmem>>, vector<64x384xbf16>
    %cst_9 = arith.constant dense<0.000000e+00> : vector<8x384xf32>
    %12 = tpu.matmul %10, %11, %cst_9 {dimension_numbers = #tpu.dot_dimension_numbers<[1], [0], [0], [1], [0, 0, 1, 1], [], []>} : vector<8x64xbf16>, vector<64x384xbf16>, vector<8x384xf32> -> vector<8x384xf32>
    %13 = vector.extract_strided_slice %12 {offsets = [0, 0], sizes = [8, 128], strides = [1, 1]} : vector<8x384xf32> to vector<8x128xf32>
    %14 = vector.extract_strided_slice %12 {offsets = [0, 128], sizes = [8, 128], strides = [1, 1]} : vector<8x384xf32> to vector<8x128xf32>
    %15 = vector.extract_strided_slice %12 {offsets = [0, 256], sizes = [8, 128], strides = [1, 1]} : vector<8x384xf32> to vector<8x128xf32>
    %cst_10 = arith.constant 0.000000e+00 : f32
    %16 = vector.broadcast %cst_10 : f32 to vector<1x128xf32>
    %17 = vector.extract_strided_slice %13 {offsets = [0, 0], sizes = [7, 128], strides = [1, 1]} : vector<8x128xf32> to vector<7x128xf32>
    %18 = tpu.concatenate %16, %17 in 0 : vector<1x128xf32>, vector<7x128xf32> -> vector<8x128xf32>
    %19 = arith.addf %14, %18 : vector<8x128xf32>
    %20 = vector.extract_strided_slice %15 {offsets = [1, 0], sizes = [7, 128], strides = [1, 1]} : vector<8x128xf32> to vector<7x128xf32>
    %21 = tpu.concatenate %20, %16 in 0 : vector<7x128xf32>, vector<1x128xf32> -> vector<8x128xf32>
    %22 = arith.addf %19, %21 : vector<8x128xf32>
    %c0_11 = arith.constant 0 : index
    %c0_12 = arith.constant 0 : index
    %23 = vector.load %arg5[%c0_11, %c0_12] : memref<3x128xf32, #tpu.memory_space<vmem>>, vector<1x128xf32>
    %24 = vector.broadcast %23 : vector<1x128xf32> to vector<8x128xf32>
    %25 = arith.addf %22, %24 : vector<8x128xf32>
    %cst_13 = arith.constant 0.000000e+00 : f32
    %26 = vector.broadcast %cst_13 : f32 to vector<8x128xf32>
    %27 = arith.maximumf %25, %26 : vector<8x128xf32>
    %cst_14 = arith.constant dense<0.000000e+00> : vector<128xf32>
    %28 = vector.multi_reduction <add>, %27, %cst_14 [0] : vector<8x128xf32> to vector<128xf32>
    %29 = vector.shape_cast %28 : vector<128xf32> to vector<1x128xf32>
    %c0_15 = arith.constant 0 : index
    %c0_16 = arith.constant 0 : index
    %30 = vector.load %arg8[%c0_15, %c0_16] : memref<128x4xf32, #tpu.memory_space<vmem>>, vector<128x4xf32>
    %cst_17 = arith.constant dense<0.000000e+00> : vector<1x4xf32>
    %31 = tpu.matmul %29, %30, %cst_17 {dimension_numbers = #tpu.dot_dimension_numbers<[1], [0], [0], [1], [0, 0, 1, 1], [], []>} : vector<1x128xf32>, vector<128x4xf32>, vector<1x4xf32> -> vector<1x4xf32>
    %cst_18 = arith.constant 3.906250e-03 : f32
    %32 = vector.broadcast %cst_18 : f32 to vector<1x4xf32>
    %33 = arith.mulf %31, %32 : vector<1x4xf32>
    %c0_19 = arith.constant 0 : index
    %c0_20 = arith.constant 0 : index
    %34 = vector.load %arg9[%c0_19, %c0_20] : memref<4x128xf32, #tpu.memory_space<vmem>>, vector<4x128xf32>
    %cst_21 = arith.constant dense<0.000000e+00> : vector<1x128xf32>
    %35 = tpu.matmul %33, %34, %cst_21 {dimension_numbers = #tpu.dot_dimension_numbers<[1], [0], [0], [1], [0, 0, 1, 1], [], []>} : vector<1x4xf32>, vector<4x128xf32>, vector<1x128xf32> -> vector<1x128xf32>
    %36 = vector.broadcast %35 : vector<1x128xf32> to vector<8x128xf32>
    %37 = arith.subf %27, %36 : vector<8x128xf32>
    %38 = arith.mulf %37, %37 : vector<8x128xf32>
    %cst_22 = arith.constant dense<0.000000e+00> : vector<128xf32>
    %39 = vector.multi_reduction <add>, %38, %cst_22 [0] : vector<8x128xf32> to vector<128xf32>
    %40 = vector.shape_cast %39 : vector<128xf32> to vector<1x128xf32>
    %c0_23 = arith.constant 0 : index
    %c0_24 = arith.constant 0 : index
    %41 = vector.load %arg8[%c0_23, %c0_24] : memref<128x4xf32, #tpu.memory_space<vmem>>, vector<128x4xf32>
    %cst_25 = arith.constant dense<0.000000e+00> : vector<1x4xf32>
    %42 = tpu.matmul %40, %41, %cst_25 {dimension_numbers = #tpu.dot_dimension_numbers<[1], [0], [0], [1], [0, 0, 1, 1], [], []>} : vector<1x128xf32>, vector<128x4xf32>, vector<1x4xf32> -> vector<1x4xf32>
    %cst_26 = arith.constant 3.906250e-03 : f32
    %43 = vector.broadcast %cst_26 : f32 to vector<1x4xf32>
    %44 = arith.mulf %42, %43 : vector<1x4xf32>
    %c0_27 = arith.constant 0 : index
    %c0_28 = arith.constant 0 : index
    %45 = vector.load %arg9[%c0_27, %c0_28] : memref<4x128xf32, #tpu.memory_space<vmem>>, vector<4x128xf32>
    %cst_29 = arith.constant dense<0.000000e+00> : vector<1x128xf32>
    %46 = tpu.matmul %44, %45, %cst_29 {dimension_numbers = #tpu.dot_dimension_numbers<[1], [0], [0], [1], [0, 0, 1, 1], [], []>} : vector<1x4xf32>, vector<4x128xf32>, vector<1x128xf32> -> vector<1x128xf32>
    %cst_30 = arith.constant 9.99999974E-6 : f32
    %47 = vector.broadcast %cst_30 : f32 to vector<1x128xf32>
    %48 = arith.addf %46, %47 : vector<1x128xf32>
    %49 = math.rsqrt %48 : vector<1x128xf32>
    %50 = vector.broadcast %49 : vector<1x128xf32> to vector<8x128xf32>
    %51 = arith.mulf %37, %50 : vector<8x128xf32>
    %c1 = arith.constant 1 : index
    %c0_31 = arith.constant 0 : index
    %52 = vector.load %arg5[%c1, %c0_31] : memref<3x128xf32, #tpu.memory_space<vmem>>, vector<1x128xf32>
    %53 = vector.broadcast %52 : vector<1x128xf32> to vector<8x128xf32>
    %54 = arith.mulf %51, %53 : vector<8x128xf32>
    %c2 = arith.constant 2 : index
    %c0_32 = arith.constant 0 : index
    %55 = vector.load %arg5[%c2, %c0_32] : memref<3x128xf32, #tpu.memory_space<vmem>>, vector<1x128xf32>
    %56 = vector.broadcast %55 : vector<1x128xf32> to vector<8x128xf32>
    %57 = arith.addf %54, %56 : vector<8x128xf32>
    %58 = arith.truncf %57 : vector<8x128xf32> to vector<8x128xbf16>
    %c0_33 = arith.constant 0 : index
    %c0_34 = arith.constant 0 : index
    %59 = vector.load %arg6[%c0_33, %c0_34] : memref<128x384xbf16, #tpu.memory_space<vmem>>, vector<128x384xbf16>
    %cst_35 = arith.constant dense<0.000000e+00> : vector<8x384xf32>
    %60 = tpu.matmul %58, %59, %cst_35 {dimension_numbers = #tpu.dot_dimension_numbers<[1], [0], [0], [1], [0, 0, 1, 1], [], []>} : vector<8x128xbf16>, vector<128x384xbf16>, vector<8x384xf32> -> vector<8x384xf32>
    %61 = vector.extract_strided_slice %60 {offsets = [0, 0], sizes = [8, 128], strides = [1, 1]} : vector<8x384xf32> to vector<8x128xf32>
    %62 = vector.extract_strided_slice %60 {offsets = [0, 128], sizes = [8, 128], strides = [1, 1]} : vector<8x384xf32> to vector<8x128xf32>
    %63 = vector.extract_strided_slice %60 {offsets = [0, 256], sizes = [8, 128], strides = [1, 1]} : vector<8x384xf32> to vector<8x128xf32>
    %cst_36 = arith.constant 0.000000e+00 : f32
    %64 = vector.broadcast %cst_36 : f32 to vector<1x128xf32>
    %65 = vector.extract_strided_slice %61 {offsets = [0, 0], sizes = [7, 128], strides = [1, 1]} : vector<8x128xf32> to vector<7x128xf32>
    %66 = tpu.concatenate %64, %65 in 0 : vector<1x128xf32>, vector<7x128xf32> -> vector<8x128xf32>
    %67 = arith.addf %62, %66 : vector<8x128xf32>
    %68 = vector.extract_strided_slice %63 {offsets = [1, 0], sizes = [7, 128], strides = [1, 1]} : vector<8x128xf32> to vector<7x128xf32>
    %69 = tpu.concatenate %68, %64 in 0 : vector<7x128xf32>, vector<1x128xf32> -> vector<8x128xf32>
    %70 = arith.addf %67, %69 : vector<8x128xf32>
    %c0_37 = arith.constant 0 : index
    %c0_38 = arith.constant 0 : index
    %71 = vector.load %arg7[%c0_37, %c0_38] : memref<3x128xf32, #tpu.memory_space<vmem>>, vector<1x128xf32>
    %72 = vector.broadcast %71 : vector<1x128xf32> to vector<8x128xf32>
    %73 = arith.addf %70, %72 : vector<8x128xf32>
    %cst_39 = arith.constant 0.000000e+00 : f32
    %74 = vector.broadcast %cst_39 : f32 to vector<8x128xf32>
    %75 = arith.maximumf %73, %74 : vector<8x128xf32>
    %cst_40 = arith.constant dense<0.000000e+00> : vector<128xf32>
    %76 = vector.multi_reduction <add>, %75, %cst_40 [0] : vector<8x128xf32> to vector<128xf32>
    %77 = vector.shape_cast %76 : vector<128xf32> to vector<1x128xf32>
    %c0_41 = arith.constant 0 : index
    %c0_42 = arith.constant 0 : index
    %78 = vector.load %arg8[%c0_41, %c0_42] : memref<128x4xf32, #tpu.memory_space<vmem>>, vector<128x4xf32>
    %cst_43 = arith.constant dense<0.000000e+00> : vector<1x4xf32>
    %79 = tpu.matmul %77, %78, %cst_43 {dimension_numbers = #tpu.dot_dimension_numbers<[1], [0], [0], [1], [0, 0, 1, 1], [], []>} : vector<1x128xf32>, vector<128x4xf32>, vector<1x4xf32> -> vector<1x4xf32>
    %cst_44 = arith.constant 3.906250e-03 : f32
    %80 = vector.broadcast %cst_44 : f32 to vector<1x4xf32>
    %81 = arith.mulf %79, %80 : vector<1x4xf32>
    %c0_45 = arith.constant 0 : index
    %c0_46 = arith.constant 0 : index
    %82 = vector.load %arg9[%c0_45, %c0_46] : memref<4x128xf32, #tpu.memory_space<vmem>>, vector<4x128xf32>
    %cst_47 = arith.constant dense<0.000000e+00> : vector<1x128xf32>
    %83 = tpu.matmul %81, %82, %cst_47 {dimension_numbers = #tpu.dot_dimension_numbers<[1], [0], [0], [1], [0, 0, 1, 1], [], []>} : vector<1x4xf32>, vector<4x128xf32>, vector<1x128xf32> -> vector<1x128xf32>
    %84 = vector.broadcast %83 : vector<1x128xf32> to vector<8x128xf32>
    %85 = arith.subf %75, %84 : vector<8x128xf32>
    %86 = arith.mulf %85, %85 : vector<8x128xf32>
    %cst_48 = arith.constant dense<0.000000e+00> : vector<128xf32>
    %87 = vector.multi_reduction <add>, %86, %cst_48 [0] : vector<8x128xf32> to vector<128xf32>
    %88 = vector.shape_cast %87 : vector<128xf32> to vector<1x128xf32>
    %c0_49 = arith.constant 0 : index
    %c0_50 = arith.constant 0 : index
    %89 = vector.load %arg8[%c0_49, %c0_50] : memref<128x4xf32, #tpu.memory_space<vmem>>, vector<128x4xf32>
    %cst_51 = arith.constant dense<0.000000e+00> : vector<1x4xf32>
    %90 = tpu.matmul %88, %89, %cst_51 {dimension_numbers = #tpu.dot_dimension_numbers<[1], [0], [0], [1], [0, 0, 1, 1], [], []>} : vector<1x128xf32>, vector<128x4xf32>, vector<1x4xf32> -> vector<1x4xf32>
    %cst_52 = arith.constant 3.906250e-03 : f32
    %91 = vector.broadcast %cst_52 : f32 to vector<1x4xf32>
    %92 = arith.mulf %90, %91 : vector<1x4xf32>
    %c0_53 = arith.constant 0 : index
    %c0_54 = arith.constant 0 : index
    %93 = vector.load %arg9[%c0_53, %c0_54] : memref<4x128xf32, #tpu.memory_space<vmem>>, vector<4x128xf32>
    %cst_55 = arith.constant dense<0.000000e+00> : vector<1x128xf32>
    %94 = tpu.matmul %92, %93, %cst_55 {dimension_numbers = #tpu.dot_dimension_numbers<[1], [0], [0], [1], [0, 0, 1, 1], [], []>} : vector<1x4xf32>, vector<4x128xf32>, vector<1x128xf32> -> vector<1x128xf32>
    %cst_56 = arith.constant 9.99999974E-6 : f32
    %95 = vector.broadcast %cst_56 : f32 to vector<1x128xf32>
    %96 = arith.addf %94, %95 : vector<1x128xf32>
    %97 = math.rsqrt %96 : vector<1x128xf32>
    %98 = vector.broadcast %97 : vector<1x128xf32> to vector<8x128xf32>
    %99 = arith.mulf %85, %98 : vector<8x128xf32>
    %c1_57 = arith.constant 1 : index
    %c0_58 = arith.constant 0 : index
    %100 = vector.load %arg7[%c1_57, %c0_58] : memref<3x128xf32, #tpu.memory_space<vmem>>, vector<1x128xf32>
    %101 = vector.broadcast %100 : vector<1x128xf32> to vector<8x128xf32>
    %102 = arith.mulf %99, %101 : vector<8x128xf32>
    %c2_59 = arith.constant 2 : index
    %c0_60 = arith.constant 0 : index
    %103 = vector.load %arg7[%c2_59, %c0_60] : memref<3x128xf32, #tpu.memory_space<vmem>>, vector<1x128xf32>
    %104 = vector.broadcast %103 : vector<1x128xf32> to vector<8x128xf32>
    %105 = arith.addf %102, %104 : vector<8x128xf32>
    %106 = arith.truncf %105 : vector<8x128xf32> to vector<8x128xbf16>
    %c0_61 = arith.constant 0 : index
    %c0_62 = arith.constant 0 : index
    %107 = vector.load %arg10[%c0_61, %c0_62] : memref<128x256xbf16, #tpu.memory_space<vmem>>, vector<128x256xbf16>
    %cst_63 = arith.constant dense<0.000000e+00> : vector<8x256xf32>
    %108 = tpu.matmul %106, %107, %cst_63 {dimension_numbers = #tpu.dot_dimension_numbers<[1], [0], [0], [1], [0, 0, 1, 1], [], []>} : vector<8x128xbf16>, vector<128x256xbf16>, vector<8x256xf32> -> vector<8x256xf32>
    %c0_64 = arith.constant 0 : index
    %c0_65 = arith.constant 0 : index
    %109 = vector.load %arg11[%c0_64, %c0_65] : memref<1x256xf32, #tpu.memory_space<vmem>>, vector<1x256xf32>
    %110 = vector.broadcast %109 : vector<1x256xf32> to vector<8x256xf32>
    %111 = arith.addf %108, %110 : vector<8x256xf32>
    %112 = arith.truncf %111 : vector<8x256xf32> to vector<8x256xbf16>
    %c0_66 = arith.constant 0 : index
    %c0_67 = arith.constant 0 : index
    %c0_68 = arith.constant 0 : index
    %113 = vector.load %arg12[%c0_66, %c0_67, %c0_68] : memref<1x8x256xbf16, #tpu.memory_space<vmem>>, vector<1x8x256xbf16>
    %114 = vector.shape_cast %113 : vector<1x8x256xbf16> to vector<8x256xbf16>
    %115 = vector.shape_cast %112 : vector<8x256xbf16> to vector<1x8x256xbf16>
    tpu.vector_store %arg12[%c0_66, %c0_67, %c0_68], %115 {strides = array<i32>} : memref<1x8x256xbf16, #tpu.memory_space<vmem>>, vector<1x8x256xbf16>,
    return
  }
  func.func @transform_0(%arg0: i32) -> (i32, i32, i32) {
    %c0_i32 = arith.constant 0 : i32
    %c0_i32_0 = arith.constant 0 : i32
    %c0_i32_1 = arith.constant 0 : i32
    return %arg0, %c0_i32, %c0_i32_0 : i32, i32, i32
  }
  func.func @transform_1(%arg0: i32) -> (i32, i32) {
    %c0_i32 = arith.constant 0 : i32
    %c0_i32_0 = arith.constant 0 : i32
    %c0_i32_1 = arith.constant 0 : i32
    return %c0_i32, %c0_i32_0 : i32, i32
  }
  func.func @transform_2(%arg0: i32) -> (i32, i32) {
    %c0_i32 = arith.constant 0 : i32
    %c0_i32_0 = arith.constant 0 : i32
    %c0_i32_1 = arith.constant 0 : i32
    return %c0_i32, %c0_i32_0 : i32, i32
  }
  func.func @transform_3(%arg0: i32) -> (i32, i32) {
    %c0_i32 = arith.constant 0 : i32
    %c0_i32_0 = arith.constant 0 : i32
    %c0_i32_1 = arith.constant 0 : i32
    return %c0_i32, %c0_i32_0 : i32, i32
  }
  func.func @transform_4(%arg0: i32) -> (i32, i32) {
    %c0_i32 = arith.constant 0 : i32
    %c0_i32_0 = arith.constant 0 : i32
    %c0_i32_1 = arith.constant 0 : i32
    return %c0_i32, %c0_i32_0 : i32, i32
  }
  func.func @transform_5(%arg0: i32) -> (i32, i32) {
    %c0_i32 = arith.constant 0 : i32
    %c0_i32_0 = arith.constant 0 : i32
    %c0_i32_1 = arith.constant 0 : i32
    return %c0_i32, %c0_i32_0 : i32, i32
  }
  func.func @transform_6(%arg0: i32) -> (i32, i32) {
    %c0_i32 = arith.constant 0 : i32
    %c0_i32_0 = arith.constant 0 : i32
    %c0_i32_1 = arith.constant 0 : i32
    return %c0_i32, %c0_i32_0 : i32, i32
  }
  func.func @transform_7(%arg0: i32) -> (i32, i32) {
    %c0_i32 = arith.constant 0 : i32
    %c0_i32_0 = arith.constant 0 : i32
    %c0_i32_1 = arith.constant 0 : i32
    return %c0_i32, %c0_i32_0 : i32, i32
  }
  func.func @transform_8(%arg0: i32) -> (i32, i32) {
    %c0_i32 = arith.constant 0 : i32
    %c0_i32_0 = arith.constant 0 : i32
    %c0_i32_1 = arith.constant 0 : i32
    return %c0_i32, %c0_i32_0 : i32, i32
  }
  func.func @transform_9(%arg0: i32) -> (i32, i32) {
    %c0_i32 = arith.constant 0 : i32
    %c0_i32_0 = arith.constant 0 : i32
    %c0_i32_1 = arith.constant 0 : i32
    return %c0_i32, %c0_i32_0 : i32, i32
  }
  func.func @transform_10(%arg0: i32) -> (i32, i32) {
    %c0_i32 = arith.constant 0 : i32
    %c0_i32_0 = arith.constant 0 : i32
    %c0_i32_1 = arith.constant 0 : i32
    return %c0_i32, %c0_i32_0 : i32, i32
  }
  func.func @transform_11(%arg0: i32) -> (i32, i32, i32) {
    %c0_i32 = arith.constant 0 : i32
    %c0_i32_0 = arith.constant 0 : i32
    %c0_i32_1 = arith.constant 0 : i32
    return %arg0, %c0_i32, %c0_i32_0 : i32, i32, i32
  }
}

</mosaic_0001>

<bundles_post_ra>
// kernel: unet_forward.3
= control target key start
LH: loop header
LB: loop body
LE: loop exit
PB: predicated region body
PF: predicated region fallthrough
CT: control target
= control target key end

     0   :  { %s1975_s24 = smov 0   ;;  %s2409_s0 = inlined_call_operand.vmem [shape: f32[2,16,64], index: 0, kind: input, shape index: {}]   ;;  %s2410_s1 = inlined_call_operand.vmem [shape: bf16[64,384], index: 1, kind: input, shape index: {}]   ;;  %s2411_s2 = inlined_call_operand.vmem [shape: f32[3,128], index: 2, kind: input, shape index: {}]   ;;  %s2412_s3 = inlined_call_operand.vmem [shape: bf16[128,384], index: 3, kind: input, shape index: {}]   ;;  %s2413_s4 = inlined_call_operand.vmem [shape: f32[3,128], index: 4, kind: input, shape index: {}]   ;;  %s2414_s5 = inlined_call_operand.vmem [shape: f32[128,2], index: 5, kind: input, shape index: {}]   ;;  %s2415_s6 = inlined_call_operand.vmem [shape: f32[2,128], index: 6, kind: input, shape index: {}]   ;;  %s2416_s7 = inlined_call_operand.vmem [shape: bf16[2,16,128], index: 7, kind: output, shape index: {}]  }
   0x1 LB: > { %s1505_s25 = sadd.s32 4294967295, %s1930_s24   ;;  %p1509_p0 = scmp.ge.s32.totalorder %s1930_s24, 1  ;;  %s1930_s24 = sphi %s1975_s24, %s17_s24  }
   0x2   : > { %p237_p1 = scmp.lt.s32.totalorder %s1930_s24, 3 }
   0x4   : > { %p238_p2 = pnand %p1509_p0, %p237_p1 }
   0x5   : > { %p269_p3 = scmp.lt.s32.totalorder (!%p238_p2), %s1505_s25, 1 }
   0x6   : > { %241 = sbr.rel (%p238_p2) target bundleno = 2118 (0x846), region = 48 }
   0xb   : > { %v1872_v0 = vld [vmem:[%s2410_s1 + $0x4c] ss:$12 sps:$4 sm:$0xff]   ;;  %v1932_v1 = vmov 0.0   ;;  %v1874_v2 = vld [vmem:[%s2410_s1 + $0x50] ss:$12 sps:$4 sm:$0xff]   ;;  %vm1933_vm0 = vmmov 0  }
   0xc   : > { %1669 = vmatprep.subr.bf16.mxu1 %v1932_v1  ;;  %1677 = vmatprep.mubr.msk.bf16.mxu1 %vm1933_vm0, %v1932_v1  ;;  %v1875_v3 = vld [vmem:[%s2410_s1 + $0x48] ss:$12 sps:$4 sm:$0xff]   ;;  %v1934_v5 = vmov 0   ;;  %v1878_v6 = vld [vmem:[%s2410_s1 + $0x38] ss:$12 sps:$4 sm:$0xff]   ;;  %s2418_s25 = smov (!%p269_p3, %s1505_s25), 1 }
   0xd   : > { %375 = vmatprep.subr.bf16.mxu0 %v1872_v0  ;;  %1670 = vmatpush3.bf16.msra.mxu1 %v1874_v2  ;;  %v1876_v4 = vld [vmem:[%s2410_s1 + $0x34] ss:$12 sps:$4 sm:$0xff]   ;;  %v1879_v7 = vld [vmem:[%s2410_s1 + $0x30] ss:$12 sps:$4 sm:$0xff]   ;;  %v1883_v10 = vld [vmem:[%s2410_s1 + $0x18] ss:$12 sps:$4 sm:$0xff]  }
   0xe   : > { %399 = vmatprep.mubr.bf16.mxu0 %v1934_v5  ;;  %376 = vmatpush1.bf16.msra.mxu0 %v1875_v3  ;;  %v1880_v8 = vld [vmem:[%s2410_s1 + $0x1c] ss:$12 sps:$4 sm:$0xff]   ;;  %v1882_v9 = vld [vmem:[%s2410_s1 + $0x20] ss:$12 sps:$4 sm:$0xff]   ;;  %s1570_s21 = sshll.u32 %s2418_s25, 4  ;;  %vm363_vm1 = vcmask 523264  }
   0xf   : > { %1671 = vmatprep.subr.bf16.mxu1 %v1932_v1  ;;  %377 = vmatprep.subr.bf16.mxu0 %v1876_v4  ;;  %v1884_v11 = vld [vmem:[%s2410_s1 + $0x4] ss:$12 sps:$4 sm:$0xff]   ;;  %s273_s28 = scalar_lea.vmem %s2409_s0, %s1570_s21  ;;  %v1886_v12 = vld [vmem:[%s2410_s1 + $0x8] ss:$12 sps:$4 sm:$0xff]   ;;  %v1887_v15 = vld [vmem:[%s2410_s1] ss:$12 sps:$4 sm:$0xff]  }
  0x10   : > { %v280_v13 = vld [vmem:[%s273_s28] sm:$0xff]  ;;  %v281_v14 = vld [vmem:[%s273_s28 + $0x8] sm:$0xff]  ;;  %v2041_v17 = vld [vmem:[%s2414_s5 + $0x78] sm:$0xff]  ;;  %vm453_vm2 = vcmask 1040384   ;;  %vm464_vm3 = vcmask 1046528   ;;  %vm581_vm4 = vcmask 1041408  }
  0x11   : > { %1672 = vmatpush3.bf16.msra.mxu1 %v1878_v6  ;;  %v282_v16 = vpack.c.bf16 %v281_v14, %v280_v13  ;;  %v2049_v18 = vld [vmem:[%s2414_s5 + $0x70] sm:$0xff]  ;;  %v2058_v19 = vld [vmem:[%s2414_s5 + $0x68] sm:$0xff]  ;;  %v2067_v20 = vld [vmem:[%s2414_s5 + $0x60] sm:$0xff]  ;;  %vm577_vm5 = vcmask 15360   ;;  %s1571_s20 = sshll.u32 %s2418_s25, 3 }
  0x12   : > { %378 = vmatpush1.bf16.msra.mxu0 %v1879_v7  ;;  %1673 = vmatprep.subr.bf16.mxu1 %v1932_v1  ;;  %v2076_v21 = vld [vmem:[%s2414_s5 + $0x58] sm:$0xff]  ;;  %v2085_v22 = vld [vmem:[%s2414_s5 + $0x50] sm:$0xff]  ;;  %v2094_v23 = vld [vmem:[%s2414_s5 + $0x48] sm:$0xff]  ;;  %v655_v7 = vlaneseq  ;;  %s278_s23 = scalar_lea.vmem %s2416_s7, %s1571_s20 }
  0x13   : > { %379 = vmatprep.subr.bf16.mxu0 %v1880_v8  ;;  %v2103_v24 = vld [vmem:[%s2414_s5 + $0x40] sm:$0xff]  ;;  %v2112_v25 = vld [vmem:[%s2414_s5 + $0x38] sm:$0xff]  ;;  %v2121_v26 = vld [vmem:[%s2414_s5 + $0x30] sm:$0xff] }
  0x14   : > { %v2130_v27 = vld [vmem:[%s2414_s5 + $0x28] sm:$0xff]  ;;  %v2139_v28 = vld [vmem:[%s2414_s5 + $0x20] sm:$0xff]  ;;  %v2148_v29 = vld [vmem:[%s2414_s5 + $0x18] sm:$0xff]  ;;  %v656_v8 = vshrl.u32 %v655_v7, 7 }
  0x15   : > { %1674 = vmatpush3.bf16.msra.mxu1 %v1882_v9  ;;  %v2153_v30 = vld [vmem:[%s2414_s5 + $0x10] sm:$0xff]  ;;  %v2162_v31 = vld [vmem:[%s2414_s5 + $0x8] sm:$0xff]  ;;  %v2171_v32 = vld [vmem:[%s2414_s5] sm:$0xff] }
  0x16   : > { %380 = vmatpush1.bf16.msra.mxu0 %v1883_v10  ;;  %1675 = vmatprep.subr.bf16.mxu1 %v1932_v1  ;;  %v1528_v50 = vld [vmem:[%s2411_s2] ss:$0 sm:$0xff]  ;;  %v2204_v9 = vsub.s32 0, %v656_v8 }
  0x17   : > { %381 = vmatprep.subr.bf16.mxu0 %v1884_v11  ;;  %v2192_v2 = vld [vmem:[%s2415_s6] sm:$0x3] }
  0x19   : > { %1676 = vmatpush3.bf16.msra.mxu1 %v1886_v12 }
  0x1a   : > { %382 = vmatpush1.bf16.msra.mxu0 %v1887_v15  ;;  %1721 = vmatprep.subr.mxu1 %v1932_v1 }
  0x1b   : > { %1681 = vmatprep.subr.mxu0 %v1932_v1 }
  0x1c   : > { %1678 = vmatmul.mubr.msk.bf16.vlgmr.msra.gmra.mxu1 %vm363_vm1, %v282_v16 }
  0x1d   : > { %1526 = vmatmul.mubr.msk.bf16.vlgmr.msra.gmra.mxu0 %vm363_vm1, %v282_v16  ;;  %1753 = vmatprep.mubr.msk.f32.mxu1 %vm1933_vm0, %v1932_v1 }
  0x1e   : > { %1713 = vmatprep.mubr.msk.f32.mxu0 %vm1933_vm0, %v1932_v1  ;;  %1682 = vmatpush3.msra.mxu0 %v2041_v17 }
  0x1f   : > { %1722 = vmatpush3.msra.mxu1 %v2041_v17  ;;  %1683 = vmatprep.subr.mxu0 %v1932_v1 }
  0x20   : > { %1723 = vmatprep.subr.mxu1 %v1932_v1  ;;  %1684 = vmatpush3.msra.mxu0 %v2049_v18 }
  0x21   : > { %1724 = vmatpush3.msra.mxu1 %v2049_v18  ;;  %1685 = vmatprep.subr.mxu0 %v1932_v1 }
  0x22   : > { %1725 = vmatprep.subr.mxu1 %v1932_v1  ;;  %1686 = vmatpush3.msra.mxu0 %v2058_v19 }
  0x23   : > { %1726 = vmatpush3.msra.mxu1 %v2058_v19  ;;  %1687 = vmatprep.subr.mxu0 %v1932_v1 }
  0x24   : > { %1727 = vmatprep.subr.mxu1 %v1932_v1  ;;  %1688 = vmatpush3.msra.mxu0 %v2067_v20 }
  0x25   : > { %1728 = vmatpush3.msra.mxu1 %v2067_v20  ;;  %1689 = vmatprep.subr.mxu0 %v1932_v1 }
  0x26   : > { %1729 = vmatprep.subr.mxu1 %v1932_v1  ;;  %1690 = vmatpush3.msra.mxu0 %v2076_v21 }
  0x27   : > { %1730 = vmatpush3.msra.mxu1 %v2076_v21  ;;  %1691 = vmatprep.subr.mxu0 %v1932_v1 }
  0x28   : > { %1731 = vmatprep.subr.mxu1 %v1932_v1  ;;  %1692 = vmatpush3.msra.mxu0 %v2085_v22 }
  0x29   : > { %1732 = vmatpush3.msra.mxu1 %v2085_v22  ;;  %1693 = vmatprep.subr.mxu0 %v1932_v1 }
  0x2a   : > { %1733 = vmatprep.subr.mxu1 %v1932_v1  ;;  %1694 = vmatpush3.msra.mxu0 %v2094_v23 }
  0x2b   : > { %1734 = vmatpush3.msra.mxu1 %v2094_v23  ;;  %1695 = vmatprep.subr.mxu0 %v1932_v1 }
  0x2c   : > { %1735 = vmatprep.subr.mxu1 %v1932_v1  ;;  %1696 = vmatpush3.msra.mxu0 %v2103_v24 }
  0x2d   : > { %1736 = vmatpush3.msra.mxu1 %v2103_v24  ;;  %1697 = vmatprep.subr.mxu0 %v1932_v1 }
  0x2e   : > { %1737 = vmatprep.subr.mxu1 %v1932_v1  ;;  %1698 = vmatpush3.msra.mxu0 %v2112_v25 }
  0x2f   : > { %1738 = vmatpush3.msra.mxu1 %v2112_v25  ;;  %1699 = vmatprep.subr.mxu0 %v1932_v1 }
  0x30   : > { %1739 = vmatprep.subr.mxu1 %v1932_v1  ;;  %1700 = vmatpush3.msra.mxu0 %v2121_v26 }
  0x31   : > { %1740 = vmatpush3.msra.mxu1 %v2121_v26  ;;  %1701 = vmatprep.subr.mxu0 %v1932_v1 }
  0x32   : > { %1741 = vmatprep.subr.mxu1 %v1932_v1  ;;  %1702 = vmatpush3.msra.mxu0 %v2130_v27 }
  0x33   : > { %1742 = vmatpush3.msra.mxu1 %v2130_v27  ;;  %1703 = vmatprep.subr.mxu0 %v1932_v1 }
  0x34   : > { %1743 = vmatprep.subr.mxu1 %v1932_v1  ;;  %1704 = vmatpush3.msra.mxu0 %v2139_v28 }
  0x35   : > { %1744 = vmatpush3.msra.mxu1 %v2139_v28  ;;  %1705 = vmatprep.subr.mxu0 %v1932_v1 }
  0x36   : > { %1745 = vmatprep.subr.mxu1 %v1932_v1  ;;  %1706 = vmatpush3.msra.mxu0 %v2148_v29 }
  0x37   : > { %1746 = vmatpush3.msra.mxu1 %v2148_v29  ;;  %1707 = vmatprep.subr.mxu0 %v1932_v1 }
  0x38   : > { %1747 = vmatprep.subr.mxu1 %v1932_v1  ;;  %1708 = vmatpush3.msra.mxu0 %v2153_v30 }
  0x39   : > { %1748 = vmatpush3.msra.mxu1 %v2153_v30  ;;  %1709 = vmatprep.subr.mxu0 %v1932_v1 }
  0x3a   : > { %1749 = vmatprep.subr.mxu1 %v1932_v1  ;;  %1710 = vmatpush3.msra.mxu0 %v2162_v31 }
  0x3b   : > { %1750 = vmatpush3.msra.mxu1 %v2162_v31  ;;  %1711 = vmatprep.subr.mxu0 %v1932_v1 }
  0x3c   : > { %1751 = vmatprep.subr.mxu1 %v1932_v1  ;;  %1712 = vmatpush3.msra.mxu0 %v2171_v32 }
  0x3d   : > { %1752 = vmatpush3.msra.mxu1 %v2171_v32  ;;  %1716 = vmatprep.subr.mxu0 %v1932_v1 }
  0x3e   : > { %1761 = vmatprep.subr.bf16.mxu1 %v1932_v1 }
  0xdc   : > { %v444_v33 = vpop.f32.mrf.mxu1 }
  0xdd   : > { %v401_v34 = vpop.f32.mrf.mxu0  ;;  %v465_v37 = vrot.slane %v444_v33, 1 }
  0xde   : > { %v454_v35 = vrot.slane %v401_v34, 7  ;;  %v1679_v36 = vpop.f32.mrf.mxu1 }
  0xdf   : > { %v403_v38 = vpop.f32.mrf.mxu0 }
  0xe0   : > { %v459_v39 = vsel %vm453_vm2, 0.0, %v454_v35  ;;  %v447_v40 = vpop.f32.mrf.mxu1 }
  0xe1   : > { %v460_v41 = vadd.f32 %v459_v39, %v403_v38  ;;  %v466_v42 = vrot.slane %v447_v40, 1  ;;  %v405_v43 = vpop.f32.mrf.mxu0  ;;  %v1890_v40 = vld [vmem:[%s2412_s3 + $0xac] ss:$12 sps:$4 sm:$0xff]  }
  0xe2   : > { %v455_v44 = vrot.slane %v405_v43, 7  ;;  %v1680_v45 = vpop.f32.mrf.mxu1  ;;  %v1888_v43 = vld [vmem:[%s2412_s3 + $0xa8] ss:$12 sps:$4 sm:$0xff]  }
  0xe3   : > { %v467_v46 = vsel %vm464_vm3, %v465_v37, %v466_v42  ;;  %v407_v47 = vpop.f32.mrf.mxu0  ;;  %v470_v52 = vsel %vm464_vm3, %v466_v42, 0.0  ;;  %v1894_v45 = vld [vmem:[%s2412_s3 + $0x94] ss:$12 sps:$4 sm:$0xff]  }
  0xe4   : > { %v471_v48 = vadd.f32 %v467_v46, %v460_v41  ;;  %v456_v49 = vsel %vm453_vm2, %v454_v35, %v455_v44  ;;  %v1891_v41 = vld [vmem:[%s2412_s3 + $0xb0] ss:$12 sps:$4 sm:$0xff]  }
  0xe5   : > { %v461_v51 = vadd.f32 %v456_v49, %v407_v47  ;;  %v1892_v47 = vld [vmem:[%s2412_s3 + $0x90] ss:$12 sps:$4 sm:$0xff]  }
  0xe6   : > { %v478_v54 = vadd.f32 %v1528_v50, %v471_v48  ;;  %v1895_v48 = vld [vmem:[%s2412_s3 + $0x98] ss:$12 sps:$4 sm:$0xff]   ;;  %v1898_v49 = vld [vmem:[%s2412_s3 + $0x7c] ss:$12 sps:$4 sm:$0xff]  }
  0xe7   : > { %v472_v53 = vadd.f32 %v470_v52, %v461_v51  ;;  %v1902_v51 = vld [vmem:[%s2412_s3 + $0x64] ss:$12 sps:$4 sm:$0xff]   ;;  %v1900_v52 = vld [vmem:[%s2412_s3 + $0x60] ss:$12 sps:$4 sm:$0xff]  }
  0xe8   : > { %v480_v56 = vmax.f32 %v478_v54, 0.0  ;;  %v1906_v54 = vld [vmem:[%s2412_s3 + $0x4c] ss:$12 sps:$4 sm:$0xff]  }
  0xe9   : > { %v479_v55 = vadd.f32 %v1528_v50, %v472_v53  ;;  %v1896_v50 = vld [vmem:[%s2412_s3 + $0x78] ss:$12 sps:$4 sm:$0xff]   ;;  %v1903_v53 = vld [vmem:[%s2412_s3 + $0x68] ss:$12 sps:$4 sm:$0xff]  }
  0xeb   : > { %v481_v57 = vmax.f32 %v479_v55, 0.0  ;;  %v1904_v55 = vld [vmem:[%s2412_s3 + $0x48] ss:$12 sps:$4 sm:$0xff]  }
  0xed   : > { %v482_v58 = vadd.f32 %v481_v57, %v480_v56 }
  0xef   : > { %v483_v59 = vrot.slane %v482_v58, 4 }
  0xf1   : > { %v484_v60 = vadd.f32 %v483_v59, %v482_v58  ;;  %v1908_v58 = vld [vmem:[%s2412_s3 + $0x30] ss:$12 sps:$4 sm:$0xff]   ;;  %v1911_v59 = vld [vmem:[%s2412_s3 + $0x38] ss:$12 sps:$4 sm:$0xff]  }
  0xf3   : > { %v485_v61 = vrot.slane %v484_v60, 2 }
  0xf5   : > { %v486_v62 = vadd.f32 %v485_v61, %v484_v60  ;;  %v1912_v60 = vld [vmem:[%s2412_s3 + $0x18] ss:$12 sps:$4 sm:$0xff]   ;;  %v1914_v61 = vld [vmem:[%s2412_s3 + $0x1c] ss:$12 sps:$4 sm:$0xff]  }
  0xf7   : > { %v487_v63 = vrot.slane %v486_v62, 1 }
  0xf9   : > { %v488_v0 = vadd.f32 %v487_v63, %v486_v62  ;;  %v1915_v62 = vld [vmem:[%s2412_s3 + $0x20] ss:$12 sps:$4 sm:$0xff]   ;;  %v1918_v63 = vld [vmem:[%s2412_s3 + $0x4] ss:$12 sps:$4 sm:$0xff]  }
  0xfb   : > { %1714 = vmatmul.mubr.f32.vlgmr.msra.gmra.mxu0 %v488_v0  ;;  %v1916_v0 = vld [vmem:[%s2412_s3] ss:$12 sps:$4 sm:$0xff]  }
  0xfc   : > { %1717 = vmatpush3.msk.msra.mxu0 %vm581_vm4, %v2192_v2  ;;  %1718 = vmatprep.mubr.msk.f32.mxu0 %vm1933_vm0, %v1932_v1 }
  0xfd   : > { %1756 = vmatprep.subr.mxu0 %v1932_v1 }
 0x1bb   : > { %v571_v3 = vpop.f32.mrf.mxu0 }
 0x1bc   : > { %v575_v4 = vmul.f32 0.0009765625, %v571_v3  ;;  %v1919_v3 = vld [vmem:[%s2412_s3 + $0x8] ss:$12 sps:$4 sm:$0xff]  }
 0x1bd   : > { %v1715_v6 = vpop.f32.mrf.mxu0 }
 0x1be   : > { %1719 = vmatmul.mubr.msk.f32.vlgmr.msra.gmra.mxu0 %vm577_vm5, %v575_v4 }
 0x1bf   : > { %1757 = vmatpush3.msk.msra.mxu0 %vm581_vm4, %v2192_v2  ;;  %1758 = vmatprep.mubr.msk.f32.mxu0 %vm1933_vm0, %v1932_v1 }
 0x1c0   : > { %996 = vmatprep.subr.bf16.mxu0 %v1890_v40 }
 0x27e   : > { %v651_v10 = vpop.f32.mrf.mxu0 }
 0x27f   : > { %v658_v11 = vrot.slane %v651_v10, %v2204_v9 }
 0x280   : > { %v1720_v12 = vpop.f32.mrf.mxu0 }
 0x281   : > { %v2207_v13 = vsub.f32 %v480_v56, %v658_v11  ;;  %v2209_v14 = vsub.f32 %v481_v57, %v658_v11  ;;  %v1907_v56 = vld [vmem:[%s2412_s3 + $0x50] ss:$12 sps:$4 sm:$0xff]   ;;  %v1910_v57 = vld [vmem:[%s2412_s3 + $0x34] ss:$12 sps:$4 sm:$0xff]  }
 0x282   : > { %v1533_v11 = vld [vmem:[%s2411_s2 + $0x1] ss:$0 sm:$0xff] }
 0x283   : > { %v661_v15 = vmul.f32 %v2207_v13, %v2207_v13  ;;  %v662_v16 = vmul.f32 %v2209_v14, %v2209_v14 }
 0x285   : > { %v663_v33 = vadd.f32 %v662_v16, %v661_v15  ;;  %v1534_v16 = vld [vmem:[%s2411_s2 + $0x2] ss:$0 sm:$0xff] }
 0x287   : > { %v664_v34 = vrot.slane %v663_v33, 4 }
 0x289   : > { %v665_v35 = vadd.f32 %v664_v34, %v663_v33 }
 0x28b   : > { %v666_v36 = vrot.slane %v665_v35, 2 }
 0x28d   : > { %v667_v37 = vadd.f32 %v666_v36, %v665_v35 }
 0x28f   : > { %v668_v38 = vrot.slane %v667_v37, 1 }
 0x291   : > { %v669_v39 = vadd.f32 %v668_v38, %v667_v37 }
 0x293   : > { %1754 = vmatmul.mubr.f32.vlgmr.msra.gmra.mxu1 %v669_v39 }
 0x294   : > { %1777 = vmatprep.mubr.msk.bf16.mxu1 %vm1933_vm0, %v1932_v1  ;;  %1762 = vmatpush3.bf16.msra.mxu1 %v1891_v41 }
 0x295   : > { %1763 = vmatprep.subr.bf16.mxu1 %v1932_v1 }
 0x298   : > { %1764 = vmatpush3.bf16.msra.mxu1 %v1895_v48 }
 0x299   : > { %1765 = vmatprep.subr.bf16.mxu1 %v1932_v1 }
 0x353   : > { %v736_v42 = vpop.f32.mrf.mxu1 }
 0x354   : > { %v740_v44 = vmul.f32 0.0009765625, %v736_v42 }
 0x355   : > { %v1755_v46 = vpop.f32.mrf.mxu1 }
 0x356   : > { %1759 = vmatmul.mubr.msk.f32.vlgmr.msra.gmra.mxu0 %vm577_vm5, %v740_v44 }
 0x357   : > { %997 = vmatpush1.bf16.msra.mxu0 %v1888_v43  ;;  %1028 = vmatprep.mubr.bf16.mxu0 %v1934_v5  ;;  %v1899_v5 = vld [vmem:[%s2412_s3 + $0x80] ss:$12 sps:$4 sm:$0xff]  }
 0x358   : > { %998 = vmatprep.subr.bf16.mxu0 %v1894_v45  ;;  %1766 = vmatpush3.bf16.msra.mxu1 %v1899_v5 }
 0x359   : > { %1767 = vmatprep.subr.bf16.mxu1 %v1932_v1 }
 0x35b   : > { %999 = vmatpush1.bf16.msra.mxu0 %v1892_v47 }
 0x35c   : > { %1000 = vmatprep.subr.bf16.mxu0 %v1898_v49  ;;  %1768 = vmatpush3.bf16.msra.mxu1 %v1903_v53 }
 0x35d   : > { %1769 = vmatprep.subr.bf16.mxu1 %v1932_v1 }
 0x35f   : > { %1001 = vmatpush1.bf16.msra.mxu0 %v1896_v50 }
 0x360   : > { %1002 = vmatprep.subr.bf16.mxu0 %v1902_v51  ;;  %1770 = vmatpush3.bf16.msra.mxu1 %v1907_v56  ;;  %v1559_v51 = vld [vmem:[%s2413_s4] ss:$0 sm:$0xff] }
 0x361   : > { %1771 = vmatprep.subr.bf16.mxu1 %v1932_v1 }
 0x363   : > { %1003 = vmatpush1.bf16.msra.mxu0 %v1900_v52 }
 0x364   : > { %1004 = vmatprep.subr.bf16.mxu0 %v1906_v54  ;;  %1772 = vmatpush3.bf16.msra.mxu1 %v1911_v59 }
 0x365   : > { %1773 = vmatprep.subr.bf16.mxu1 %v1932_v1 }
 0x367   : > { %1005 = vmatpush1.bf16.msra.mxu0 %v1904_v55 }
 0x368   : > { %1006 = vmatprep.subr.bf16.mxu0 %v1910_v57  ;;  %1774 = vmatpush3.bf16.msra.mxu1 %v1915_v62 }
 0x369   : > { %1775 = vmatprep.subr.bf16.mxu1 %v1932_v1 }
 0x36b   : > { %1007 = vmatpush1.bf16.msra.mxu0 %v1908_v58 }
 0x36c   : > { %1008 = vmatprep.subr.bf16.mxu0 %v1914_v61  ;;  %1776 = vmatpush3.bf16.msra.mxu1 %v1919_v3 }
 0x36d   : > { %1816 = vmatprep.subr.mxu1 %v1932_v1 }
 0x36f   : > { %1009 = vmatpush1.bf16.msra.mxu0 %v1912_v60 }
 0x370   : > { %1010 = vmatprep.subr.bf16.mxu0 %v1918_v63 }
 0x373   : > { %1011 = vmatpush1.bf16.msra.mxu0 %v1916_v0 }
 0x374   : > { %1781 = vmatprep.subr.mxu0 %v1932_v1 }
 0x416   : > { %v810_v4 = vpop.f32.mrf.mxu0 }
 0x417   : > { %v811_v6 = vadd.f32 1e-05, %v810_v4 }
 0x418   : > { %v1760_v7 = vpop.f32.mrf.mxu0 }
 0x419   : > { %1920 = vrsqrt.f32 %v811_v6 }
 0x426   : > { %v1921_v8 = vpop.eup %1920 }
 0x427   : > { %v818_v10 = vrot.slane %v1921_v8, %v2204_v9 }
 0x429   : > { %v819_v12 = vmul.f32 %v818_v10, %v2207_v13  ;;  %v820_v15 = vmul.f32 %v818_v10, %v2209_v14 }
 0x42b   : > { %v826_v33 = vmul.f32 %v1533_v11, %v819_v12  ;;  %v827_v34 = vmul.f32 %v1533_v11, %v820_v15 }
 0x42d   : > { %v833_v35 = vadd.f32 %v1534_v16, %v826_v33  ;;  %v834_v36 = vadd.f32 %v1534_v16, %v827_v34  ;;  %v1564_v16 = vld [vmem:[%s2413_s4 + $0x1] ss:$0 sm:$0xff] }
 0x42f   : > { %v835_v37 = vpack.c.bf16 %v834_v36, %v833_v35  ;;  %v1565_v35 = vld [vmem:[%s2413_s4 + $0x2] ss:$0 sm:$0xff] }
 0x431   : > { %1029 = vmatmul.mubr.bf16.vlgmr.msra.gmra.mxu0 %v835_v37  ;;  %1778 = vmatmul.mubr.bf16.vlgmr.msra.gmra.mxu1 %v835_v37 }
 0x432   : > { %1782 = vmatpush3.msra.mxu0 %v2041_v17  ;;  %1813 = vmatprep.mubr.msk.f32.mxu0 %vm1933_vm0, %v1932_v1 }
 0x433   : > { %1783 = vmatprep.subr.mxu0 %v1932_v1  ;;  %1817 = vmatpush3.msk.msra.mxu1 %vm581_vm4, %v2192_v2 }
 0x434   : > { %1784 = vmatpush3.msra.mxu0 %v2049_v18  ;;  %1818 = vmatprep.mubr.msk.f32.mxu1 %vm1933_vm0, %v1932_v1 }
 0x435   : > { %1785 = vmatprep.subr.mxu0 %v1932_v1  ;;  %1821 = vmatprep.subr.mxu1 %v1932_v1 }
 0x436   : > { %1786 = vmatpush3.msra.mxu0 %v2058_v19 }
 0x437   : > { %1787 = vmatprep.subr.mxu0 %v1932_v1 }
 0x438   : > { %1788 = vmatpush3.msra.mxu0 %v2067_v20 }
 0x439   : > { %1789 = vmatprep.subr.mxu0 %v1932_v1 }
 0x43a   : > { %1790 = vmatpush3.msra.mxu0 %v2076_v21 }
 0x43b   : > { %1791 = vmatprep.subr.mxu0 %v1932_v1 }
 0x43c   : > { %1792 = vmatpush3.msra.mxu0 %v2085_v22 }
 0x43d   : > { %1793 = vmatprep.subr.mxu0 %v1932_v1 }
 0x43e   : > { %1794 = vmatpush3.msra.mxu0 %v2094_v23 }
 0x43f   : > { %1795 = vmatprep.subr.mxu0 %v1932_v1 }
 0x440   : > { %1796 = vmatpush3.msra.mxu0 %v2103_v24 }
 0x441   : > { %1797 = vmatprep.subr.mxu0 %v1932_v1 }
 0x442   : > { %1798 = vmatpush3.msra.mxu0 %v2112_v25 }
 0x443   : > { %1799 = vmatprep.subr.mxu0 %v1932_v1 }
 0x444   : > { %1800 = vmatpush3.msra.mxu0 %v2121_v26 }
 0x445   : > { %1801 = vmatprep.subr.mxu0 %v1932_v1 }
 0x446   : > { %1802 = vmatpush3.msra.mxu0 %v2130_v27 }
 0x447   : > { %1803 = vmatprep.subr.mxu0 %v1932_v1 }
 0x448   : > { %1804 = vmatpush3.msra.mxu0 %v2139_v28 }
 0x449   : > { %1805 = vmatprep.subr.mxu0 %v1932_v1 }
 0x44a   : > { %1806 = vmatpush3.msra.mxu0 %v2148_v29 }
 0x44b   : > { %1807 = vmatprep.subr.mxu0 %v1932_v1 }
 0x44c   : > { %1808 = vmatpush3.msra.mxu0 %v2153_v30 }
 0x44d   : > { %1809 = vmatprep.subr.mxu0 %v1932_v1 }
 0x44e   : > { %1810 = vmatpush3.msra.mxu0 %v2162_v31 }
 0x44f   : > { %1811 = vmatprep.subr.mxu0 %v1932_v1 }
 0x450   : > { %1812 = vmatpush3.msra.mxu0 %v2171_v32 }
 0x451   : > { %1856 = vmatprep.subr.mxu0 %v1932_v1 }
 0x4f1   : > { %v1030_v13 = vpop.f32.mrf.mxu0  ;;  %v1073_v14 = vpop.f32.mrf.mxu1 }
 0x4f2   : > { %v1082_v38 = vrot.slane %v1030_v13, 7  ;;  %v1092_v44 = vrot.slane %v1073_v14, 1 }
 0x4f3   : > { %v1032_v39 = vpop.f32.mrf.mxu0  ;;  %v1779_v40 = vpop.f32.mrf.mxu1 }
 0x4f4   : > { %v1087_v41 = vsel %vm453_vm2, 0.0, %v1082_v38 }
 0x4f5   : > { %v1034_v42 = vpop.f32.mrf.mxu0  ;;  %v1076_v43 = vpop.f32.mrf.mxu1  ;;  %v1088_v47 = vadd.f32 %v1087_v41, %v1032_v39 }
 0x4f6   : > { %v1083_v45 = vrot.slane %v1034_v42, 7  ;;  %v1093_v46 = vrot.slane %v1076_v43, 1 }
 0x4f7   : > { %v1036_v48 = vpop.f32.mrf.mxu0  ;;  %v1780_v49 = vpop.f32.mrf.mxu1 }
 0x4f8   : > { %v1094_v50 = vsel %vm464_vm3, %v1092_v44, %v1093_v46  ;;  %v1084_v5 = vsel %vm453_vm2, %v1082_v38, %v1083_v45  ;;  %v1097_v54 = vsel %vm464_vm3, %v1093_v46, 0.0 }
 0x4f9   : > { %v1098_v52 = vadd.f32 %v1094_v50, %v1088_v47  ;;  %v1089_v53 = vadd.f32 %v1084_v5, %v1036_v48 }
 0x4fb   : > { %v1099_v55 = vadd.f32 %v1097_v54, %v1089_v53  ;;  %v1105_v56 = vadd.f32 %v1559_v51, %v1098_v52 }
 0x4fd   : > { %v1106_v57 = vadd.f32 %v1559_v51, %v1099_v55  ;;  %v1107_v58 = vmax.f32 %v1105_v56, 0.0 }
 0x4ff   : > { %v1108_v59 = vmax.f32 %v1106_v57, 0.0 }
 0x501   : > { %v1109_v60 = vadd.f32 %v1108_v59, %v1107_v58 }
 0x503   : > { %v1110_v61 = vrot.slane %v1109_v60, 4 }
 0x505   : > { %v1111_v62 = vadd.f32 %v1110_v61, %v1109_v60 }
 0x507   : > { %v1112_v63 = vrot.slane %v1111_v62, 2 }
 0x509   : > { %v1113_v0 = vadd.f32 %v1112_v63, %v1111_v62 }
 0x50b   : > { %v1114_v3 = vrot.slane %v1113_v0, 1 }
 0x50d   : > { %v1115_v4 = vadd.f32 %v1114_v3, %v1113_v0 }
 0x50f   : > { %1814 = vmatmul.mubr.f32.vlgmr.msra.gmra.mxu0 %v1115_v4 }
 0x510   : > { %1857 = vmatpush3.msk.msra.mxu0 %vm581_vm4, %v2192_v2  ;;  %1858 = vmatprep.mubr.msk.f32.mxu0 %vm1933_vm0, %v1932_v1 }
 0x5cf   : > { %v1182_v6 = vpop.f32.mrf.mxu0 }
 0x5d0   : > { %v1186_v7 = vmul.f32 0.0009765625, %v1182_v6 }
 0x5d1   : > { %v1815_v8 = vpop.f32.mrf.mxu0 }
 0x5d2   : > { %1819 = vmatmul.mubr.msk.f32.vlgmr.msra.gmra.mxu1 %vm577_vm5, %v1186_v7 }
 0x5d3   : > { %1822 = vmatpush3.msra.mxu1 %v2041_v17  ;;  %1853 = vmatprep.mubr.msk.f32.mxu1 %vm1933_vm0, %v1932_v1 }
 0x5d4   : > { %1823 = vmatprep.subr.mxu1 %v1932_v1 }
 0x5d5   : > { %1824 = vmatpush3.msra.mxu1 %v2049_v18 }
 0x5d6   : > { %1825 = vmatprep.subr.mxu1 %v1932_v1 }
 0x5d7   : > { %1826 = vmatpush3.msra.mxu1 %v2058_v19 }
 0x5d8   : > { %1827 = vmatprep.subr.mxu1 %v1932_v1 }
 0x5d9   : > { %1828 = vmatpush3.msra.mxu1 %v2067_v20 }
 0x5da   : > { %1829 = vmatprep.subr.mxu1 %v1932_v1 }
 0x5db   : > { %1830 = vmatpush3.msra.mxu1 %v2076_v21 }
 0x5dc   : > { %1831 = vmatprep.subr.mxu1 %v1932_v1 }
 0x5dd   : > { %1832 = vmatpush3.msra.mxu1 %v2085_v22 }
 0x5de   : > { %1833 = vmatprep.subr.mxu1 %v1932_v1 }
 0x5df   : > { %1834 = vmatpush3.msra.mxu1 %v2094_v23 }
 0x5e0   : > { %1835 = vmatprep.subr.mxu1 %v1932_v1 }
 0x5e1   : > { %1836 = vmatpush3.msra.mxu1 %v2103_v24 }
 0x5e2   : > { %1837 = vmatprep.subr.mxu1 %v1932_v1 }
 0x5e3   : > { %1838 = vmatpush3.msra.mxu1 %v2112_v25 }
 0x5e4   : > { %1839 = vmatprep.subr.mxu1 %v1932_v1 }
 0x5e5   : > { %1840 = vmatpush3.msra.mxu1 %v2121_v26 }
 0x5e6   : > { %1841 = vmatprep.subr.mxu1 %v1932_v1 }
 0x5e7   : > { %1842 = vmatpush3.msra.mxu1 %v2130_v27 }
 0x5e8   : > { %1843 = vmatprep.subr.mxu1 %v1932_v1 }
 0x5e9   : > { %1844 = vmatpush3.msra.mxu1 %v2139_v28 }
 0x5ea   : > { %1845 = vmatprep.subr.mxu1 %v1932_v1 }
 0x5eb   : > { %1846 = vmatpush3.msra.mxu1 %v2148_v29 }
 0x5ec   : > { %1847 = vmatprep.subr.mxu1 %v1932_v1 }
 0x5ed   : > { %1848 = vmatpush3.msra.mxu1 %v2153_v30 }
 0x5ee   : > { %1849 = vmatprep.subr.mxu1 %v1932_v1 }
 0x5ef   : > { %1850 = vmatpush3.msra.mxu1 %v2162_v31 }
 0x5f0   : > { %1851 = vmatprep.subr.mxu1 %v1932_v1 }
 0x5f1   : > { %1852 = vmatpush3.msra.mxu1 %v2171_v32 }
 0x692   : > { %v1256_v17 = vpop.f32.mrf.mxu1 }
 0x693   : > { %v1263_v18 = vrot.slane %v1256_v17, %v2204_v9 }
 0x694   : > { %v1820_v19 = vpop.f32.mrf.mxu1 }
 0x695   : > { %v1264_v20 = vsub.f32 %v1107_v58, %v1263_v18  ;;  %v1265_v21 = vsub.f32 %v1108_v59, %v1263_v18 }
 0x697   : > { %v1266_v22 = vmul.f32 %v1264_v20, %v1264_v20  ;;  %v1267_v23 = vmul.f32 %v1265_v21, %v1265_v21 }
 0x699   : > { %v1268_v24 = vadd.f32 %v1267_v23, %v1266_v22 }
 0x69b   : > { %v1269_v25 = vrot.slane %v1268_v24, 4 }
 0x69d   : > { %v1270_v26 = vadd.f32 %v1269_v25, %v1268_v24 }
 0x69f   : > { %v1271_v27 = vrot.slane %v1270_v26, 2 }
 0x6a1   : > { %v1272_v28 = vadd.f32 %v1271_v27, %v1270_v26 }
 0x6a3   : > { %v1273_v29 = vrot.slane %v1272_v28, 1 }
 0x6a5   : > { %v1274_v30 = vadd.f32 %v1273_v29, %v1272_v28 }
 0x6a7   : > { %1854 = vmatmul.mubr.f32.vlgmr.msra.gmra.mxu1 %v1274_v30 }
 0x767   : > { %v1341_v1 = vpop.f32.mrf.mxu1 }
 0x768   : > { %v1345_v31 = vmul.f32 0.0009765625, %v1341_v1 }
 0x769   : > { %v1855_v32 = vpop.f32.mrf.mxu1 }
 0x76a   : > { %1859 = vmatmul.mubr.msk.f32.vlgmr.msra.gmra.mxu0 %vm577_vm5, %v1345_v31 }
 0x82a   : > { %v1415_v2 = vpop.f32.mrf.mxu0 }
 0x82b   : > { %v1416_v10 = vadd.f32 1e-05, %v1415_v2 }
 0x82c   : > { %v1860_v11 = vpop.f32.mrf.mxu0 }
 0x82d   : > { %1922 = vrsqrt.f32 %v1416_v10 }
 0x83a   : > { %v1923_v12 = vpop.eup %1922 }
 0x83b   : > { %v1423_v15 = vrot.slane %v1923_v12, %v2204_v9 }
 0x83d   : > { %v1424_v33 = vmul.f32 %v1423_v15, %v1264_v20  ;;  %v1425_v34 = vmul.f32 %v1423_v15, %v1265_v21 }
 0x83f   : > { %v1431_v36 = vmul.f32 %v1564_v16, %v1424_v33  ;;  %v1432_v37 = vmul.f32 %v1564_v16, %v1425_v34 }
 0x841   : > { %v1438_v13 = vadd.f32 %v1565_v35, %v1431_v36  ;;  %v1439_v14 = vadd.f32 %v1565_v35, %v1432_v37 }
 0x843   : > { %v1577_v9 = vpack.c.bf16 %v1439_v14, %v1438_v13 }
 0x845   : > { %1578 = vst [vmem:[%s278_s23] sm:$0xff] %v1577_v9  }
 0x846 PF: > { %s17_s24 = sadd.s32 1, %s1930_s24  }
 0x847   : > { %p14_p4 = scmp.ge.s32.totalorder %s17_s24, 4  }
 0x849   :  { %16 = sbr.rel (!%p14_p4) target bundleno = 1 (0x1), region = 78 }

// kernel: unet_forward.5
= control target key start
LH: loop header
LB: loop body
LE: loop exit
PB: predicated region body
PF: predicated region fallthrough
CT: control target
= control target key end

     0   :  { %s2589_s13 = smov 0   ;;  %s3167_s0 = inlined_call_operand.vmem [shape: bf16[2,16,128], index: 0, kind: input, shape index: {}]   ;;  %s3168_s1 = inlined_call_operand.vmem [shape: bf16[2,16,128], index: 1, kind: input, shape index: {}]   ;;  %s3169_s2 = inlined_call_operand.vmem [shape: bf16[256,384], index: 2, kind: input, shape index: {}]   ;;  %s3170_s3 = inlined_call_operand.vmem [shape: f32[3,128], index: 3, kind: input, shape index: {}]   ;;  %s3171_s4 = inlined_call_operand.vmem [shape: bf16[128,384], index: 4, kind: input, shape index: {}]   ;;  %s3172_s5 = inlined_call_operand.vmem [shape: f32[3,128], index: 5, kind: input, shape index: {}]   ;;  %s3173_s6 = inlined_call_operand.vmem [shape: f32[128,2], index: 6, kind: input, shape index: {}]   ;;  %s3174_s7 = inlined_call_operand.vmem [shape: f32[2,128], index: 7, kind: input, shape index: {}]   ;;  %s3175_s8 = inlined_call_operand.vmem [shape: bf16[128,48], index: 8, kind: input, shape index: {}]   ;;  %s3176_s9 = inlined_call_operand.vmem [shape: f32[1,48], index: 9, kind: input, shape index: {}]   ;;  %s3177_s10 = inlined_call_operand.vmem [shape: f32[2,16,48], index: 10, kind: output, shape index: {}]  }
   0x1 LB: > { %s1973_s14 = sadd.s32 4294967295, %s2529_s13   ;;  %p1977_p0 = scmp.ge.s32.totalorder %s2529_s13, 1  ;;  %s2529_s13 = sphi %s2589_s13, %s20_s13  }
   0x2   : > { %p322_p1 = scmp.lt.s32.totalorder %s2529_s13, 3 }
   0x4   : > { %p323_p2 = pnand %p1977_p0, %p322_p1 }
   0x5   : > { %p365_p3 = scmp.lt.s32.totalorder (!%p323_p2), %s1973_s14, 1 }
   0x6   : > { %326 = sbr.rel (%p323_p2) target bundleno = 2364 (0x93c), region = 60 }
   0xb   : > { %v2413_v0 = vld [vmem:[%s3169_s2 + $0xac] ss:$12 sps:$4 sm:$0xff]   ;;  %v2415_v1 = vld [vmem:[%s3169_s2 + $0xa8] ss:$12 sps:$4 sm:$0xff]   ;;  %v2418_v3 = vld [vmem:[%s3169_s2 + $0x90] ss:$12 sps:$4 sm:$0xff]  }
   0xc   : > { %717 = vmatprep.subr.bf16.mxu0 %v2413_v0  ;;  %v2416_v2 = vld [vmem:[%s3169_s2 + $0x94] ss:$12 sps:$4 sm:$0xff]   ;;  %v2419_v4 = vld [vmem:[%s3169_s2 + $0x7c] ss:$12 sps:$4 sm:$0xff]   ;;  %v2421_v5 = vld [vmem:[%s3169_s2 + $0x78] ss:$12 sps:$4 sm:$0xff]  }
   0xd   : > { %718 = vmatpush1.bf16.msra.mxu0 %v2415_v1  ;;  %v2422_v6 = vld [vmem:[%s3169_s2 + $0x64] ss:$12 sps:$4 sm:$0xff]   ;;  %v2424_v8 = vld [vmem:[%s3169_s2 + $0x60] ss:$12 sps:$4 sm:$0xff]   ;;  %v2427_v13 = vld [vmem:[%s3169_s2 + $0x48] ss:$12 sps:$4 sm:$0xff]  }
   0xe   : > { %719 = vmatprep.subr.bf16.mxu0 %v2416_v2  ;;  %v2433_v7 = vld [vmem:[%s3169_s2 + $0x170] ss:$12 sps:$4 sm:$0xff]   ;;  %v2425_v10 = vld [vmem:[%s3169_s2 + $0x4c] ss:$12 sps:$4 sm:$0xff]   ;;  %v2428_v14 = vld [vmem:[%s3169_s2 + $0x34] ss:$12 sps:$4 sm:$0xff]  }
   0xf   : > { %2086 = vmatprep.subr.bf16.mxu1 %v2433_v7  ;;  %v2435_v9 = vld [vmem:[%s3169_s2 + $0xb0] ss:$12 sps:$4 sm:$0xff]   ;;  %v2438_v11 = vld [vmem:[%s3169_s2 + $0x158] ss:$12 sps:$4 sm:$0xff]   ;;  %v2443_v15 = vld [vmem:[%s3169_s2 + $0x140] ss:$12 sps:$4 sm:$0xff]  }
  0x10   : > { %2087 = vmatpush3.bf16.msra.mxu1 %v2435_v9  ;;  %v2440_v12 = vld [vmem:[%s3169_s2 + $0x98] ss:$12 sps:$4 sm:$0xff]   ;;  %v2445_v16 = vld [vmem:[%s3169_s2 + $0x80] ss:$12 sps:$4 sm:$0xff]   ;;  %v2430_v17 = vld [vmem:[%s3169_s2 + $0x30] ss:$12 sps:$4 sm:$0xff]  }
  0x11   : > { %720 = vmatpush1.bf16.msra.mxu0 %v2418_v3  ;;  %2088 = vmatprep.subr.bf16.mxu1 %v2438_v11  ;;  %v2448_v18 = vld [vmem:[%s3169_s2 + $0x128] ss:$12 sps:$4 sm:$0xff]   ;;  %v2434_v21 = vld [vmem:[%s3169_s2 + $0x18] ss:$12 sps:$4 sm:$0xff]   ;;  %v2453_v22 = vld [vmem:[%s3169_s2 + $0x110] ss:$12 sps:$4 sm:$0xff]  }
  0x12   : > { %721 = vmatprep.subr.bf16.mxu0 %v2419_v4  ;;  %v2431_v19 = vld [vmem:[%s3169_s2 + $0x1c] ss:$12 sps:$4 sm:$0xff]   ;;  %v2436_v23 = vld [vmem:[%s3169_s2 + $0x4] ss:$12 sps:$4 sm:$0xff]   ;;  %s3179_s14 = smov (!%p365_p3, %s1973_s14), 1  ;;  %v2531_v51 = vmov 0.0  }
  0x13   : > { %v2450_v20 = vld [vmem:[%s3169_s2 + $0x68] ss:$12 sps:$4 sm:$0xff]   ;;  %v2455_v24 = vld [vmem:[%s3169_s2 + $0x50] ss:$12 sps:$4 sm:$0xff]   ;;  %v2458_v25 = vld [vmem:[%s3169_s2 + $0xf8] ss:$12 sps:$4 sm:$0xff]  }
  0x14   : > { %2089 = vmatpush3.bf16.msra.mxu1 %v2440_v12  ;;  %v2439_v26 = vld [vmem:[%s3169_s2] ss:$12 sps:$4 sm:$0xff]   ;;  %s2083_s17 = sshll.u32 %s3179_s14, 3  ;;  %v2460_v28 = vld [vmem:[%s3169_s2 + $0x38] ss:$12 sps:$4 sm:$0xff]   ;;  %v2768_v52 = vld [vmem:[%s3173_s6 + $0x70] sm:$0xff] }
  0x15   : > { %722 = vmatpush1.bf16.msra.mxu0 %v2421_v5  ;;  %2090 = vmatprep.subr.bf16.mxu1 %v2443_v15  ;;  %v2441_v27 = vld [vmem:[%s3169_s2 + $0x16c] ss:$12 sps:$4 sm:$0xff]   ;;  %v2444_v30 = vld [vmem:[%s3169_s2 + $0x168] ss:$12 sps:$4 sm:$0xff]   ;;  %s374_s28 = scalar_lea.vmem %s3168_s1, %s2083_s17  ;;  %v2449_v32 = vld [vmem:[%s3169_s2 + $0x150] ss:$12 sps:$4 sm:$0xff]   ;;  %s369_s20 = scalar_lea.vmem %s3167_s0, %s2083_s17 }
  0x16   : > { %723 = vmatprep.subr.bf16.mxu0 %v2422_v6  ;;  %v2463_v29 = vld [vmem:[%s3169_s2 + $0xe0] ss:$12 sps:$4 sm:$0xff]   ;;  %v2468_v34 = vld [vmem:[%s3169_s2 + $0xc8] ss:$12 sps:$4 sm:$0xff]   ;;  %v2454_v37 = vld [vmem:[%s3169_s2 + $0x138] ss:$12 sps:$4 sm:$0xff]  }
  0x17   : > { %v2446_v31 = vld [vmem:[%s3169_s2 + $0x154] ss:$12 sps:$4 sm:$0xff]   ;;  %v2451_v36 = vld [vmem:[%s3169_s2 + $0x13c] ss:$12 sps:$4 sm:$0xff]   ;;  %v2456_v39 = vld [vmem:[%s3169_s2 + $0x124] ss:$12 sps:$4 sm:$0xff]  }
  0x18   : > { %2091 = vmatpush3.bf16.msra.mxu1 %v2445_v16  ;;  %v2465_v33 = vld [vmem:[%s3169_s2 + $0x20] ss:$12 sps:$4 sm:$0xff]   ;;  %v2470_v38 = vld [vmem:[%s3169_s2 + $0x8] ss:$12 sps:$4 sm:$0xff]   ;;  %v2469_v45 = vld [vmem:[%s3169_s2 + $0xf0] ss:$12 sps:$4 sm:$0xff]  }
  0x19   : > { %724 = vmatpush1.bf16.msra.mxu0 %v2424_v8  ;;  %2092 = vmatprep.subr.bf16.mxu1 %v2448_v18  ;;  %v2471_v35 = vld [vmem:[%s374_s28] sm:$0xff]   ;;  %v2461_v42 = vld [vmem:[%s3169_s2 + $0x10c] ss:$12 sps:$4 sm:$0xff]   ;;  %v2464_v43 = vld [vmem:[%s3169_s2 + $0x108] ss:$12 sps:$4 sm:$0xff]   ;;  %vm2532_vm0 = vmmov 0  }
  0x1a   : > { %725 = vmatprep.subr.bf16.mxu0 %v2425_v10  ;;  %792 = vmatprep.mubr.bf16.mxu1 %v2471_v35  ;;  %v2474_v40 = vld [vmem:[%s369_s20] sm:$0xff]   ;;  %v2472_v46 = vld [vmem:[%s3169_s2 + $0xdc] ss:$12 sps:$4 sm:$0xff]   ;;  %v2803_v56 = vld [vmem:[%s3173_s6 + $0x50] sm:$0xff]  ;;  %vm803_vm1 = vcmask 1040384   ;;  %vm814_vm2 = vcmask 1046528  }
  0x1b   : > { %749 = vmatprep.mubr.bf16.mxu0 %v2471_v35  ;;  %v2459_v41 = vld [vmem:[%s3169_s2 + $0x120] ss:$12 sps:$4 sm:$0xff]   ;;  %v2475_v47 = vld [vmem:[%s3169_s2 + $0xd8] ss:$12 sps:$4 sm:$0xff]   ;;  %v2839_v60 = vld [vmem:[%s3173_s6 + $0x30] sm:$0xff]  ;;  %vm931_vm3 = vcmask 1041408  }
  0x1c   : > { %2093 = vmatpush3.bf16.msra.mxu1 %v2450_v20  ;;  %v2466_v44 = vld [vmem:[%s3169_s2 + $0xf4] ss:$12 sps:$4 sm:$0xff]   ;;  %v2476_v48 = vld [vmem:[%s3169_s2 + $0xc4] ss:$12 sps:$4 sm:$0xff]   ;;  %v2757_v50 = vld [vmem:[%s3173_s6 + $0x78] sm:$0xff]  ;;  %vm927_vm4 = vcmask 15360  }
  0x1d   : > { %726 = vmatpush1.bf16.msra.mxu0 %v2427_v13  ;;  %2094 = vmatprep.subr.bf16.mxu1 %v2453_v22  ;;  %v2478_v49 = vld [vmem:[%s3169_s2 + $0xc0] ss:$12 sps:$4 sm:$0xff]   ;;  %v2794_v55 = vld [vmem:[%s3173_s6 + $0x58] sm:$0xff]  ;;  %v2871_v0 = vld [vmem:[%s3173_s6 + $0x10] sm:$0xff]  ;;  %s2085_s30 = sshll.u32 %s3179_s14, 4  ;;  %vm1903_vm5 = vcmask 392192  }
  0x1e   : > { %727 = vmatprep.subr.bf16.mxu0 %v2428_v14  ;;  %v2776_v53 = vld [vmem:[%s3173_s6 + $0x68] sm:$0xff]  ;;  %v2785_v54 = vld [vmem:[%s3173_s6 + $0x60] sm:$0xff]  ;;  %v2830_v59 = vld [vmem:[%s3173_s6 + $0x38] sm:$0xff]  ;;  %s379_s18 = scalar_lea.vmem %s3177_s10, %s2085_s30 }
  0x1f   : > { %v2812_v57 = vld [vmem:[%s3173_s6 + $0x48] sm:$0xff]  ;;  %v2821_v58 = vld [vmem:[%s3173_s6 + $0x40] sm:$0xff]  ;;  %v2866_v63 = vld [vmem:[%s3173_s6 + $0x18] sm:$0xff] }
  0x20   : > { %2095 = vmatpush3.bf16.msra.mxu1 %v2455_v24  ;;  %v2848_v61 = vld [vmem:[%s3173_s6 + $0x28] sm:$0xff]  ;;  %v2857_v62 = vld [vmem:[%s3173_s6 + $0x20] sm:$0xff] }
  0x21   : > { %728 = vmatpush1.bf16.msra.mxu0 %v2430_v17  ;;  %2096 = vmatprep.subr.bf16.mxu1 %v2458_v25  ;;  %v2881_v1 = vld [vmem:[%s3173_s6 + $0x8] sm:$0xff]  ;;  %v2890_v2 = vld [vmem:[%s3173_s6] sm:$0xff] }
  0x22   : > { %729 = vmatprep.subr.bf16.mxu0 %v2431_v19 }
  0x24   : > { %2097 = vmatpush3.bf16.msra.mxu1 %v2460_v28 }
  0x25   : > { %730 = vmatpush1.bf16.msra.mxu0 %v2434_v21  ;;  %2098 = vmatprep.subr.bf16.mxu1 %v2463_v29  ;;  %v2034_v21 = vld [vmem:[%s3170_s3] ss:$0 sm:$0xff] }
  0x26   : > { %731 = vmatprep.subr.bf16.mxu0 %v2436_v23 }
  0x28   : > { %2099 = vmatpush3.bf16.msra.mxu1 %v2465_v33 }
  0x29   : > { %732 = vmatpush1.bf16.msra.mxu0 %v2439_v26  ;;  %2100 = vmatprep.subr.bf16.mxu1 %v2468_v34 }
  0x2a   : > { %733 = vmatprep.subr.bf16.mxu0 %v2441_v27 }
  0x2c   : > { %2101 = vmatpush3.bf16.msra.mxu1 %v2470_v38 }
  0x2d   : > { %734 = vmatpush2.bf16.msra.mxu0 %v2444_v30  ;;  %2202 = vmatprep.subr.mxu1 %v2531_v51 }
  0x2e   : > { %735 = vmatprep.subr.bf16.mxu0 %v2446_v31 }
  0x2f   : > { %793 = vmatmul.mubr.bf16.vlgmr.msra.gmra.mxu1 %v2474_v40 }
  0x30   : > { %2203 = vmatpush3.msra.mxu1 %v2757_v50  ;;  %2234 = vmatprep.mubr.msk.f32.mxu1 %vm2532_vm0, %v2531_v51 }
  0x31   : > { %736 = vmatpush2.bf16.msra.mxu0 %v2449_v32  ;;  %2204 = vmatprep.subr.mxu1 %v2531_v51 }
  0x32   : > { %737 = vmatprep.subr.bf16.mxu0 %v2451_v36  ;;  %2205 = vmatpush3.msra.mxu1 %v2768_v52 }
  0x33   : > { %2206 = vmatprep.subr.mxu1 %v2531_v51 }
  0x34   : > { %2207 = vmatpush3.msra.mxu1 %v2776_v53 }
  0x35   : > { %738 = vmatpush2.bf16.msra.mxu0 %v2454_v37  ;;  %2208 = vmatprep.subr.mxu1 %v2531_v51  ;;  %v2914_v37 = vld [vmem:[%s3174_s7] sm:$0x3] }
  0x36   : > { %739 = vmatprep.subr.bf16.mxu0 %v2456_v39  ;;  %2209 = vmatpush3.msra.mxu1 %v2785_v54 }
  0x37   : > { %2210 = vmatprep.subr.mxu1 %v2531_v51 }
  0x38   : > { %2211 = vmatpush3.msra.mxu1 %v2794_v55 }
  0x39   : > { %740 = vmatpush2.bf16.msra.mxu0 %v2459_v41  ;;  %2212 = vmatprep.subr.mxu1 %v2531_v51  ;;  %v1005_v41 = vlaneseq }
  0x3a   : > { %741 = vmatprep.subr.bf16.mxu0 %v2461_v42  ;;  %2213 = vmatpush3.msra.mxu1 %v2803_v56 }
  0x3b   : > { %2214 = vmatprep.subr.mxu1 %v2531_v51  ;;  %v1006_v42 = vshrl.u32 %v1005_v41, 7 }
  0x3c   : > { %2215 = vmatpush3.msra.mxu1 %v2812_v57 }
  0x3d   : > { %742 = vmatpush2.bf16.msra.mxu0 %v2464_v43  ;;  %2216 = vmatprep.subr.mxu1 %v2531_v51  ;;  %v2921_v43 = vsub.s32 0, %v1006_v42 }
  0x3e   : > { %743 = vmatprep.subr.bf16.mxu0 %v2466_v44  ;;  %2217 = vmatpush3.msra.mxu1 %v2821_v58 }
  0x3f   : > { %2218 = vmatprep.subr.mxu1 %v2531_v51 }
  0x40   : > { %2219 = vmatpush3.msra.mxu1 %v2830_v59 }
  0x41   : > { %744 = vmatpush2.bf16.msra.mxu0 %v2469_v45  ;;  %2220 = vmatprep.subr.mxu1 %v2531_v51 }
  0x42   : > { %745 = vmatprep.subr.bf16.mxu0 %v2472_v46  ;;  %2221 = vmatpush3.msra.mxu1 %v2839_v60 }
  0x43   : > { %2222 = vmatprep.subr.mxu1 %v2531_v51 }
  0x44   : > { %2223 = vmatpush3.msra.mxu1 %v2848_v61 }
  0x45   : > { %746 = vmatpush2.bf16.msra.mxu0 %v2475_v47  ;;  %2224 = vmatprep.subr.mxu1 %v2531_v51 }
  0x46   : > { %747 = vmatprep.subr.bf16.mxu0 %v2476_v48  ;;  %2225 = vmatpush3.msra.mxu1 %v2857_v62 }
  0x47   : > { %2226 = vmatprep.subr.mxu1 %v2531_v51 }
  0x48   : > { %2227 = vmatpush3.msra.mxu1 %v2866_v63 }
  0x49   : > { %748 = vmatpush2.bf16.msra.mxu0 %v2478_v49  ;;  %2228 = vmatprep.subr.mxu1 %v2531_v51 }
  0x4a   : > { %2242 = vmatprep.subr.mxu0 %v2531_v51  ;;  %2229 = vmatpush3.msra.mxu1 %v2871_v0 }
  0x4b   : > { %2230 = vmatprep.subr.mxu1 %v2531_v51 }
  0x4c   : > { %750 = vmatmul.mubr.bf16.vlgmr.msra.gmra.mxu0 %v2474_v40  ;;  %2231 = vmatpush3.msra.mxu1 %v2881_v1 }
  0x4d   : > { %2243 = vmatpush3.msra.mxu0 %v2757_v50  ;;  %2232 = vmatprep.subr.mxu1 %v2531_v51 }
  0x4e   : > { %2244 = vmatprep.subr.mxu0 %v2531_v51  ;;  %2233 = vmatpush3.msra.mxu1 %v2890_v2 }
  0x4f   : > { %2245 = vmatpush3.msra.mxu0 %v2768_v52  ;;  %2237 = vmatprep.subr.mxu1 %v2531_v51 }
  0x50   : > { %2246 = vmatprep.subr.mxu0 %v2531_v51  ;;  %2274 = vmatprep.mubr.msk.f32.mxu0 %vm2532_vm0, %v2531_v51 }
  0x51   : > { %2247 = vmatpush3.msra.mxu0 %v2776_v53 }
  0x52   : > { %2248 = vmatprep.subr.mxu0 %v2531_v51 }
  0x53   : > { %2249 = vmatpush3.msra.mxu0 %v2785_v54 }
  0x54   : > { %2250 = vmatprep.subr.mxu0 %v2531_v51 }
  0x55   : > { %2251 = vmatpush3.msra.mxu0 %v2794_v55 }
  0x56   : > { %2252 = vmatprep.subr.mxu0 %v2531_v51 }
  0x57   : > { %2253 = vmatpush3.msra.mxu0 %v2803_v56 }
  0x58   : > { %2254 = vmatprep.subr.mxu0 %v2531_v51 }
  0x59   : > { %2255 = vmatpush3.msra.mxu0 %v2812_v57 }
  0x5a   : > { %2256 = vmatprep.subr.mxu0 %v2531_v51 }
  0x5b   : > { %2257 = vmatpush3.msra.mxu0 %v2821_v58 }
  0x5c   : > { %2258 = vmatprep.subr.mxu0 %v2531_v51 }
  0x5d   : > { %2259 = vmatpush3.msra.mxu0 %v2830_v59 }
  0x5e   : > { %2260 = vmatprep.subr.mxu0 %v2531_v51 }
  0x5f   : > { %2261 = vmatpush3.msra.mxu0 %v2839_v60 }
  0x60   : > { %2262 = vmatprep.subr.mxu0 %v2531_v51 }
  0x61   : > { %2263 = vmatpush3.msra.mxu0 %v2848_v61 }
  0x62   : > { %2264 = vmatprep.subr.mxu0 %v2531_v51 }
  0x63   : > { %2265 = vmatpush3.msra.mxu0 %v2857_v62 }
  0x64   : > { %2266 = vmatprep.subr.mxu0 %v2531_v51 }
  0x65   : > { %2267 = vmatpush3.msra.mxu0 %v2866_v63 }
  0x66   : > { %2268 = vmatprep.subr.mxu0 %v2531_v51 }
  0x67   : > { %2269 = vmatpush3.msra.mxu0 %v2871_v0 }
  0x68   : > { %2270 = vmatprep.subr.mxu0 %v2531_v51 }
  0x69   : > { %2271 = vmatpush3.msra.mxu0 %v2881_v1 }
  0x6a   : > { %2272 = vmatprep.subr.mxu0 %v2531_v51 }
  0x6b   : > { %2273 = vmatpush3.msra.mxu0 %v2890_v2 }
  0x6c   : > { %2277 = vmatprep.subr.mxu0 %v2531_v51 }
  0xef   : > { %v2102_v3 = vpop.f32.mrf.mxu1 }
  0xf1   : > { %v2103_v4 = vpop.f32.mrf.mxu1 }
  0xf2   : > { %v2104_v7 = vadd.f32 %v2103_v4, %v2102_v3 }
  0xf3   : > { %v2105_v5 = vpop.f32.mrf.mxu1 }
  0xf4   : > { %v815_v10 = vrot.slane %v2104_v7, 1 }
  0xf5   : > { %v2106_v6 = vpop.f32.mrf.mxu1 }
  0xf6   : > { %v2107_v8 = vadd.f32 %v2106_v6, %v2105_v5 }
  0xf8   : > { %v816_v11 = vrot.slane %v2107_v8, 1 }
  0xfa   : > { %v817_v17 = vsel %vm814_vm2, %v815_v10, %v816_v11  ;;  %v820_v24 = vsel %vm814_vm2, %v816_v11, 0.0  ;;  %v2479_v11 = vld [vmem:[%s3171_s4 + $0xa8] ss:$12 sps:$4 sm:$0xff]  }
 0x10c   : > { %v751_v9 = vpop.f32.mrf.mxu0 }
 0x10d   : > { %v804_v12 = vrot.slane %v751_v9, 7 }
 0x10e   : > { %v753_v13 = vpop.f32.mrf.mxu0 }
 0x10f   : > { %v809_v14 = vsel %vm803_vm1, 0.0, %v804_v12 }
 0x110   : > { %v810_v15 = vadd.f32 %v809_v14, %v753_v13  ;;  %v755_v16 = vpop.f32.mrf.mxu0  ;;  %v2485_v13 = vld [vmem:[%s3171_s4 + $0x94] ss:$12 sps:$4 sm:$0xff]   ;;  %v2483_v14 = vld [vmem:[%s3171_s4 + $0x90] ss:$12 sps:$4 sm:$0xff]  }
 0x111   : > { %v805_v18 = vrot.slane %v755_v16, 7  ;;  %v2482_v16 = vld [vmem:[%s3171_s4 + $0xb0] ss:$12 sps:$4 sm:$0xff]  }
 0x112   : > { %v821_v19 = vadd.f32 %v817_v17, %v810_v15  ;;  %v757_v20 = vpop.f32.mrf.mxu0 }
 0x113   : > { %v806_v22 = vsel %vm803_vm1, %v804_v12, %v805_v18  ;;  %v2481_v12 = vld [vmem:[%s3171_s4 + $0xac] ss:$12 sps:$4 sm:$0xff]  }
 0x114   : > { %v811_v23 = vadd.f32 %v806_v22, %v757_v20  ;;  %v828_v25 = vadd.f32 %v2034_v21, %v821_v19  ;;  %v2486_v19 = vld [vmem:[%s3171_s4 + $0x98] ss:$12 sps:$4 sm:$0xff]   ;;  %v2489_v20 = vld [vmem:[%s3171_s4 + $0x7c] ss:$12 sps:$4 sm:$0xff]   ;;  %v2490_v22 = vld [vmem:[%s3171_s4 + $0x80] ss:$12 sps:$4 sm:$0xff]  }
 0x116   : > { %v822_v26 = vadd.f32 %v820_v24, %v811_v23  ;;  %v830_v28 = vmax.f32 %v828_v25, 0.0  ;;  %v2493_v23 = vld [vmem:[%s3171_s4 + $0x64] ss:$12 sps:$4 sm:$0xff]   ;;  %v2491_v24 = vld [vmem:[%s3171_s4 + $0x60] ss:$12 sps:$4 sm:$0xff]  }
 0x117   : > { %v2494_v25 = vld [vmem:[%s3171_s4 + $0x68] ss:$12 sps:$4 sm:$0xff]  }
 0x118   : > { %v829_v27 = vadd.f32 %v2034_v21, %v822_v26  ;;  %v2487_v21 = vld [vmem:[%s3171_s4 + $0x78] ss:$12 sps:$4 sm:$0xff]  }
 0x119   : > { %v2497_v26 = vld [vmem:[%s3171_s4 + $0x4c] ss:$12 sps:$4 sm:$0xff]  }
 0x11a   : > { %v831_v29 = vmax.f32 %v829_v27, 0.0  ;;  %v2495_v27 = vld [vmem:[%s3171_s4 + $0x48] ss:$12 sps:$4 sm:$0xff]  }
 0x11c   : > { %v832_v30 = vadd.f32 %v831_v29, %v830_v28 }
 0x11e   : > { %v833_v31 = vrot.slane %v832_v30, 4 }
 0x120   : > { %v834_v32 = vadd.f32 %v833_v31, %v832_v30  ;;  %v2499_v30 = vld [vmem:[%s3171_s4 + $0x30] ss:$12 sps:$4 sm:$0xff]   ;;  %v2502_v31 = vld [vmem:[%s3171_s4 + $0x38] ss:$12 sps:$4 sm:$0xff]  }
 0x122   : > { %v835_v33 = vrot.slane %v834_v32, 2 }
 0x124   : > { %v836_v34 = vadd.f32 %v835_v33, %v834_v32  ;;  %v2503_v32 = vld [vmem:[%s3171_s4 + $0x18] ss:$12 sps:$4 sm:$0xff]   ;;  %v2505_v33 = vld [vmem:[%s3171_s4 + $0x1c] ss:$12 sps:$4 sm:$0xff]  }
 0x126   : > { %v837_v35 = vrot.slane %v836_v34, 1 }
 0x128   : > { %v838_v36 = vadd.f32 %v837_v35, %v836_v34  ;;  %v2506_v34 = vld [vmem:[%s3171_s4 + $0x20] ss:$12 sps:$4 sm:$0xff]   ;;  %v2509_v35 = vld [vmem:[%s3171_s4 + $0x4] ss:$12 sps:$4 sm:$0xff]  }
 0x12a   : > { %2235 = vmatmul.mubr.f32.vlgmr.msra.gmra.mxu1 %v838_v36  ;;  %v2507_v36 = vld [vmem:[%s3171_s4] ss:$12 sps:$4 sm:$0xff]  }
 0x12b   : > { %2238 = vmatpush3.msk.msra.mxu1 %vm931_vm3, %v2914_v37  ;;  %2239 = vmatprep.mubr.msk.f32.mxu1 %vm2532_vm0, %v2531_v51 }
 0x12c   : > { %1346 = vmatprep.subr.bf16.mxu1 %v2481_v12 }
 0x1ea   : > { %v921_v38 = vpop.f32.mrf.mxu1 }
 0x1eb   : > { %v925_v39 = vmul.f32 0.0009765625, %v921_v38  ;;  %v2510_v38 = vld [vmem:[%s3171_s4 + $0x8] ss:$12 sps:$4 sm:$0xff]  }
 0x1ec   : > { %v2236_v40 = vpop.f32.mrf.mxu1 }
 0x1ed   : > { %2240 = vmatmul.mubr.msk.f32.vlgmr.msra.gmra.mxu1 %vm927_vm4, %v925_v39  ;;  %v2533_v39 = vmov 0  }
 0x1ee   : > { %1347 = vmatpush1.bf16.msra.mxu1 %v2479_v11  ;;  %1378 = vmatprep.mubr.bf16.mxu1 %v2533_v39 }
 0x1ef   : > { %1348 = vmatprep.subr.bf16.mxu1 %v2485_v13 }
 0x1f2   : > { %1349 = vmatpush1.bf16.msra.mxu1 %v2483_v14 }
 0x1f3   : > { %1350 = vmatprep.subr.bf16.mxu1 %v2489_v20 }
 0x1f6   : > { %1351 = vmatpush1.bf16.msra.mxu1 %v2487_v21 }
 0x1f7   : > { %1352 = vmatprep.subr.bf16.mxu1 %v2493_v23 }
 0x1fa   : > { %1353 = vmatpush1.bf16.msra.mxu1 %v2491_v24  ;;  %v2065_v24 = vld [vmem:[%s3172_s5] ss:$0 sm:$0xff] }
 0x1fb   : > { %1354 = vmatprep.subr.bf16.mxu1 %v2497_v26 }
 0x1fe   : > { %1355 = vmatpush1.bf16.msra.mxu1 %v2495_v27 }
 0x2ad   : > { %v1001_v44 = vpop.f32.mrf.mxu1 }
 0x2ae   : > { %v1008_v45 = vrot.slane %v1001_v44, %v2921_v43 }
 0x2af   : > { %v2241_v46 = vpop.f32.mrf.mxu1 }
 0x2b0   : > { %v2924_v47 = vsub.f32 %v830_v28, %v1008_v45  ;;  %v2926_v48 = vsub.f32 %v831_v29, %v1008_v45  ;;  %v2498_v28 = vld [vmem:[%s3171_s4 + $0x50] ss:$12 sps:$4 sm:$0xff]   ;;  %v2501_v29 = vld [vmem:[%s3171_s4 + $0x34] ss:$12 sps:$4 sm:$0xff]  }
 0x2b1   : > { %1356 = vmatprep.subr.bf16.mxu1 %v2501_v29  ;;  %v2039_v46 = vld [vmem:[%s3170_s3 + $0x1] ss:$0 sm:$0xff] }
 0x2b2   : > { %v1011_v49 = vmul.f32 %v2924_v47, %v2924_v47  ;;  %v1012_v3 = vmul.f32 %v2926_v48, %v2926_v48  ;;  %1357 = vmatpush1.bf16.msra.mxu1 %v2499_v30 }
 0x2b3   : > { %1358 = vmatprep.subr.bf16.mxu1 %v2505_v33 }
 0x2b4   : > { %v1013_v4 = vadd.f32 %v1012_v3, %v1011_v49 }
 0x2b6   : > { %v1014_v5 = vrot.slane %v1013_v4, 4  ;;  %1359 = vmatpush1.bf16.msra.mxu1 %v2503_v32 }
 0x2b7   : > { %1360 = vmatprep.subr.bf16.mxu1 %v2509_v35 }
 0x2b8   : > { %v1015_v6 = vadd.f32 %v1014_v5, %v1013_v4  ;;  %v2040_v4 = vld [vmem:[%s3170_s3 + $0x2] ss:$0 sm:$0xff] }
 0x2ba   : > { %v1016_v7 = vrot.slane %v1015_v6, 2  ;;  %1361 = vmatpush1.bf16.msra.mxu1 %v2507_v36 }
 0x2bb   : > { %2302 = vmatprep.subr.mxu1 %v2531_v51 }
 0x2bc   : > { %v1017_v8 = vadd.f32 %v1016_v7, %v1015_v6 }
 0x2be   : > { %v1018_v9 = vrot.slane %v1017_v8, 1 }
 0x2c0   : > { %v1019_v10 = vadd.f32 %v1018_v9, %v1017_v8 }
 0x2c2   : > { %2275 = vmatmul.mubr.f32.vlgmr.msra.gmra.mxu0 %v1019_v10 }
 0x2c3   : > { %2278 = vmatpush3.msk.msra.mxu0 %vm931_vm3, %v2914_v37  ;;  %2279 = vmatprep.mubr.msk.f32.mxu0 %vm2532_vm0, %v2531_v51 }
 0x2c4   : > { %2282 = vmatprep.subr.bf16.mxu0 %v2531_v51 }
 0x382   : > { %v1086_v15 = vpop.f32.mrf.mxu0 }
 0x383   : > { %v1090_v17 = vmul.f32 0.0009765625, %v1086_v15 }
 0x384   : > { %v2276_v18 = vpop.f32.mrf.mxu0 }
 0x385   : > { %2280 = vmatmul.mubr.msk.f32.vlgmr.msra.gmra.mxu0 %vm927_vm4, %v1090_v17 }
 0x386   : > { %2283 = vmatpush3.bf16.msra.mxu0 %v2482_v16  ;;  %2298 = vmatprep.mubr.msk.bf16.mxu0 %vm2532_vm0, %v2531_v51 }
 0x387   : > { %2284 = vmatprep.subr.bf16.mxu0 %v2531_v51 }
 0x38a   : > { %2285 = vmatpush3.bf16.msra.mxu0 %v2486_v19 }
 0x38b   : > { %2286 = vmatprep.subr.bf16.mxu0 %v2531_v51 }
 0x38e   : > { %2287 = vmatpush3.bf16.msra.mxu0 %v2490_v22 }
 0x38f   : > { %2288 = vmatprep.subr.bf16.mxu0 %v2531_v51 }
 0x392   : > { %2289 = vmatpush3.bf16.msra.mxu0 %v2494_v25 }
 0x393   : > { %2290 = vmatprep.subr.bf16.mxu0 %v2531_v51 }
 0x396   : > { %2291 = vmatpush3.bf16.msra.mxu0 %v2498_v28 }
 0x397   : > { %2292 = vmatprep.subr.bf16.mxu0 %v2531_v51 }
 0x39a   : > { %2293 = vmatpush3.bf16.msra.mxu0 %v2502_v31 }
 0x39b   : > { %2294 = vmatprep.subr.bf16.mxu0 %v2531_v51 }
 0x39e   : > { %2295 = vmatpush3.bf16.msra.mxu0 %v2506_v34 }
 0x39f   : > { %2296 = vmatprep.subr.bf16.mxu0 %v2531_v51 }
 0x3a2   : > { %2297 = vmatpush3.bf16.msra.mxu0 %v2510_v38 }
 0x3a3   : > { %2337 = vmatprep.subr.mxu0 %v2531_v51 }
 0x445   : > { %v1160_v40 = vpop.f32.mrf.mxu0 }
 0x446   : > { %v1161_v41 = vadd.f32 1e-05, %v1160_v40 }
 0x447   : > { %v2281_v42 = vpop.f32.mrf.mxu0 }
 0x448   : > { %2519 = vrsqrt.f32 %v1161_v41 }
 0x455   : > { %v2520_v44 = vpop.eup %2519 }
 0x456   : > { %v1168_v45 = vrot.slane %v2520_v44, %v2921_v43 }
 0x458   : > { %v1169_v49 = vmul.f32 %v1168_v45, %v2924_v47  ;;  %v1170_v3 = vmul.f32 %v1168_v45, %v2926_v48 }
 0x45a   : > { %v1176_v5 = vmul.f32 %v2039_v46, %v1169_v49  ;;  %v1177_v6 = vmul.f32 %v2039_v46, %v1170_v3  ;;  %v2512_v46 = vld [vmem:[%s3175_s8 + $0x30] sm:$0xff]   ;;  %v2513_v49 = vld [vmem:[%s3175_s8 + $0x28] sm:$0xff]   ;;  %v2514_v3 = vld [vmem:[%s3175_s8 + $0x20] sm:$0xff]  }
 0x45c   : > { %v1183_v7 = vadd.f32 %v2040_v4, %v1176_v5  ;;  %v1184_v8 = vadd.f32 %v2040_v4, %v1177_v6  ;;  %v2515_v4 = vld [vmem:[%s3175_s8 + $0x18] sm:$0xff]   ;;  %v2516_v5 = vld [vmem:[%s3175_s8 + $0x10] sm:$0xff]   ;;  %v2517_v6 = vld [vmem:[%s3175_s8 + $0x8] sm:$0xff]  }
 0x45e   : > { %v1185_v9 = vpack.c.bf16 %v1184_v8, %v1183_v7  ;;  %v2518_v7 = vld [vmem:[%s3175_s8] sm:$0xff]  }
 0x460   : > { %1379 = vmatmul.mubr.bf16.vlgmr.msra.gmra.mxu1 %v1185_v9  ;;  %2299 = vmatmul.mubr.bf16.vlgmr.msra.gmra.mxu0 %v1185_v9 }
 0x461   : > { %2303 = vmatpush3.msra.mxu1 %v2757_v50  ;;  %2334 = vmatprep.mubr.msk.f32.mxu1 %vm2532_vm0, %v2531_v51 }
 0x462   : > { %2304 = vmatprep.subr.mxu1 %v2531_v51  ;;  %2338 = vmatpush3.msk.msra.mxu0 %vm931_vm3, %v2914_v37 }
 0x463   : > { %2305 = vmatpush3.msra.mxu1 %v2768_v52  ;;  %2339 = vmatprep.mubr.msk.f32.mxu0 %vm2532_vm0, %v2531_v51 }
 0x464   : > { %2306 = vmatprep.subr.mxu1 %v2531_v51  ;;  %2342 = vmatprep.subr.mxu0 %v2531_v51 }
 0x465   : > { %2307 = vmatpush3.msra.mxu1 %v2776_v53 }
 0x466   : > { %2308 = vmatprep.subr.mxu1 %v2531_v51 }
 0x467   : > { %2309 = vmatpush3.msra.mxu1 %v2785_v54 }
 0x468   : > { %2310 = vmatprep.subr.mxu1 %v2531_v51 }
 0x469   : > { %2311 = vmatpush3.msra.mxu1 %v2794_v55 }
 0x46a   : > { %2312 = vmatprep.subr.mxu1 %v2531_v51 }
 0x46b   : > { %2313 = vmatpush3.msra.mxu1 %v2803_v56 }
 0x46c   : > { %2314 = vmatprep.subr.mxu1 %v2531_v51 }
 0x46d   : > { %2315 = vmatpush3.msra.mxu1 %v2812_v57 }
 0x46e   : > { %2316 = vmatprep.subr.mxu1 %v2531_v51 }
 0x46f   : > { %2317 = vmatpush3.msra.mxu1 %v2821_v58 }
 0x470   : > { %2318 = vmatprep.subr.mxu1 %v2531_v51 }
 0x471   : > { %2319 = vmatpush3.msra.mxu1 %v2830_v59 }
 0x472   : > { %2320 = vmatprep.subr.mxu1 %v2531_v51 }
 0x473   : > { %2321 = vmatpush3.msra.mxu1 %v2839_v60 }
 0x474   : > { %2322 = vmatprep.subr.mxu1 %v2531_v51 }
 0x475   : > { %2323 = vmatpush3.msra.mxu1 %v2848_v61 }
 0x476   : > { %2324 = vmatprep.subr.mxu1 %v2531_v51 }
 0x477   : > { %2325 = vmatpush3.msra.mxu1 %v2857_v62 }
 0x478   : > { %2326 = vmatprep.subr.mxu1 %v2531_v51 }
 0x479   : > { %2327 = vmatpush3.msra.mxu1 %v2866_v63 }
 0x47a   : > { %2328 = vmatprep.subr.mxu1 %v2531_v51 }
 0x47b   : > { %2329 = vmatpush3.msra.mxu1 %v2871_v0 }
 0x47c   : > { %2330 = vmatprep.subr.mxu1 %v2531_v51 }
 0x47d   : > { %2331 = vmatpush3.msra.mxu1 %v2881_v1 }
 0x47e   : > { %2332 = vmatprep.subr.mxu1 %v2531_v51 }
 0x47f   : > { %2333 = vmatpush3.msra.mxu1 %v2890_v2 }
 0x480   : > { %2377 = vmatprep.subr.mxu1 %v2531_v51 }
 0x520   : > { %v1380_v47 = vpop.f32.mrf.mxu1  ;;  %v1423_v48 = vpop.f32.mrf.mxu0 }
 0x521   : > { %v1432_v10 = vrot.slane %v1380_v47, 7  ;;  %v1442_v16 = vrot.slane %v1423_v48, 1 }
 0x522   : > { %v1382_v11 = vpop.f32.mrf.mxu1  ;;  %v2300_v12 = vpop.f32.mrf.mxu0 }
 0x523   : > { %v1437_v13 = vsel %vm803_vm1, 0.0, %v1432_v10 }
 0x524   : > { %v1384_v14 = vpop.f32.mrf.mxu1  ;;  %v1426_v15 = vpop.f32.mrf.mxu0  ;;  %v1438_v19 = vadd.f32 %v1437_v13, %v1382_v11  ;;  %v2070_v11 = vld [vmem:[%s3172_s5 + $0x1] ss:$0 sm:$0xff] }
 0x525   : > { %v1433_v17 = vrot.slane %v1384_v14, 7  ;;  %v1443_v18 = vrot.slane %v1426_v15, 1  ;;  %v2071_v14 = vld [vmem:[%s3172_s5 + $0x2] ss:$0 sm:$0xff] }
 0x526   : > { %v1386_v20 = vpop.f32.mrf.mxu1  ;;  %v2301_v21 = vpop.f32.mrf.mxu0 }
 0x527   : > { %v1444_v22 = vsel %vm814_vm2, %v1442_v16, %v1443_v18  ;;  %v1434_v23 = vsel %vm803_vm1, %v1432_v10, %v1433_v17  ;;  %v1447_v27 = vsel %vm814_vm2, %v1443_v18, 0.0 }
 0x528   : > { %v1448_v25 = vadd.f32 %v1444_v22, %v1438_v19  ;;  %v1439_v26 = vadd.f32 %v1434_v23, %v1386_v20 }
 0x52a   : > { %v1449_v28 = vadd.f32 %v1447_v27, %v1439_v26  ;;  %v1455_v29 = vadd.f32 %v2065_v24, %v1448_v25 }
 0x52c   : > { %v1456_v30 = vadd.f32 %v2065_v24, %v1449_v28  ;;  %v1457_v31 = vmax.f32 %v1455_v29, 0.0 }
 0x52e   : > { %v1458_v32 = vmax.f32 %v1456_v30, 0.0 }
 0x530   : > { %v1459_v33 = vadd.f32 %v1458_v32, %v1457_v31 }
 0x532   : > { %v1460_v34 = vrot.slane %v1459_v33, 4 }
 0x534   : > { %v1461_v35 = vadd.f32 %v1460_v34, %v1459_v33 }
 0x536   : > { %v1462_v36 = vrot.slane %v1461_v35, 2 }
 0x538   : > { %v1463_v38 = vadd.f32 %v1462_v36, %v1461_v35 }
 0x53a   : > { %v1464_v39 = vrot.slane %v1463_v38, 1 }
 0x53c   : > { %v1465_v40 = vadd.f32 %v1464_v39, %v1463_v38 }
 0x53e   : > { %2335 = vmatmul.mubr.f32.vlgmr.msra.gmra.mxu1 %v1465_v40 }
 0x53f   : > { %2378 = vmatpush3.msk.msra.mxu1 %vm931_vm3, %v2914_v37  ;;  %2379 = vmatprep.mubr.msk.f32.mxu1 %vm2532_vm0, %v2531_v51 }
 0x540   : > { %2382 = vmatprep.subr.bf16.mxu1 %v2531_v51 }
 0x5fe   : > { %v1532_v41 = vpop.f32.mrf.mxu1 }
 0x5ff   : > { %v1536_v42 = vmul.f32 0.0009765625, %v1532_v41 }
 0x600   : > { %v2336_v44 = vpop.f32.mrf.mxu1 }
 0x601   : > { %2340 = vmatmul.mubr.msk.f32.vlgmr.msra.gmra.mxu0 %vm927_vm4, %v1536_v42 }
 0x602   : > { %2343 = vmatpush3.msra.mxu0 %v2757_v50  ;;  %2374 = vmatprep.mubr.msk.f32.mxu0 %vm2532_vm0, %v2531_v51 }
 0x603   : > { %2344 = vmatprep.subr.mxu0 %v2531_v51 }
 0x604   : > { %2345 = vmatpush3.msra.mxu0 %v2768_v52 }
 0x605   : > { %2346 = vmatprep.subr.mxu0 %v2531_v51 }
 0x606   : > { %2347 = vmatpush3.msra.mxu0 %v2776_v53 }
 0x607   : > { %2348 = vmatprep.subr.mxu0 %v2531_v51 }
 0x608   : > { %2349 = vmatpush3.msra.mxu0 %v2785_v54 }
 0x609   : > { %2350 = vmatprep.subr.mxu0 %v2531_v51 }
 0x60a   : > { %2351 = vmatpush3.msra.mxu0 %v2794_v55 }
 0x60b   : > { %2352 = vmatprep.subr.mxu0 %v2531_v51 }
 0x60c   : > { %2353 = vmatpush3.msra.mxu0 %v2803_v56 }
 0x60d   : > { %2354 = vmatprep.subr.mxu0 %v2531_v51 }
 0x60e   : > { %2355 = vmatpush3.msra.mxu0 %v2812_v57 }
 0x60f   : > { %2356 = vmatprep.subr.mxu0 %v2531_v51 }
 0x610   : > { %2357 = vmatpush3.msra.mxu0 %v2821_v58 }
 0x611   : > { %2358 = vmatprep.subr.mxu0 %v2531_v51 }
 0x612   : > { %2359 = vmatpush3.msra.mxu0 %v2830_v59 }
 0x613   : > { %2360 = vmatprep.subr.mxu0 %v2531_v51 }
 0x614   : > { %2361 = vmatpush3.msra.mxu0 %v2839_v60 }
 0x615   : > { %2362 = vmatprep.subr.mxu0 %v2531_v51 }
 0x616   : > { %2363 = vmatpush3.msra.mxu0 %v2848_v61 }
 0x617   : > { %2364 = vmatprep.subr.mxu0 %v2531_v51 }
 0x618   : > { %2365 = vmatpush3.msra.mxu0 %v2857_v62 }
 0x619   : > { %2366 = vmatprep.subr.mxu0 %v2531_v51 }
 0x61a   : > { %2367 = vmatpush3.msra.mxu0 %v2866_v63 }
 0x61b   : > { %2368 = vmatprep.subr.mxu0 %v2531_v51 }
 0x61c   : > { %2369 = vmatpush3.msra.mxu0 %v2871_v0 }
 0x61d   : > { %2370 = vmatprep.subr.mxu0 %v2531_v51 }
 0x61e   : > { %2371 = vmatpush3.msra.mxu0 %v2881_v1 }
 0x61f   : > { %2372 = vmatprep.subr.mxu0 %v2531_v51 }
 0x620   : > { %2373 = vmatpush3.msra.mxu0 %v2890_v2  ;;  %v2511_v2 = vld [vmem:[%s3175_s8 + $0x38] sm:$0xff]  }
 0x6c1   : > { %v1606_v50 = vpop.f32.mrf.mxu0 }
 0x6c2   : > { %v1613_v52 = vrot.slane %v1606_v50, %v2921_v43 }
 0x6c3   : > { %v2341_v53 = vpop.f32.mrf.mxu0 }
 0x6c4   : > { %v1614_v54 = vsub.f32 %v1457_v31, %v1613_v52  ;;  %v1615_v55 = vsub.f32 %v1458_v32, %v1613_v52 }
 0x6c6   : > { %v1616_v56 = vmul.f32 %v1614_v54, %v1614_v54  ;;  %v1617_v57 = vmul.f32 %v1615_v55, %v1615_v55 }
 0x6c8   : > { %v1618_v58 = vadd.f32 %v1617_v57, %v1616_v56 }
 0x6ca   : > { %v1619_v59 = vrot.slane %v1618_v58, 4 }
 0x6cc   : > { %v1620_v60 = vadd.f32 %v1619_v59, %v1618_v58 }
 0x6ce   : > { %v1621_v61 = vrot.slane %v1620_v60, 2 }
 0x6d0   : > { %v1622_v62 = vadd.f32 %v1621_v61, %v1620_v60 }
 0x6d2   : > { %v1623_v63 = vrot.slane %v1622_v62, 1 }
 0x6d4   : > { %v1624_v0 = vadd.f32 %v1623_v63, %v1622_v62 }
 0x6d6   : > { %2375 = vmatmul.mubr.f32.vlgmr.msra.gmra.mxu0 %v1624_v0 }
 0x796   : > { %v1691_v1 = vpop.f32.mrf.mxu0 }
 0x797   : > { %v1695_v37 = vmul.f32 0.0009765625, %v1691_v1 }
 0x798   : > { %v2376_v45 = vpop.f32.mrf.mxu0 }
 0x799   : > { %2380 = vmatmul.mubr.msk.f32.vlgmr.msra.gmra.mxu1 %vm927_vm4, %v1695_v37 }
 0x79a   : > { %2383 = vmatpush3.bf16.msra.mxu1 %v2511_v2  ;;  %2398 = vmatprep.mubr.msk.bf16.mxu1 %vm2532_vm0, %v2531_v51 }
 0x79b   : > { %2384 = vmatprep.subr.bf16.mxu1 %v2531_v51 }
 0x79e   : > { %2385 = vmatpush3.bf16.msra.mxu1 %v2512_v46 }
 0x79f   : > { %2386 = vmatprep.subr.bf16.mxu1 %v2531_v51 }
 0x7a2   : > { %2387 = vmatpush3.bf16.msra.mxu1 %v2513_v49 }
 0x7a3   : > { %2388 = vmatprep.subr.bf16.mxu1 %v2531_v51 }
 0x7a6   : > { %2389 = vmatpush3.bf16.msra.mxu1 %v2514_v3 }
 0x7a7   : > { %2390 = vmatprep.subr.bf16.mxu1 %v2531_v51 }
 0x7aa   : > { %2391 = vmatpush3.bf16.msra.mxu1 %v2515_v4 }
 0x7ab   : > { %2392 = vmatprep.subr.bf16.mxu1 %v2531_v51 }
 0x7ae   : > { %2393 = vmatpush3.bf16.msra.mxu1 %v2516_v5 }
 0x7af   : > { %2394 = vmatprep.subr.bf16.mxu1 %v2531_v51 }
 0x7b2   : > { %2395 = vmatpush3.bf16.msra.mxu1 %v2517_v6 }
 0x7b3   : > { %2396 = vmatprep.subr.bf16.mxu1 %v2531_v51 }
 0x7b6   : > { %2397 = vmatpush3.bf16.msra.mxu1 %v2518_v7 }
 0x859   : > { %v1765_v8 = vpop.f32.mrf.mxu1 }
 0x85a   : > { %v1766_v9 = vadd.f32 1e-05, %v1765_v8 }
 0x85b   : > { %v2381_v47 = vpop.f32.mrf.mxu1 }
 0x85c   : > { %2521 = vrsqrt.f32 %v1766_v9 }
 0x869   : > { %v2522_v48 = vpop.eup %2521 }
 0x86a   : > { %v1773_v10 = vrot.slane %v2522_v48, %v2921_v43  ;;  %v2072_v43 = vld [vmem:[%s3176_s9] ss:$0 sm:$0xff] }
 0x86c   : > { %v1774_v12 = vmul.f32 %v1773_v10, %v1614_v54  ;;  %v1775_v13 = vmul.f32 %v1773_v10, %v1615_v55 }
 0x86e   : > { %v1781_v51 = vmul.f32 %v2070_v11, %v1774_v12  ;;  %v1782_v15 = vmul.f32 %v2070_v11, %v1775_v13 }
 0x870   : > { %v1788_v16 = vadd.f32 %v2071_v14, %v1781_v51  ;;  %v1789_v17 = vadd.f32 %v2071_v14, %v1782_v15 }
 0x872   : > { %v1790_v18 = vpack.c.bf16 %v1789_v17, %v1788_v16 }
 0x874   : > { %2399 = vmatmul.mubr.bf16.vlgmr.msra.gmra.mxu1 %v1790_v18 }
 0x934   : > { %v1896_v19 = vpop.f32.mrf.mxu1 }
 0x935   : > { %v1897_v20 = vadd.f32 %v2072_v43, %v1896_v19 }
 0x936   : > { %v2400_v21 = vpop.f32.mrf.mxu1 }
 0x937   : > { %1904 = vst.msk [vmem:[%s379_s18] sm:$0xff] %vm1903_vm5, %v1897_v20 }
 0x938   : > { %v1899_v22 = vpop.f32.mrf.mxu1 }
 0x939   : > { %v1900_v23 = vadd.f32 %v2072_v43, %v1899_v22 }
 0x93a   : > { %v2401_v24 = vpop.f32.mrf.mxu1 }
 0x93b   : > { %1905 = vst.msk [vmem:[%s379_s18 + $0x8] sm:$0xff] %vm1903_vm5, %v1900_v23 }
 0x93c PF: > { %s20_s13 = sadd.s32 1, %s2529_s13  }
 0x93d   : > { %p17_p4 = scmp.ge.s32.totalorder %s20_s13, 4  }
 0x93f   :  { %19 = sbr.rel (!%p17_p4) target bundleno = 1 (0x1), region = 93 }

// kernel: unet_forward.4
= control target key start
LH: loop header
LB: loop body
LE: loop exit
PB: predicated region body
PF: predicated region fallthrough
CT: control target
= control target key end

     0   :  { %s2543_s17 = smov 0   ;;  %s3098_s0 = inlined_call_operand.vmem [shape: bf16[2,8,256], index: 0, kind: input, shape index: {}]   ;;  %s3099_s1 = inlined_call_operand.vmem [shape: bf16[128,64], index: 1, kind: input, shape index: {}]   ;;  %s3100_s2 = inlined_call_operand.vmem [shape: bf16[128,64], index: 2, kind: input, shape index: {}]   ;;  %s3101_s3 = inlined_call_operand.vmem [shape: bf16[64,384], index: 3, kind: input, shape index: {}]   ;;  %s3102_s4 = inlined_call_operand.vmem [shape: f32[3,128], index: 4, kind: input, shape index: {}]   ;;  %s3103_s5 = inlined_call_operand.vmem [shape: bf16[128,384], index: 5, kind: input, shape index: {}]   ;;  %s3104_s6 = inlined_call_operand.vmem [shape: f32[3,128], index: 6, kind: input, shape index: {}]   ;;  %s3105_s7 = inlined_call_operand.vmem [shape: f32[128,4], index: 7, kind: input, shape index: {}]   ;;  %s3106_s8 = inlined_call_operand.vmem [shape: f32[4,128], index: 8, kind: input, shape index: {}]   ;;  %s3107_s9 = inlined_call_operand.vmem [shape: bf16[128,256], index: 9, kind: input, shape index: {}]   ;;  %s3108_s10 = inlined_call_operand.vmem [shape: f32[1,256], index: 10, kind: input, shape index: {}]   ;;  %s3109_s11 = inlined_call_operand.vmem [shape: bf16[2,8,256], index: 11, kind: output, shape index: {}]  }
   0x1 LB: > { %s1930_s18 = sadd.s32 4294967295, %s2478_s17   ;;  %p1934_p0 = scmp.ge.s32.totalorder %s2478_s17, 1  ;;  %s2478_s17 = sphi %s2543_s17, %s21_s17  }
   0x2   : > { %p337_p1 = scmp.lt.s32.totalorder %s2478_s17, 3 }
   0x4   : > { %p338_p2 = pnand %p1934_p0, %p337_p1 }
   0x5   : > { %p377_p3 = scmp.lt.s32.totalorder (!%p338_p2), %s1930_s18, 1 }
   0x6   : > { %341 = sbr.rel (%p338_p2) target bundleno = 2528 (0x9e0), region = 64 }
   0xb   : > { %v2380_v0 = vld [vmem:[%s3099_s1 + $0x38] sm:$0xff]   ;;  %v2480_v1 = vmov 0.0   ;;  %v2382_v3 = vld [vmem:[%s3099_s1 + $0x30] sm:$0xff]   ;;  %vm2481_vm0 = vmmov 0   ;;  %v2384_v5 = vld [vmem:[%s3099_s1 + $0x28] sm:$0xff]   ;;  %s3111_s18 = smov (!%p377_p3, %s1930_s18), 1 }
   0xc   : > { %2137 = vmatprep.subr.bf16.mxu0 %v2480_v1  ;;  %2157 = vmatprep.subr.bf16.mxu1 %v2480_v1  ;;  %v2381_v2 = vld [vmem:[%s3100_s2 + $0x38] sm:$0xff]   ;;  %v2383_v4 = vld [vmem:[%s3100_s2 + $0x30] sm:$0xff]   ;;  %v2385_v6 = vld [vmem:[%s3100_s2 + $0x28] sm:$0xff]   ;;  %s2026_s20 = sshll.u32 %s3111_s18, 3  ;;  %v2482_v28 = vmov 0   ;;  %vm683_vm1 = vcmask 523264  }
   0xd   : > { %2138 = vmatpush3.bf16.msra.mxu0 %v2380_v0  ;;  %2153 = vmatprep.mubr.msk.bf16.mxu0 %vm2481_vm0, %v2480_v1  ;;  %v2386_v7 = vld [vmem:[%s3099_s1 + $0x20] sm:$0xff]   ;;  %v2388_v9 = vld [vmem:[%s3099_s1 + $0x18] sm:$0xff]   ;;  %s381_s25 = scalar_lea.vmem %s3098_s0, %s2026_s20  ;;  %v2390_v11 = vld [vmem:[%s3099_s1 + $0x10] sm:$0xff]   ;;  %vm885_vm2 = vcmask 1043456   ;;  %vm771_vm3 = vcmask 1040384   ;;  %vm777_vm4 = vcmask 1046528   ;;  %s386_s13 = scalar_lea.vmem %s3109_s11, %s2026_s20 }
   0xe   : > { %2158 = vmatpush3.bf16.msra.mxu1 %v2381_v2  ;;  %2139 = vmatprep.subr.bf16.mxu0 %v2480_v1  ;;  %v2387_v8 = vld [vmem:[%s3100_s2 + $0x20] sm:$0xff]   ;;  %v2389_v10 = vld [vmem:[%s3100_s2 + $0x18] sm:$0xff]   ;;  %v2391_v12 = vld [vmem:[%s3100_s2 + $0x10] sm:$0xff]   ;;  %vm881_vm5 = vcmask 31744  }
   0xf   : > { %2159 = vmatprep.subr.bf16.mxu1 %v2480_v1  ;;  %2173 = vmatprep.mubr.msk.bf16.mxu1 %vm2481_vm0, %v2480_v1  ;;  %v2392_v13 = vld [vmem:[%s3099_s1 + $0x8] sm:$0xff]   ;;  %v388_v14 = vld [vmem:[%s381_s25] sm:$0xff]  ;;  %v2399_v23 = vld [vmem:[%s3101_s3 + $0x30] ss:$12 sps:$4 sm:$0xff]  }
  0x10   : > { %v2393_v15 = vld [vmem:[%s3100_s2 + $0x8] sm:$0xff]   ;;  %v2394_v16 = vld [vmem:[%s3099_s1] sm:$0xff]   ;;  %v390_v18 = vrot.slane %v388_v14, 4  ;;  %v2408_v34 = vld [vmem:[%s3101_s3 + $0x50] ss:$12 sps:$4 sm:$0xff]  }
  0x11   : > { %2140 = vmatpush3.bf16.msra.mxu0 %v2382_v3  ;;  %v2395_v17 = vld [vmem:[%s3100_s2] sm:$0xff]   ;;  %v2398_v19 = vld [vmem:[%s3101_s3 + $0x4c] ss:$12 sps:$4 sm:$0xff]   ;;  %v2396_v21 = vld [vmem:[%s3101_s3 + $0x48] ss:$12 sps:$4 sm:$0xff]  }
  0x12   : > { %2160 = vmatpush3.bf16.msra.mxu1 %v2383_v4  ;;  %2141 = vmatprep.subr.bf16.mxu0 %v2480_v1  ;;  %v392_v20 = vmax.bf16 %v390_v18, %v388_v14  ;;  %v2401_v22 = vld [vmem:[%s3101_s3 + $0x34] ss:$12 sps:$4 sm:$0xff]   ;;  %v2404_v24 = vld [vmem:[%s3101_s3 + $0x1c] ss:$12 sps:$4 sm:$0xff]   ;;  %v2402_v25 = vld [vmem:[%s3101_s3 + $0x18] ss:$12 sps:$4 sm:$0xff]  }
  0x13   : > { %2161 = vmatprep.subr.bf16.mxu1 %v2480_v1  ;;  %v2407_v26 = vld [vmem:[%s3101_s3 + $0x4] ss:$12 sps:$4 sm:$0xff]   ;;  %v2405_v27 = vld [vmem:[%s3101_s3] ss:$12 sps:$4 sm:$0xff]   ;;  %v2411_v42 = vld [vmem:[%s3101_s3 + $0x8] ss:$12 sps:$4 sm:$0xff]  }
  0x14   : > { %v2409_v40 = vld [vmem:[%s3101_s3 + $0x38] ss:$12 sps:$4 sm:$0xff]   ;;  %v2410_v41 = vld [vmem:[%s3101_s3 + $0x20] ss:$12 sps:$4 sm:$0xff]   ;;  %v2686_v44 = vld [vmem:[%s3105_s7 + $0x70] sm:$0xff] }
  0x15   : > { %2142 = vmatpush3.bf16.msra.mxu0 %v2384_v5  ;;  %v2681_v43 = vld [vmem:[%s3105_s7 + $0x78] sm:$0xff]  ;;  %v2693_v45 = vld [vmem:[%s3105_s7 + $0x68] sm:$0xff]  ;;  %v2700_v46 = vld [vmem:[%s3105_s7 + $0x60] sm:$0xff] }
  0x16   : > { %2162 = vmatpush3.bf16.msra.mxu1 %v2385_v6  ;;  %2143 = vmatprep.subr.bf16.mxu0 %v2480_v1  ;;  %v2707_v47 = vld [vmem:[%s3105_s7 + $0x58] sm:$0xff]  ;;  %v2716_v48 = vld [vmem:[%s3105_s7 + $0x50] sm:$0xff]  ;;  %v2723_v49 = vld [vmem:[%s3105_s7 + $0x48] sm:$0xff] }
  0x17   : > { %2163 = vmatprep.subr.bf16.mxu1 %v2480_v1  ;;  %v2730_v50 = vld [vmem:[%s3105_s7 + $0x40] sm:$0xff]  ;;  %v2737_v51 = vld [vmem:[%s3105_s7 + $0x38] sm:$0xff]  ;;  %v2744_v52 = vld [vmem:[%s3105_s7 + $0x30] sm:$0xff] }
  0x18   : > { %v2751_v53 = vld [vmem:[%s3105_s7 + $0x28] sm:$0xff]  ;;  %v2758_v54 = vld [vmem:[%s3105_s7 + $0x20] sm:$0xff]  ;;  %v2763_v55 = vld [vmem:[%s3105_s7 + $0x18] sm:$0xff] }
  0x19   : > { %2144 = vmatpush3.bf16.msra.mxu0 %v2386_v7  ;;  %v2770_v56 = vld [vmem:[%s3105_s7 + $0x10] sm:$0xff]  ;;  %v2777_v57 = vld [vmem:[%s3105_s7 + $0x8] sm:$0xff]  ;;  %v2784_v58 = vld [vmem:[%s3105_s7] sm:$0xff] }
  0x1a   : > { %2164 = vmatpush3.bf16.msra.mxu1 %v2387_v8  ;;  %2145 = vmatprep.subr.bf16.mxu0 %v2480_v1  ;;  %v2792_v59 = vld [vmem:[%s3106_s8] sm:$0xf] }
  0x1b   : > { %2165 = vmatprep.subr.bf16.mxu1 %v2480_v1  ;;  %v1969_v8 = vld [vmem:[%s3102_s4] ss:$0 sm:$0xff] }
  0x1d   : > { %2146 = vmatpush3.bf16.msra.mxu0 %v2388_v9 }
  0x1e   : > { %2166 = vmatpush3.bf16.msra.mxu1 %v2389_v10  ;;  %2147 = vmatprep.subr.bf16.mxu0 %v2480_v1 }
  0x1f   : > { %2167 = vmatprep.subr.bf16.mxu1 %v2480_v1 }
  0x21   : > { %2148 = vmatpush3.bf16.msra.mxu0 %v2390_v11 }
  0x22   : > { %2168 = vmatpush3.bf16.msra.mxu1 %v2391_v12  ;;  %2149 = vmatprep.subr.bf16.mxu0 %v2480_v1 }
  0x23   : > { %2169 = vmatprep.subr.bf16.mxu1 %v2480_v1 }
  0x25   : > { %2150 = vmatpush3.bf16.msra.mxu0 %v2392_v13 }
  0x26   : > { %2170 = vmatpush3.bf16.msra.mxu1 %v2393_v15  ;;  %2151 = vmatprep.subr.bf16.mxu0 %v2480_v1 }
  0x27   : > { %2171 = vmatprep.subr.bf16.mxu1 %v2480_v1 }
  0x29   : > { %2152 = vmatpush3.bf16.msra.mxu0 %v2394_v16 }
  0x2a   : > { %2172 = vmatpush3.bf16.msra.mxu1 %v2395_v17  ;;  %2189 = vmatprep.subr.mxu0 %v2480_v1 }
  0x2b   : > { %695 = vmatprep.subr.bf16.mxu1 %v2398_v19 }
  0x2c   : > { %2154 = vmatmul.mubr.bf16.vlgmr.msra.gmra.mxu0 %v392_v20 }
  0x2d   : > { %2174 = vmatmul.mubr.bf16.vlgmr.msra.gmra.mxu1 %v392_v20  ;;  %2221 = vmatprep.mubr.msk.f32.mxu0 %vm2481_vm0, %v2480_v1 }
  0x2e   : > { %696 = vmatpush1.bf16.msra.mxu1 %v2396_v21  ;;  %719 = vmatprep.mubr.bf16.mxu1 %v2482_v28 }
  0x2f   : > { %697 = vmatprep.subr.bf16.mxu1 %v2401_v22  ;;  %2190 = vmatpush3.msra.mxu0 %v2681_v43 }
  0x30   : > { %2191 = vmatprep.subr.mxu0 %v2480_v1 }
  0x31   : > { %2192 = vmatpush3.msra.mxu0 %v2686_v44 }
  0x32   : > { %698 = vmatpush1.bf16.msra.mxu1 %v2399_v23  ;;  %2193 = vmatprep.subr.mxu0 %v2480_v1  ;;  %v959_v23 = vlaneseq }
  0x33   : > { %699 = vmatprep.subr.bf16.mxu1 %v2404_v24  ;;  %2194 = vmatpush3.msra.mxu0 %v2693_v45 }
  0x34   : > { %2195 = vmatprep.subr.mxu0 %v2480_v1  ;;  %v2842_v24 = vshrl.u32 %v959_v23, 7 }
  0x35   : > { %2196 = vmatpush3.msra.mxu0 %v2700_v46 }
  0x36   : > { %700 = vmatpush1.bf16.msra.mxu1 %v2402_v25  ;;  %2197 = vmatprep.subr.mxu0 %v2480_v1  ;;  %v2845_v25 = vsub.s32 0, %v2842_v24 }
  0x37   : > { %701 = vmatprep.subr.bf16.mxu1 %v2407_v26  ;;  %2198 = vmatpush3.msra.mxu0 %v2707_v47 }
  0x38   : > { %2199 = vmatprep.subr.mxu0 %v2480_v1 }
  0x39   : > { %2200 = vmatpush3.msra.mxu0 %v2716_v48 }
  0x3a   : > { %702 = vmatpush1.bf16.msra.mxu1 %v2405_v27  ;;  %2201 = vmatprep.subr.mxu0 %v2480_v1 }
  0x3b   : > { %2177 = vmatprep.subr.bf16.mxu1 %v2480_v1  ;;  %2202 = vmatpush3.msra.mxu0 %v2723_v49 }
  0x3c   : > { %2203 = vmatprep.subr.mxu0 %v2480_v1 }
  0x3d   : > { %2204 = vmatpush3.msra.mxu0 %v2730_v50 }
  0x3e   : > { %2205 = vmatprep.subr.mxu0 %v2480_v1 }
  0x3f   : > { %2206 = vmatpush3.msra.mxu0 %v2737_v51 }
  0x40   : > { %2207 = vmatprep.subr.mxu0 %v2480_v1 }
  0x41   : > { %2208 = vmatpush3.msra.mxu0 %v2744_v52 }
  0x42   : > { %2209 = vmatprep.subr.mxu0 %v2480_v1 }
  0x43   : > { %2210 = vmatpush3.msra.mxu0 %v2751_v53 }
  0x44   : > { %2211 = vmatprep.subr.mxu0 %v2480_v1 }
  0x45   : > { %2212 = vmatpush3.msra.mxu0 %v2758_v54 }
  0x46   : > { %2213 = vmatprep.subr.mxu0 %v2480_v1 }
  0x47   : > { %2214 = vmatpush3.msra.mxu0 %v2763_v55 }
  0x48   : > { %2215 = vmatprep.subr.mxu0 %v2480_v1 }
  0x49   : > { %2216 = vmatpush3.msra.mxu0 %v2770_v56 }
  0x4a   : > { %2217 = vmatprep.subr.mxu0 %v2480_v1 }
  0x4b   : > { %2218 = vmatpush3.msra.mxu0 %v2777_v57 }
  0x4c   : > { %2219 = vmatprep.subr.mxu0 %v2480_v1 }
  0x4d   : > { %2220 = vmatpush3.msra.mxu0 %v2784_v58 }
  0x4e   : > { %2264 = vmatprep.subr.mxu0 %v2480_v1 }
  0xec   : > { %v491_v29 = vpop.f32.mrf.mxu0 }
  0xed   : > { %v595_v30 = vpop.f32.mrf.mxu1 }
  0xee   : > { %v601_v31 = vmax.f32 %v491_v29, %v595_v30  ;;  %v2155_v32 = vpop.f32.mrf.mxu0 }
  0xef   : > { %v2175_v33 = vpop.f32.mrf.mxu1 }
  0xf0   : > { %v602_v35 = vpack.c.bf16 %v601_v31, %v601_v31  ;;  %v494_v36 = vpop.f32.mrf.mxu0 }
  0xf1   : > { %v598_v37 = vpop.f32.mrf.mxu1 }
  0xf2   : > { %1967 = vmatmul.mubr.msk.bf16.vlgmr.msra.gmra.mxu1 %vm683_vm1, %v602_v35  ;;  %v2156_v38 = vpop.f32.mrf.mxu0 }
  0xf3   : > { %2178 = vmatpush3.bf16.msra.mxu1 %v2408_v34  ;;  %v2176_v39 = vpop.f32.mrf.mxu1  ;;  %2185 = vmatprep.mubr.msk.bf16.mxu1 %vm2481_vm0, %v2480_v1  ;;  %v2414_v38 = vld [vmem:[%s3103_s5 + $0xac] ss:$12 sps:$4 sm:$0xff]  }
  0xf4   : > { %2179 = vmatprep.subr.bf16.mxu1 %v2480_v1  ;;  %v2415_v39 = vld [vmem:[%s3103_s5 + $0xb0] ss:$12 sps:$4 sm:$0xff]  }
  0xf7   : > { %2180 = vmatpush3.bf16.msra.mxu1 %v2409_v40 }
  0xf8   : > { %2181 = vmatprep.subr.bf16.mxu1 %v2480_v1 }
  0xfb   : > { %2182 = vmatpush3.bf16.msra.mxu1 %v2410_v41  ;;  %v2412_v41 = vld [vmem:[%s3103_s5 + $0xa8] ss:$12 sps:$4 sm:$0xff]  }
  0xfc   : > { %2183 = vmatprep.subr.bf16.mxu1 %v2480_v1 }
  0xff   : > { %2184 = vmatpush3.bf16.msra.mxu1 %v2411_v42 }
 0x100   : > { %2224 = vmatprep.subr.mxu1 %v2480_v1 }
 0x102   : > { %2186 = vmatmul.mubr.msk.bf16.vlgmr.msra.gmra.mxu1 %vm683_vm1, %v602_v35 }
 0x103   : > { %2226 = vmatprep.mubr.msk.f32.mxu1 %vm2481_vm0, %v2480_v1  ;;  %2225 = vmatpush3.msk.msra.mxu1 %vm885_vm2, %v2792_v59 }
 0x104   : > { %2229 = vmatprep.subr.mxu1 %v2480_v1 }
 0x1b2   : > { %v721_v60 = vpop.f32.mrf.mxu1 }
 0x1b3   : > { %v769_v0 = vrot.slane %v721_v60, 7  ;;  %v2418_v60 = vld [vmem:[%s3103_s5 + $0x94] ss:$12 sps:$4 sm:$0xff]  }
 0x1b4   : > { %v723_v61 = vpop.f32.mrf.mxu1 }
 0x1b5   : > { %v772_v2 = vsel %vm771_vm3, 0.0, %v769_v0  ;;  %v2422_v0 = vld [vmem:[%s3103_s5 + $0x7c] ss:$12 sps:$4 sm:$0xff]  }
 0x1b6   : > { %v725_v62 = vpop.f32.mrf.mxu1  ;;  %v773_v5 = vadd.f32 %v772_v2, %v723_v61  ;;  %v2420_v2 = vld [vmem:[%s3103_s5 + $0x78] ss:$12 sps:$4 sm:$0xff]  }
 0x1b7   : > { %v2416_v62 = vld [vmem:[%s3103_s5 + $0x90] ss:$12 sps:$4 sm:$0xff]  }
 0x1b8   : > { %v726_v63 = vpop.f32.mrf.mxu1 }
 0x1b9   : > { %v2419_v63 = vld [vmem:[%s3103_s5 + $0x98] ss:$12 sps:$4 sm:$0xff]  }
 0x1c2   : > { %v762_v3 = vpop.f32.mrf.mxu1 }
 0x1c3   : > { %v775_v4 = vrot.slane %v762_v3, 1  ;;  %v2423_v3 = vld [vmem:[%s3103_s5 + $0x80] ss:$12 sps:$4 sm:$0xff]  }
 0x1c4   : > { %v2187_v6 = vpop.f32.mrf.mxu1 }
 0x1c5   : > { %v778_v7 = vsel %vm777_vm4, %v775_v4, 0.0  ;;  %v2426_v4 = vld [vmem:[%s3103_s5 + $0x64] ss:$12 sps:$4 sm:$0xff]   ;;  %v2427_v6 = vld [vmem:[%s3103_s5 + $0x68] ss:$12 sps:$4 sm:$0xff]  }
 0x1c6   : > { %v779_v9 = vadd.f32 %v778_v7, %v773_v5  ;;  %v765_v10 = vpop.f32.mrf.mxu1  ;;  %v2424_v5 = vld [vmem:[%s3103_s5 + $0x60] ss:$12 sps:$4 sm:$0xff]  }
 0x1c7   : > { %v2430_v7 = vld [vmem:[%s3103_s5 + $0x4c] ss:$12 sps:$4 sm:$0xff]   ;;  %v2434_v10 = vld [vmem:[%s3103_s5 + $0x34] ss:$12 sps:$4 sm:$0xff]  }
 0x1c8   : > { %v785_v11 = vadd.f32 %v1969_v8, %v779_v9  ;;  %v2188_v12 = vpop.f32.mrf.mxu1  ;;  %v2428_v8 = vld [vmem:[%s3103_s5 + $0x48] ss:$12 sps:$4 sm:$0xff]   ;;  %v2431_v9 = vld [vmem:[%s3103_s5 + $0x50] ss:$12 sps:$4 sm:$0xff]  }
 0x1c9   : > { %v2435_v12 = vld [vmem:[%s3103_s5 + $0x38] ss:$12 sps:$4 sm:$0xff]  }
 0x1ca   : > { %v786_v13 = vmax.f32 %v785_v11, 0.0  ;;  %v2432_v11 = vld [vmem:[%s3103_s5 + $0x30] ss:$12 sps:$4 sm:$0xff]  }
 0x1cc   : > { %v787_v14 = vrot.slane %v786_v13, 4 }
 0x1ce   : > { %v788_v15 = vadd.f32 %v787_v14, %v786_v13  ;;  %v2436_v14 = vld [vmem:[%s3103_s5 + $0x18] ss:$12 sps:$4 sm:$0xff]  }
 0x1d0   : > { %v789_v16 = vrot.slane %v788_v15, 2 }
 0x1d2   : > { %v790_v17 = vadd.f32 %v789_v16, %v788_v15  ;;  %v2439_v15 = vld [vmem:[%s3103_s5 + $0x20] ss:$12 sps:$4 sm:$0xff]   ;;  %v2442_v16 = vld [vmem:[%s3103_s5 + $0x4] ss:$12 sps:$4 sm:$0xff]  }
 0x1d4   : > { %v791_v18 = vrot.slane %v790_v17, 1 }
 0x1d6   : > { %v792_v19 = vadd.f32 %v791_v18, %v790_v17  ;;  %v2440_v17 = vld [vmem:[%s3103_s5] ss:$12 sps:$4 sm:$0xff]   ;;  %v2443_v18 = vld [vmem:[%s3103_s5 + $0x8] ss:$12 sps:$4 sm:$0xff]  }
 0x1d8   : > { %2222 = vmatmul.mubr.f32.vlgmr.msra.gmra.mxu0 %v792_v19 }
 0x1d9   : > { %2265 = vmatpush3.msk.msra.mxu0 %vm885_vm2, %v2792_v59  ;;  %2266 = vmatprep.mubr.msk.f32.mxu0 %vm2481_vm0, %v2480_v1 }
 0x1da   : > { %1294 = vmatprep.subr.bf16.mxu0 %v2414_v38 }
 0x298   : > { %v875_v20 = vpop.f32.mrf.mxu0 }
 0x299   : > { %v879_v21 = vmul.f32 0.00390625, %v875_v20 }
 0x29a   : > { %v2223_v22 = vpop.f32.mrf.mxu0 }
 0x29b   : > { %2227 = vmatmul.mubr.msk.f32.vlgmr.msra.gmra.mxu1 %vm881_vm5, %v879_v21 }
 0x29c   : > { %2230 = vmatpush3.msra.mxu1 %v2681_v43  ;;  %2261 = vmatprep.mubr.msk.f32.mxu1 %vm2481_vm0, %v2480_v1 }
 0x29d   : > { %2231 = vmatprep.subr.mxu1 %v2480_v1 }
 0x29e   : > { %2232 = vmatpush3.msra.mxu1 %v2686_v44 }
 0x29f   : > { %2233 = vmatprep.subr.mxu1 %v2480_v1 }
 0x2a0   : > { %2234 = vmatpush3.msra.mxu1 %v2693_v45 }
 0x2a1   : > { %2235 = vmatprep.subr.mxu1 %v2480_v1 }
 0x2a2   : > { %2236 = vmatpush3.msra.mxu1 %v2700_v46 }
 0x2a3   : > { %2237 = vmatprep.subr.mxu1 %v2480_v1 }
 0x2a4   : > { %2238 = vmatpush3.msra.mxu1 %v2707_v47 }
 0x2a5   : > { %2239 = vmatprep.subr.mxu1 %v2480_v1 }
 0x2a6   : > { %2240 = vmatpush3.msra.mxu1 %v2716_v48 }
 0x2a7   : > { %2241 = vmatprep.subr.mxu1 %v2480_v1 }
 0x2a8   : > { %2242 = vmatpush3.msra.mxu1 %v2723_v49 }
 0x2a9   : > { %2243 = vmatprep.subr.mxu1 %v2480_v1 }
 0x2aa   : > { %2244 = vmatpush3.msra.mxu1 %v2730_v50 }
 0x2ab   : > { %2245 = vmatprep.subr.mxu1 %v2480_v1 }
 0x2ac   : > { %2246 = vmatpush3.msra.mxu1 %v2737_v51 }
 0x2ad   : > { %2247 = vmatprep.subr.mxu1 %v2480_v1 }
 0x2ae   : > { %2248 = vmatpush3.msra.mxu1 %v2744_v52 }
 0x2af   : > { %2249 = vmatprep.subr.mxu1 %v2480_v1 }
 0x2b0   : > { %2250 = vmatpush3.msra.mxu1 %v2751_v53 }
 0x2b1   : > { %2251 = vmatprep.subr.mxu1 %v2480_v1 }
 0x2b2   : > { %2252 = vmatpush3.msra.mxu1 %v2758_v54 }
 0x2b3   : > { %2253 = vmatprep.subr.mxu1 %v2480_v1 }
 0x2b4   : > { %2254 = vmatpush3.msra.mxu1 %v2763_v55 }
 0x2b5   : > { %2255 = vmatprep.subr.mxu1 %v2480_v1 }
 0x2b6   : > { %2256 = vmatpush3.msra.mxu1 %v2770_v56 }
 0x2b7   : > { %2257 = vmatprep.subr.mxu1 %v2480_v1 }
 0x2b8   : > { %2258 = vmatpush3.msra.mxu1 %v2777_v57 }
 0x2b9   : > { %2259 = vmatprep.subr.mxu1 %v2480_v1 }
 0x2ba   : > { %2260 = vmatpush3.msra.mxu1 %v2784_v58 }
 0x2bb   : > { %2269 = vmatprep.subr.bf16.mxu1 %v2480_v1 }
 0x35b   : > { %v955_v26 = vpop.f32.mrf.mxu1 }
 0x35c   : > { %v962_v27 = vrot.slane %v955_v26, %v2845_v25  ;;  %v1974_v26 = vld [vmem:[%s3102_s4 + $0x1] ss:$0 sm:$0xff] }
 0x35d   : > { %v2228_v29 = vpop.f32.mrf.mxu1 }
 0x35e   : > { %v2848_v30 = vsub.f32 %v786_v13, %v962_v27  ;;  %v2438_v13 = vld [vmem:[%s3103_s5 + $0x1c] ss:$12 sps:$4 sm:$0xff]   ;;  %v1975_v29 = vld [vmem:[%s3102_s4 + $0x2] ss:$0 sm:$0xff] }
 0x360   : > { %v964_v31 = vmul.f32 %v2848_v30, %v2848_v30 }
 0x362   : > { %v965_v32 = vrot.slane %v964_v31, 4 }
 0x364   : > { %v966_v33 = vadd.f32 %v965_v32, %v964_v31 }
 0x366   : > { %v967_v34 = vrot.slane %v966_v33, 2 }
 0x368   : > { %v968_v35 = vadd.f32 %v967_v34, %v966_v33 }
 0x36a   : > { %v969_v36 = vrot.slane %v968_v35, 1 }
 0x36c   : > { %v970_v37 = vadd.f32 %v969_v36, %v968_v35 }
 0x36e   : > { %2262 = vmatmul.mubr.f32.vlgmr.msra.gmra.mxu1 %v970_v37 }
 0x36f   : > { %2285 = vmatprep.mubr.msk.bf16.mxu1 %vm2481_vm0, %v2480_v1  ;;  %2270 = vmatpush3.bf16.msra.mxu1 %v2415_v39 }
 0x370   : > { %2271 = vmatprep.subr.bf16.mxu1 %v2480_v1 }
 0x373   : > { %2272 = vmatpush3.bf16.msra.mxu1 %v2419_v63 }
 0x374   : > { %2273 = vmatprep.subr.bf16.mxu1 %v2480_v1 }
 0x377   : > { %2274 = vmatpush3.bf16.msra.mxu1 %v2423_v3 }
 0x378   : > { %2275 = vmatprep.subr.bf16.mxu1 %v2480_v1 }
 0x37b   : > { %2276 = vmatpush3.bf16.msra.mxu1 %v2427_v6 }
 0x37c   : > { %2277 = vmatprep.subr.bf16.mxu1 %v2480_v1 }
 0x37f   : > { %2278 = vmatpush3.bf16.msra.mxu1 %v2431_v9 }
 0x380   : > { %2279 = vmatprep.subr.bf16.mxu1 %v2480_v1 }
 0x383   : > { %2280 = vmatpush3.bf16.msra.mxu1 %v2435_v12 }
 0x384   : > { %2281 = vmatprep.subr.bf16.mxu1 %v2480_v1 }
 0x387   : > { %2282 = vmatpush3.bf16.msra.mxu1 %v2439_v15  ;;  %v2455_v15 = vld [vmem:[%s3107_s9 + $0x44] ss:$8 sps:$4 sm:$0xff]  }
 0x388   : > { %2283 = vmatprep.subr.bf16.mxu1 %v2480_v1 }
 0x38b   : > { %2284 = vmatpush3.bf16.msra.mxu1 %v2443_v18  ;;  %v2461_v18 = vld [vmem:[%s3107_s9 + $0x24] ss:$8 sps:$4 sm:$0xff]  }
 0x38c   : > { %2324 = vmatprep.subr.mxu1 %v2480_v1 }
 0x42e   : > { %v1037_v40 = vpop.f32.mrf.mxu1 }
 0x42f   : > { %v1041_v42 = vmul.f32 0.00390625, %v1037_v40 }
 0x430   : > { %v2263_v61 = vpop.f32.mrf.mxu1 }
 0x431   : > { %2267 = vmatmul.mubr.msk.f32.vlgmr.msra.gmra.mxu0 %vm881_vm5, %v1041_v42  ;;  %v2000_v61 = vld [vmem:[%s3104_s6] ss:$0 sm:$0xff] }
 0x432   : > { %1295 = vmatpush1.bf16.msra.mxu0 %v2412_v41  ;;  %1326 = vmatprep.mubr.bf16.mxu0 %v2482_v28 }
 0x433   : > { %1296 = vmatprep.subr.bf16.mxu0 %v2418_v60 }
 0x436   : > { %1297 = vmatpush1.bf16.msra.mxu0 %v2416_v62 }
 0x437   : > { %1298 = vmatprep.subr.bf16.mxu0 %v2422_v0 }
 0x43a   : > { %1299 = vmatpush1.bf16.msra.mxu0 %v2420_v2 }
 0x43b   : > { %1300 = vmatprep.subr.bf16.mxu0 %v2426_v4 }
 0x43e   : > { %1301 = vmatpush1.bf16.msra.mxu0 %v2424_v5 }
 0x43f   : > { %1302 = vmatprep.subr.bf16.mxu0 %v2430_v7 }
 0x442   : > { %1303 = vmatpush1.bf16.msra.mxu0 %v2428_v8 }
 0x443   : > { %1304 = vmatprep.subr.bf16.mxu0 %v2434_v10 }
 0x446   : > { %1305 = vmatpush1.bf16.msra.mxu0 %v2432_v11 }
 0x447   : > { %1306 = vmatprep.subr.bf16.mxu0 %v2438_v13  ;;  %v2452_v13 = vld [vmem:[%s3107_s9 + $0x54] ss:$8 sps:$4 sm:$0xff]  }
 0x44a   : > { %1307 = vmatpush1.bf16.msra.mxu0 %v2436_v14  ;;  %v2450_v14 = vld [vmem:[%s3107_s9 + $0x50] ss:$8 sps:$4 sm:$0xff]  }
 0x44b   : > { %1308 = vmatprep.subr.bf16.mxu0 %v2442_v16  ;;  %v2458_v16 = vld [vmem:[%s3107_s9 + $0x34] ss:$8 sps:$4 sm:$0xff]  }
 0x44e   : > { %1309 = vmatpush1.bf16.msra.mxu0 %v2440_v17  ;;  %v2456_v17 = vld [vmem:[%s3107_s9 + $0x30] ss:$8 sps:$4 sm:$0xff]  }
 0x44f   : > { %2289 = vmatprep.subr.mxu0 %v2480_v1 }
 0x4f1   : > { %v1111_v19 = vpop.f32.mrf.mxu0 }
 0x4f2   : > { %v1112_v20 = vadd.f32 1e-05, %v1111_v19  ;;  %v2459_v19 = vld [vmem:[%s3107_s9 + $0x20] ss:$8 sps:$4 sm:$0xff]  }
 0x4f3   : > { %v2268_v21 = vpop.f32.mrf.mxu0 }
 0x4f4   : > { %2468 = vrsqrt.f32 %v1112_v20  ;;  %v2464_v20 = vld [vmem:[%s3107_s9 + $0x14] ss:$8 sps:$4 sm:$0xff]   ;;  %v2462_v21 = vld [vmem:[%s3107_s9 + $0x10] ss:$8 sps:$4 sm:$0xff]  }
 0x501   : > { %v2469_v22 = vpop.eup %2468 }
 0x502   : > { %v1119_v23 = vrot.slane %v2469_v22, %v2845_v25  ;;  %v2467_v22 = vld [vmem:[%s3107_s9 + $0x4] ss:$8 sps:$4 sm:$0xff]  }
 0x504   : > { %v1120_v27 = vmul.f32 %v1119_v23, %v2848_v30  ;;  %v2465_v23 = vld [vmem:[%s3107_s9] ss:$8 sps:$4 sm:$0xff]  }
 0x506   : > { %v1126_v31 = vmul.f32 %v1974_v26, %v1120_v27 }
 0x508   : > { %v1132_v32 = vadd.f32 %v1975_v29, %v1126_v31 }
 0x50a   : > { %v1133_v33 = vpack.c.bf16 %v1132_v32, %v1132_v32 }
 0x50c   : > { %1327 = vmatmul.mubr.bf16.vlgmr.msra.gmra.mxu0 %v1133_v33  ;;  %2286 = vmatmul.mubr.bf16.vlgmr.msra.gmra.mxu1 %v1133_v33  ;;  %v2005_v33 = vld [vmem:[%s3104_s6 + $0x1] ss:$0 sm:$0xff] }
 0x50d   : > { %2290 = vmatpush3.msra.mxu0 %v2681_v43  ;;  %2321 = vmatprep.mubr.msk.f32.mxu0 %vm2481_vm0, %v2480_v1 }
 0x50e   : > { %2291 = vmatprep.subr.mxu0 %v2480_v1  ;;  %2325 = vmatpush3.msk.msra.mxu1 %vm885_vm2, %v2792_v59 }
 0x50f   : > { %2292 = vmatpush3.msra.mxu0 %v2686_v44  ;;  %2326 = vmatprep.mubr.msk.f32.mxu1 %vm2481_vm0, %v2480_v1 }
 0x510   : > { %2293 = vmatprep.subr.mxu0 %v2480_v1  ;;  %2329 = vmatprep.subr.mxu1 %v2480_v1 }
 0x511   : > { %2294 = vmatpush3.msra.mxu0 %v2693_v45 }
 0x512   : > { %2295 = vmatprep.subr.mxu0 %v2480_v1 }
 0x513   : > { %2296 = vmatpush3.msra.mxu0 %v2700_v46 }
 0x514   : > { %2297 = vmatprep.subr.mxu0 %v2480_v1 }
 0x515   : > { %2298 = vmatpush3.msra.mxu0 %v2707_v47 }
 0x516   : > { %2299 = vmatprep.subr.mxu0 %v2480_v1 }
 0x517   : > { %2300 = vmatpush3.msra.mxu0 %v2716_v48 }
 0x518   : > { %2301 = vmatprep.subr.mxu0 %v2480_v1 }
 0x519   : > { %2302 = vmatpush3.msra.mxu0 %v2723_v49 }
 0x51a   : > { %2303 = vmatprep.subr.mxu0 %v2480_v1 }
 0x51b   : > { %2304 = vmatpush3.msra.mxu0 %v2730_v50 }
 0x51c   : > { %2305 = vmatprep.subr.mxu0 %v2480_v1 }
 0x51d   : > { %2306 = vmatpush3.msra.mxu0 %v2737_v51 }
 0x51e   : > { %2307 = vmatprep.subr.mxu0 %v2480_v1 }
 0x51f   : > { %2308 = vmatpush3.msra.mxu0 %v2744_v52 }
 0x520   : > { %2309 = vmatprep.subr.mxu0 %v2480_v1 }
 0x521   : > { %2310 = vmatpush3.msra.mxu0 %v2751_v53 }
 0x522   : > { %2311 = vmatprep.subr.mxu0 %v2480_v1 }
 0x523   : > { %2312 = vmatpush3.msra.mxu0 %v2758_v54 }
 0x524   : > { %2313 = vmatprep.subr.mxu0 %v2480_v1 }
 0x525   : > { %2314 = vmatpush3.msra.mxu0 %v2763_v55 }
 0x526   : > { %2315 = vmatprep.subr.mxu0 %v2480_v1 }
 0x527   : > { %2316 = vmatpush3.msra.mxu0 %v2770_v56 }
 0x528   : > { %2317 = vmatprep.subr.mxu0 %v2480_v1 }
 0x529   : > { %2318 = vmatpush3.msra.mxu0 %v2777_v57 }
 0x52a   : > { %2319 = vmatprep.subr.mxu0 %v2480_v1 }
 0x52b   : > { %2320 = vmatpush3.msra.mxu0 %v2784_v58 }
 0x52c   : > { %2364 = vmatprep.subr.mxu0 %v2480_v1 }
 0x5cc   : > { %v1328_v30 = vpop.f32.mrf.mxu0  ;;  %v1369_v34 = vpop.f32.mrf.mxu1 }
 0x5cd   : > { %v1376_v35 = vrot.slane %v1328_v30, 7  ;;  %v1381_v36 = vrot.slane %v1369_v34, 1  ;;  %v2006_v34 = vld [vmem:[%s3104_s6 + $0x2] ss:$0 sm:$0xff] }
 0x5ce   : > { %v1330_v37 = vpop.f32.mrf.mxu0  ;;  %v2287_v38 = vpop.f32.mrf.mxu1 }
 0x5cf   : > { %v1378_v39 = vsel %vm771_vm3, 0.0, %v1376_v35  ;;  %v1383_v60 = vsel %vm777_vm4, %v1381_v36, 0.0  ;;  %v1741_v38 = vsub.s32 1, %v2842_v24 }
 0x5d0   : > { %v1379_v40 = vadd.f32 %v1378_v39, %v1330_v37  ;;  %v1332_v41 = vpop.f32.mrf.mxu0  ;;  %v1372_v42 = vpop.f32.mrf.mxu1  ;;  %v1733_v39 = vld [vmem:[%s3108_s10] sm:$0x3] }
 0x5d1   : > { %v1742_v41 = vrot.slane %v1733_v39, %v1741_v38 }
 0x5d2   : > { %v1384_v62 = vadd.f32 %v1383_v60, %v1379_v40  ;;  %v1333_v63 = vpop.f32.mrf.mxu0  ;;  %v2288_v0 = vpop.f32.mrf.mxu1  ;;  %v1738_v40 = vrot.slane %v1733_v39, %v2845_v25 }
 0x5d4   : > { %v1390_v2 = vadd.f32 %v2000_v61, %v1384_v62 }
 0x5d6   : > { %v1391_v3 = vmax.f32 %v1390_v2, 0.0 }
 0x5d8   : > { %v1392_v4 = vrot.slane %v1391_v3, 4 }
 0x5da   : > { %v1393_v5 = vadd.f32 %v1392_v4, %v1391_v3 }
 0x5dc   : > { %v1394_v6 = vrot.slane %v1393_v5, 2 }
 0x5de   : > { %v1395_v7 = vadd.f32 %v1394_v6, %v1393_v5 }
 0x5e0   : > { %v1396_v8 = vrot.slane %v1395_v7, 1 }
 0x5e2   : > { %v1397_v9 = vadd.f32 %v1396_v8, %v1395_v7 }
 0x5e4   : > { %2322 = vmatmul.mubr.f32.vlgmr.msra.gmra.mxu0 %v1397_v9 }
 0x5e5   : > { %2365 = vmatpush3.msk.msra.mxu0 %vm885_vm2, %v2792_v59  ;;  %2366 = vmatprep.mubr.msk.f32.mxu0 %vm2481_vm0, %v2480_v1  ;;  %v2447_v59 = vld [vmem:[%s3107_s9 + $0x60] ss:$8 sps:$4 sm:$0xff]  }
 0x6a4   : > { %v1464_v10 = vpop.f32.mrf.mxu0 }
 0x6a5   : > { %v1468_v11 = vmul.f32 0.00390625, %v1464_v10 }
 0x6a6   : > { %v2323_v12 = vpop.f32.mrf.mxu0 }
 0x6a7   : > { %2327 = vmatmul.mubr.msk.f32.vlgmr.msra.gmra.mxu1 %vm881_vm5, %v1468_v11 }
 0x6a8   : > { %2330 = vmatpush3.msra.mxu1 %v2681_v43  ;;  %2361 = vmatprep.mubr.msk.f32.mxu1 %vm2481_vm0, %v2480_v1 }
 0x6a9   : > { %2331 = vmatprep.subr.mxu1 %v2480_v1 }
 0x6aa   : > { %2332 = vmatpush3.msra.mxu1 %v2686_v44 }
 0x6ab   : > { %2333 = vmatprep.subr.mxu1 %v2480_v1 }
 0x6ac   : > { %2334 = vmatpush3.msra.mxu1 %v2693_v45 }
 0x6ad   : > { %2335 = vmatprep.subr.mxu1 %v2480_v1 }
 0x6ae   : > { %2336 = vmatpush3.msra.mxu1 %v2700_v46 }
 0x6af   : > { %2337 = vmatprep.subr.mxu1 %v2480_v1 }
 0x6b0   : > { %2338 = vmatpush3.msra.mxu1 %v2707_v47 }
 0x6b1   : > { %2339 = vmatprep.subr.mxu1 %v2480_v1 }
 0x6b2   : > { %2340 = vmatpush3.msra.mxu1 %v2716_v48 }
 0x6b3   : > { %2341 = vmatprep.subr.mxu1 %v2480_v1 }
 0x6b4   : > { %2342 = vmatpush3.msra.mxu1 %v2723_v49 }
 0x6b5   : > { %2343 = vmatprep.subr.mxu1 %v2480_v1 }
 0x6b6   : > { %2344 = vmatpush3.msra.mxu1 %v2730_v50 }
 0x6b7   : > { %2345 = vmatprep.subr.mxu1 %v2480_v1 }
 0x6b8   : > { %2346 = vmatpush3.msra.mxu1 %v2737_v51 }
 0x6b9   : > { %2347 = vmatprep.subr.mxu1 %v2480_v1 }
 0x6ba   : > { %2348 = vmatpush3.msra.mxu1 %v2744_v52 }
 0x6bb   : > { %2349 = vmatprep.subr.mxu1 %v2480_v1 }
 0x6bc   : > { %2350 = vmatpush3.msra.mxu1 %v2751_v53 }
 0x6bd   : > { %2351 = vmatprep.subr.mxu1 %v2480_v1 }
 0x6be   : > { %2352 = vmatpush3.msra.mxu1 %v2758_v54  ;;  %v2446_v54 = vld [vmem:[%s3107_s9 + $0x74] ss:$8 sps:$4 sm:$0xff]  }
 0x6bf   : > { %2353 = vmatprep.subr.mxu1 %v2480_v1  ;;  %1825 = vmatprep.subr.bf16.mxu0 %v2446_v54 }
 0x6c0   : > { %2354 = vmatpush3.msra.mxu1 %v2763_v55  ;;  %v2444_v55 = vld [vmem:[%s3107_s9 + $0x70] ss:$8 sps:$4 sm:$0xff]  }
 0x6c1   : > { %2355 = vmatprep.subr.mxu1 %v2480_v1 }
 0x6c2   : > { %2356 = vmatpush3.msra.mxu1 %v2770_v56 }
 0x6c3   : > { %2357 = vmatprep.subr.mxu1 %v2480_v1 }
 0x6c4   : > { %2358 = vmatpush3.msra.mxu1 %v2777_v57  ;;  %v2449_v57 = vld [vmem:[%s3107_s9 + $0x64] ss:$8 sps:$4 sm:$0xff]  }
 0x6c5   : > { %2359 = vmatprep.subr.mxu1 %v2480_v1 }
 0x6c6   : > { %2360 = vmatpush3.msra.mxu1 %v2784_v58 }
 0x767   : > { %v1538_v43 = vpop.f32.mrf.mxu1 }
 0x768   : > { %v1545_v44 = vrot.slane %v1538_v43, %v2845_v25 }
 0x769   : > { %v2328_v45 = vpop.f32.mrf.mxu1 }
 0x76a   : > { %v1546_v46 = vsub.f32 %v1391_v3, %v1545_v44 }
 0x76c   : > { %v1547_v47 = vmul.f32 %v1546_v46, %v1546_v46 }
 0x76e   : > { %v1548_v48 = vrot.slane %v1547_v47, 4 }
 0x770   : > { %v1549_v49 = vadd.f32 %v1548_v48, %v1547_v47 }
 0x772   : > { %v1550_v50 = vrot.slane %v1549_v49, 2 }
 0x774   : > { %v1551_v51 = vadd.f32 %v1550_v50, %v1549_v49 }
 0x776   : > { %v1552_v52 = vrot.slane %v1551_v51, 1 }
 0x778   : > { %v1553_v53 = vadd.f32 %v1552_v52, %v1551_v51 }
 0x77a   : > { %2362 = vmatmul.mubr.f32.vlgmr.msra.gmra.mxu1 %v1553_v53 }
 0x83a   : > { %v1620_v1 = vpop.f32.mrf.mxu1 }
 0x83b   : > { %v1624_v56 = vmul.f32 0.00390625, %v1620_v1 }
 0x83c   : > { %v2363_v58 = vpop.f32.mrf.mxu1 }
 0x83d   : > { %2367 = vmatmul.mubr.msk.f32.vlgmr.msra.gmra.mxu0 %vm881_vm5, %v1624_v56 }
 0x83e   : > { %1826 = vmatpush1.bf16.msra.mxu0 %v2444_v55  ;;  %1857 = vmatprep.mubr.bf16.mxu0 %v2482_v28  ;;  %v2453_v28 = vld [vmem:[%s3107_s9 + $0x40] ss:$8 sps:$4 sm:$0xff]  }
 0x83f   : > { %1827 = vmatprep.subr.bf16.mxu0 %v2449_v57 }
 0x842   : > { %1828 = vmatpush1.bf16.msra.mxu0 %v2447_v59 }
 0x843   : > { %1829 = vmatprep.subr.bf16.mxu0 %v2452_v13 }
 0x846   : > { %1830 = vmatpush1.bf16.msra.mxu0 %v2450_v14 }
 0x847   : > { %1831 = vmatprep.subr.bf16.mxu0 %v2455_v15 }
 0x84a   : > { %1832 = vmatpush1.bf16.msra.mxu0 %v2453_v28 }
 0x84b   : > { %1833 = vmatprep.subr.bf16.mxu0 %v2458_v16 }
 0x84e   : > { %1834 = vmatpush1.bf16.msra.mxu0 %v2456_v17 }
 0x84f   : > { %1835 = vmatprep.subr.bf16.mxu0 %v2461_v18 }
 0x852   : > { %1836 = vmatpush1.bf16.msra.mxu0 %v2459_v19 }
 0x853   : > { %1837 = vmatprep.subr.bf16.mxu0 %v2464_v20 }
 0x856   : > { %1838 = vmatpush1.bf16.msra.mxu0 %v2462_v21 }
 0x857   : > { %1839 = vmatprep.subr.bf16.mxu0 %v2467_v22 }
 0x85a   : > { %1840 = vmatpush1.bf16.msra.mxu0 %v2465_v23 }
 0x8fd   : > { %v1694_v26 = vpop.f32.mrf.mxu0 }
 0x8fe   : > { %v1695_v27 = vadd.f32 1e-05, %v1694_v26 }
 0x8ff   : > { %v2368_v29 = vpop.f32.mrf.mxu0 }
 0x900   : > { %2470 = vrsqrt.f32 %v1695_v27 }
 0x90d   : > { %v2471_v31 = vpop.eup %2470 }
 0x90e   : > { %v1702_v32 = vrot.slane %v2471_v31, %v2845_v25 }
 0x910   : > { %v1703_v30 = vmul.f32 %v1702_v32, %v1546_v46 }
 0x912   : > { %v1709_v35 = vmul.f32 %v2005_v33, %v1703_v30 }
 0x914   : > { %v1715_v36 = vadd.f32 %v2006_v34, %v1709_v35 }
 0x916   : > { %v1716_v37 = vpack.c.bf16 %v1715_v36, %v1715_v36 }
 0x918   : > { %1858 = vmatmul.mubr.bf16.vlgmr.msra.gmra.mxu0 %v1716_v37 }
 0x9d8   : > { %v1859_v42 = vpop.f32.mrf.mxu0 }
 0x9d9   : > { %v1860_v61 = vadd.f32 %v1859_v42, %v1738_v40 }
 0x9da   : > { %v1861_v60 = vpop.f32.mrf.mxu0 }
 0x9db   : > { %v1862_v62 = vadd.f32 %v1861_v60, %v1742_v41 }
 0x9dc   : > { %v1863_v63 = vpop.f32.mrf.mxu0 }
 0x9dd   : > { %v2028_v0 = vpack.c.bf16 %v1862_v62, %v1860_v61 }
 0x9de   : > { %v1864_v2 = vpop.f32.mrf.mxu0 }
 0x9df   : > { %1874 = vst [vmem:[%s386_s13] sm:$0xff] %v2028_v0 }
 0x9e0 PF: > { %s21_s17 = sadd.s32 1, %s2478_s17  }
 0x9e1   : > { %p18_p4 = scmp.ge.s32.totalorder %s21_s17, 4  }
 0x9e3   :  { %20 = sbr.rel (!%p18_p4) target bundleno = 1 (0x1), region = 94 }

</bundles_post_ra>
